<compile_context>
chip_gen: v6e
topology: v6e:2x2x1
jax: 0.10.0
libtpu: 0.0.40
codegen_flags: <defaults>
</compile_context>

<pallas_src>
import functools

import numpy as np
import jax
import jax.numpy as jnp
from jax.experimental import pallas as pl
from jax.experimental.pallas import tpu as pltpu


# ---------------------------------------------------------------------------
# Fused forward kernel
# ---------------------------------------------------------------------------
def _fused_kernel(nb, x_ref, m1_ref, bq1_ref, m2e_ref, m2o_ref, bq2_ref,
                  m3e_ref, m3o_ref, bq3_ref, w1_ref, b1_ref, w2_ref, b2_ref,
                  w3_ref, b3_ref, o_ref):
    dot = functools.partial(jnp.dot, preferred_element_type=jnp.float32)
    bf16 = jnp.bfloat16

    # TODO(synk): Quanv2D evaluates a parameterized quantum circuit (qsimcirq)
    # per 2x2 patch; no Pallas equivalent exists, so each quanv layer is
    # modeled as a classical 2x2 conv with deterministic synthetic weights.
    x = x_ref[...]                                              # (28*nb, 28)

    # quanv1: 28x28x1 -> 27x27x8  (two banded matmuls, one per dy tap)
    r = 27 * nb
    c1 = dot(x[:r], m1_ref[0]) + dot(x[nb:nb + r], m1_ref[1]) + bq1_ref[...]

    # quanv2: 27x27x8 -> 26x26x16, output columns split even/odd so maxpool1's
    # x-direction max needs no cross-lane shift; conv bias added after the
    # pool (max(a+b, c+b) == max(a, c) + b).
    r = 26 * nb
    t0, t1 = c1[:r], c1[nb:nb + r]
    c2e = dot(t0, m2e_ref[0]) + dot(t1, m2e_ref[1])
    c2o = dot(t0, m2o_ref[0]) + dot(t1, m2o_ref[1])
    m = jnp.maximum(c2e, c2o)                                   # x max
    r = 25 * nb
    p1 = jnp.maximum(m[:r], m[nb:nb + r]) + bq2_ref[...]        # y max -> 13x13x16

    # quanv3: 13x13x16 -> 12x12x16 on the stride-2 grid, same even/odd trick,
    # then maxpool2 -> 6x6x16.
    r = 23 * nb
    t0, t1 = p1[:r], p1[2 * nb:2 * nb + r]
    c3e = dot(t0, m3e_ref[0]) + dot(t1, m3e_ref[1])
    c3o = dot(t0, m3o_ref[0]) + dot(t1, m3o_ref[1])
    m = jnp.maximum(c3e, c3o)
    r = 21 * nb
    p2 = jnp.maximum(m[:r], m[2 * nb:2 * nb + r]) + bq3_ref[...]

    # flatten + fc1 fused: one (nb,96)@(96,896) matmul per valid spatial row;
    # PyTorch's channel-major flatten order is baked into w1's row layout.
    p2 = p2.astype(bf16)
    h = b1_ref[...]
    for io in range(6):
        h = h + dot(p2[4 * io * nb:(4 * io + 1) * nb, :], w1_ref[io])
    h = h * (1.0 / (1.0 + jnp.exp(-h)))                         # exact SiLU
    # TODO(synk): nn.Dropout(p=0.5) is identity at inference; training-mode
    # dropout (random mask + 1/(1-p) scaling) is not implemented.
    h = dot(h.astype(bf16), w2_ref[...]) + b2_ref[...]
    h = jnp.maximum(h, 0.0)                                     # ReLU
    o_ref[...] = dot(h.astype(bf16), w3_ref[...]) + b3_ref[...]


# ---------------------------------------------------------------------------
# Wrapper
# ---------------------------------------------------------------------------
def simple_q_classifier_forward(x_nchw, prep, *, block_images=8):
    """x_nchw: (N, 1, 28, 28) f32; prep: output of prepare_params().

    block_images (NB) must be a multiple of 8 so every row slice in the kernel
    is sublane-aligned; sweep 8..64 for throughput at large batch.
    """
    if block_images % 8:
        raise ValueError("block_images must be a multiple of 8")
    nb = block_images
    n = x_nchw.shape[0]
    g = pl.cdiv(n, nb)
    n_pad = g * nb

    # Layout plumbing (outside the kernel): rows = spatial_row*nb + image,
    # lanes = spatial_col.  Pad the batch to a whole number of blocks.
    x = x_nchw.reshape(n, 28, 28).astype(jnp.float32)
    x = jnp.pad(x, ((0, n_pad - n), (0, 0), (0, 0)))
    x = x.reshape(g, nb, 28, 28).transpose(0, 2, 1, 3).reshape(g * 28 * nb, 28)

    def full(a):  # whole-array, grid-invariant block (weights stay VMEM-resident)
        return pl.BlockSpec(a.shape, lambda b: (0,) * a.ndim)

    out = pl.pallas_call(
        functools.partial(_fused_kernel, nb),
        out_shape=jax.ShapeDtypeStruct((n_pad, 128), jnp.float32),
        grid=(g,),
        in_specs=[
            pl.BlockSpec((28 * nb, 28), lambda b: (b, 0)),       # input block
            full(prep["m1"]), full(prep["bq1"]),
            full(prep["m2e"]), full(prep["m2o"]), full(prep["bq2"]),
            full(prep["m3e"]), full(prep["m3o"]), full(prep["bq3"]),
            full(prep["w1"]), full(prep["b1"]),
            full(prep["w2"]), full(prep["b2"]),
            full(prep["w3"]), full(prep["b3"]),
        ],
        out_specs=pl.BlockSpec((nb, 128), lambda b: (b, 0)),
        compiler_params=pltpu.CompilerParams(
            dimension_semantics=("parallel",),
            vmem_limit_bytes=32 * 1024 * 1024,   # block footprint ~4 MB + headroom
        ),
    )(x, prep["m1"], prep["bq1"], prep["m2e"], prep["m2o"], prep["bq2"],
      prep["m3e"], prep["m3o"], prep["bq3"], prep["w1"], prep["b1"],
      prep["w2"], prep["b2"], prep["w3"], prep["b3"])
    return out[:n, :5]                    # drop batch padding + padded logits


# ---------------------------------------------------------------------------
# Deterministic synthetic parameters (PyTorch layouts) + one-time kernel prep
# ---------------------------------------------------------------------------
def init_params(key):
    ks = jax.random.split(key, 12)

    def w_init(k, shape, fan_in):
        return jax.random.normal(k, shape, jnp.float32) / jnp.sqrt(float(fan_in))

    return {
        # conv weights stored (kh, kw, Cin, Cout)
        "w_q1": w_init(ks[0], (2, 2, 1, 8), 4),
        "b_q1": 0.01 * jax.random.normal(ks[1], (8,), jnp.float32),
        "w_q2": w_init(ks[2], (2, 2, 8, 16), 32),
        "b_q2": 0.01 * jax.random.normal(ks[3], (16,), jnp.float32),
        "w_q3": w_init(ks[4], (2, 2, 16, 16), 64),
        "b_q3": 0.01 * jax.random.normal(ks[5], (16,), jnp.float32),
        # MLP 576 -> 800 -> 100 -> 5, weights stored (in, out); w1's input
        # index is PyTorch's channel-major flatten index c*36 + i*6 + j.
        "w1": w_init(ks[6], (576, 800), 576),
        "b1": 0.01 * jax.random.normal(ks[7], (800,), jnp.float32),
        "w2": w_init(ks[8], (800, 100), 800),
        "b2": 0.01 * jax.random.normal(ks[9], (100,), jnp.float32),
        "w3": w_init(ks[10], (100, 5), 100),
        "b3": 0.01 * jax.random.normal(ks[11], (5,), jnp.float32),
    }


def prepare_params(params):
    """One-time layout/dtype prep (run outside the jitted forward)."""

    def conv_mats(w, out_cols, in_group, in_lanes):
        """Banded lane-space matrices (one per dy tap) for a 2x2/stride-1 conv.

        out_cols: conv output columns packed consecutively into output lanes
                  (k-th entry -> lanes k*cout .. k*cout+cout-1).
        in_group: lane stride of one input column (== cin).
        """
        w = np.asarray(w, np.float32)                  # (2, 2, cin, cout)
        cin, cout = w.shape[2], w.shape[3]
        m = np.zeros((2, in_lanes, len(out_cols) * cout), np.float32)
        for dy in range(2):
            for dx in range(2):
                for k, jo in enumerate(out_cols):
                    r0 = (jo + dx) * in_group
                    m[dy, r0:r0 + cin, k * cout:(k + 1) * cout] = w[dy, dx]
        return jnp.asarray(m)

    def tile_bias(b, reps):                            # per-channel -> per-lane
        return jnp.asarray(np.tile(np.asarray(b, np.float32), reps)[None, :])

    # fc1: fold PyTorch's channel-major flatten (c*36 + i*6 + j) and the pooled
    # lane layout (16*j + c) into 6 per-spatial-row blocks; pad 800 -> 896.
    w1 = np.asarray(params["w1"], np.float32)          # (576, 800)
    w1b = np.zeros((6, 96, 896), np.float32)
    for io in range(6):
        for jo in range(6):
            w1b[io, 16 * jo:16 * jo + 16, :800] = w1[np.arange(16) * 36 + io * 6 + jo, :]
    w2 = np.zeros((896, 128), np.float32)
    w2[:800, :100] = np.asarray(params["w2"], np.float32)
    w3 = np.zeros((128, 128), np.float32)
    w3[:100, :5] = np.asarray(params["w3"], np.float32)
    b1 = np.zeros((1, 896), np.float32); b1[0, :800] = np.asarray(params["b1"])
    b2 = np.zeros((1, 128), np.float32); b2[0, :100] = np.asarray(params["b2"])
    b3 = np.zeros((1, 128), np.float32); b3[0, :5] = np.asarray(params["b3"])

    return {
        "m1": conv_mats(params["w_q1"], range(27), 1, 28),            # (2,28,216)
        "bq1": tile_bias(params["b_q1"], 27),                         # (1,216)
        "m2e": conv_mats(params["w_q2"], range(0, 26, 2), 8, 216),    # (2,216,208)
        "m2o": conv_mats(params["w_q2"], range(1, 26, 2), 8, 216),
        "bq2": tile_bias(params["b_q2"], 13),                         # (1,208)
        "m3e": conv_mats(params["w_q3"], range(0, 12, 2), 16, 208),   # (2,208,96)
        "m3o": conv_mats(params["w_q3"], range(1, 12, 2), 16, 208),
        "bq3": tile_bias(params["b_q3"], 6),                          # (1,96)
        "w1": jnp.asarray(w1b, jnp.bfloat16), "b1": jnp.asarray(b1),
        "w2": jnp.asarray(w2, jnp.bfloat16), "b2": jnp.asarray(b2),
        "w3": jnp.asarray(w3, jnp.bfloat16), "b3": jnp.asarray(b3),
    }


# ---------------------------------------------------------------------------
# Pure-JAX reference (f32) for tolerance checking
# ---------------------------------------------------------------------------
def reference_forward(x_nchw, params):
    hi = jax.lax.Precision.HIGHEST
    dn = ("NHWC", "HWIO", "NHWC")

    def conv(v, w, b):
        return jax.lax.conv_general_dilated(
            v, w, (1, 1), "VALID", dimension_numbers=dn, precision=hi) + b

    def pool(v):
        return jax.lax.reduce_window(
            v, -jnp.inf, jax.lax.max, (1, 2, 2, 1), (1, 2, 2, 1), "VALID")

    v = jnp.transpose(x_nchw, (0, 2, 3, 1)).astype(jnp.float32)
    v = conv(v, params["w_q1"], params["b_q1"])
    v = conv(v, params["w_q2"], params["b_q2"])
    v = pool(v)
    v = conv(v, params["w_q3"], params["b_q3"])
    v = pool(v)
    flat = jnp.transpose(v, (0, 3, 1, 2)).reshape(v.shape[0], -1)   # NCHW flatten
    h = jnp.dot(flat, params["w1"], precision=hi) + params["b1"]
    h = h * jax.nn.sigmoid(h)
    h = jnp.maximum(jnp.dot(h, params["w2"], precision=hi) + params["b2"], 0.0)
    return jnp.dot(h, params["w3"], precision=hi) + params["b3"]


if __name__ == "__main__":
    key = jax.random.PRNGKey(0)
    k_params, k_x = jax.random.split(key)
    params = init_params(k_params)
    prep = prepare_params(params)     # once, outside jit

    # Input spatial size is fixed by Linear(in_features=576): 28x28, 1 channel.
    x = jax.random.normal(k_x, (2, 1, 28, 28), jnp.float32)

    fwd = jax.jit(functools.partial(simple_q_classifier_forward, block_images=8))
    out = jax.block_until_ready(fwd(x, prep))

    assert out.shape == (2, 5), out.shape
    assert bool(jnp.all(jnp.isfinite(out)))

    # Tolerance-asserted pure-JAX reference (kernel uses bf16 MLP weights).
    ref = reference_forward(x, params)
    assert bool(jnp.max(jnp.abs(out - ref)) < 0.2), (out, ref)

    print("KERNEL_OK")
</pallas_src>

<mosaic_0001>
module attributes {stable_mosaic.version = 11 : i64} {
  func.func @_fused_kernel(%arg0: i32, %arg1: memref<224x28xf32, #tpu.memory_space<vmem>>, %arg2: memref<2x28x216xf32, #tpu.memory_space<vmem>>, %arg3: memref<1x216xf32, #tpu.memory_space<vmem>>, %arg4: memref<2x216x208xf32, #tpu.memory_space<vmem>>, %arg5: memref<2x216x208xf32, #tpu.memory_space<vmem>>, %arg6: memref<1x208xf32, #tpu.memory_space<vmem>>, %arg7: memref<2x208x96xf32, #tpu.memory_space<vmem>>, %arg8: memref<2x208x96xf32, #tpu.memory_space<vmem>>, %arg9: memref<1x96xf32, #tpu.memory_space<vmem>>, %arg10: memref<6x96x896xbf16, #tpu.memory_space<vmem>>, %arg11: memref<1x896xf32, #tpu.memory_space<vmem>>, %arg12: memref<896x128xbf16, #tpu.memory_space<vmem>>, %arg13: memref<1x128xf32, #tpu.memory_space<vmem>>, %arg14: memref<128x128xbf16, #tpu.memory_space<vmem>>, %arg15: memref<1x128xf32, #tpu.memory_space<vmem>>, %arg16: memref<8x128xf32, #tpu.memory_space<vmem>>) attributes {dimension_semantics = [#tpu.dimension_semantics<parallel>], iteration_bounds = array<i64: 1>, scalar_prefetch = 0 : i64, scratch_operands = 0 : i64, tpu.core_type = #tpu.core_type<tc>, window_params = [{transform_indices = @transform_0, window_bounds = array<i64: 224, 28>}, {pipeline_mode = #tpu.pipeline_mode<synchronous>, transform_indices = @transform_1, window_bounds = array<i64: 2, 28, 216>}, {pipeline_mode = #tpu.pipeline_mode<synchronous>, transform_indices = @transform_2, window_bounds = array<i64: 1, 216>}, {pipeline_mode = #tpu.pipeline_mode<synchronous>, transform_indices = @transform_3, window_bounds = array<i64: 2, 216, 208>}, {pipeline_mode = #tpu.pipeline_mode<synchronous>, transform_indices = @transform_4, window_bounds = array<i64: 2, 216, 208>}, {pipeline_mode = #tpu.pipeline_mode<synchronous>, transform_indices = @transform_5, window_bounds = array<i64: 1, 208>}, {pipeline_mode = #tpu.pipeline_mode<synchronous>, transform_indices = @transform_6, window_bounds = array<i64: 2, 208, 96>}, {pipeline_mode = #tpu.pipeline_mode<synchronous>, transform_indices = @transform_7, window_bounds = array<i64: 2, 208, 96>}, {pipeline_mode = #tpu.pipeline_mode<synchronous>, transform_indices = @transform_8, window_bounds = array<i64: 1, 96>}, {pipeline_mode = #tpu.pipeline_mode<synchronous>, transform_indices = @transform_9, window_bounds = array<i64: 6, 96, 896>}, {pipeline_mode = #tpu.pipeline_mode<synchronous>, transform_indices = @transform_10, window_bounds = array<i64: 1, 896>}, {pipeline_mode = #tpu.pipeline_mode<synchronous>, transform_indices = @transform_11, window_bounds = array<i64: 896, 128>}, {pipeline_mode = #tpu.pipeline_mode<synchronous>, transform_indices = @transform_12, window_bounds = array<i64: 1, 128>}, {pipeline_mode = #tpu.pipeline_mode<synchronous>, transform_indices = @transform_13, window_bounds = array<i64: 128, 128>}, {pipeline_mode = #tpu.pipeline_mode<synchronous>, transform_indices = @transform_14, window_bounds = array<i64: 1, 128>}, {transform_indices = @transform_15, window_bounds = array<i64: 8, 128>}]} {
    %c0 = arith.constant 0 : index
    %c0_0 = arith.constant 0 : index
    %0 = vector.load %arg1[%c0, %c0_0] : memref<224x28xf32, #tpu.memory_space<vmem>>, vector<224x28xf32>
    %1 = vector.extract_strided_slice %0 {offsets = [0, 0], sizes = [216, 28], strides = [1, 1]} : vector<224x28xf32> to vector<216x28xf32>
    %c0_1 = arith.constant 0 : index
    %c0_2 = arith.constant 0 : index
    %c0_3 = arith.constant 0 : index
    %2 = vector.load %arg2[%c0_1, %c0_2, %c0_3] : memref<2x28x216xf32, #tpu.memory_space<vmem>>, vector<1x28x216xf32>
    %3 = vector.shape_cast %2 : vector<1x28x216xf32> to vector<28x216xf32>
    %cst = arith.constant dense<0.000000e+00> : vector<216x216xf32>
    %4 = tpu.matmul %1, %3, %cst {dimension_numbers = #tpu.dot_dimension_numbers<[1], [0], [0], [1], [0, 0, 1, 1], [], []>} : vector<216x28xf32>, vector<28x216xf32>, vector<216x216xf32> -> vector<216x216xf32>
    %5 = vector.extract_strided_slice %0 {offsets = [8, 0], sizes = [216, 28], strides = [1, 1]} : vector<224x28xf32> to vector<216x28xf32>
    %c1 = arith.constant 1 : index
    %c0_4 = arith.constant 0 : index
    %c0_5 = arith.constant 0 : index
    %6 = vector.load %arg2[%c1, %c0_4, %c0_5] : memref<2x28x216xf32, #tpu.memory_space<vmem>>, vector<1x28x216xf32>
    %7 = vector.shape_cast %6 : vector<1x28x216xf32> to vector<28x216xf32>
    %cst_6 = arith.constant dense<0.000000e+00> : vector<216x216xf32>
    %8 = tpu.matmul %5, %7, %cst_6 {dimension_numbers = #tpu.dot_dimension_numbers<[1], [0], [0], [1], [0, 0, 1, 1], [], []>} : vector<216x28xf32>, vector<28x216xf32>, vector<216x216xf32> -> vector<216x216xf32>
    %9 = arith.addf %4, %8 : vector<216x216xf32>
    %c0_7 = arith.constant 0 : index
    %c0_8 = arith.constant 0 : index
    %10 = vector.load %arg3[%c0_7, %c0_8] : memref<1x216xf32, #tpu.memory_space<vmem>>, vector<1x216xf32>
    %11 = vector.broadcast %10 : vector<1x216xf32> to vector<216x216xf32>
    %12 = arith.addf %9, %11 : vector<216x216xf32>
    %13 = vector.extract_strided_slice %12 {offsets = [0, 0], sizes = [208, 216], strides = [1, 1]} : vector<216x216xf32> to vector<208x216xf32>
    %14 = vector.extract_strided_slice %12 {offsets = [8, 0], sizes = [208, 216], strides = [1, 1]} : vector<216x216xf32> to vector<208x216xf32>
    %c0_9 = arith.constant 0 : index
    %c0_10 = arith.constant 0 : index
    %c0_11 = arith.constant 0 : index
    %15 = vector.load %arg4[%c0_9, %c0_10, %c0_11] : memref<2x216x208xf32, #tpu.memory_space<vmem>>, vector<1x216x208xf32>
    %16 = vector.shape_cast %15 : vector<1x216x208xf32> to vector<216x208xf32>
    %cst_12 = arith.constant dense<0.000000e+00> : vector<208x208xf32>
    %17 = tpu.matmul %13, %16, %cst_12 {dimension_numbers = #tpu.dot_dimension_numbers<[1], [0], [0], [1], [0, 0, 1, 1], [], []>} : vector<208x216xf32>, vector<216x208xf32>, vector<208x208xf32> -> vector<208x208xf32>
    %c1_13 = arith.constant 1 : index
    %c0_14 = arith.constant 0 : index
    %c0_15 = arith.constant 0 : index
    %18 = vector.load %arg4[%c1_13, %c0_14, %c0_15] : memref<2x216x208xf32, #tpu.memory_space<vmem>>, vector<1x216x208xf32>
    %19 = vector.shape_cast %18 : vector<1x216x208xf32> to vector<216x208xf32>
    %cst_16 = arith.constant dense<0.000000e+00> : vector<208x208xf32>
    %20 = tpu.matmul %14, %19, %cst_16 {dimension_numbers = #tpu.dot_dimension_numbers<[1], [0], [0], [1], [0, 0, 1, 1], [], []>} : vector<208x216xf32>, vector<216x208xf32>, vector<208x208xf32> -> vector<208x208xf32>
    %21 = arith.addf %17, %20 : vector<208x208xf32>
    %c0_17 = arith.constant 0 : index
    %c0_18 = arith.constant 0 : index
    %c0_19 = arith.constant 0 : index
    %22 = vector.load %arg5[%c0_17, %c0_18, %c0_19] : memref<2x216x208xf32, #tpu.memory_space<vmem>>, vector<1x216x208xf32>
    %23 = vector.shape_cast %22 : vector<1x216x208xf32> to vector<216x208xf32>
    %cst_20 = arith.constant dense<0.000000e+00> : vector<208x208xf32>
    %24 = tpu.matmul %13, %23, %cst_20 {dimension_numbers = #tpu.dot_dimension_numbers<[1], [0], [0], [1], [0, 0, 1, 1], [], []>} : vector<208x216xf32>, vector<216x208xf32>, vector<208x208xf32> -> vector<208x208xf32>
    %c1_21 = arith.constant 1 : index
    %c0_22 = arith.constant 0 : index
    %c0_23 = arith.constant 0 : index
    %25 = vector.load %arg5[%c1_21, %c0_22, %c0_23] : memref<2x216x208xf32, #tpu.memory_space<vmem>>, vector<1x216x208xf32>
    %26 = vector.shape_cast %25 : vector<1x216x208xf32> to vector<216x208xf32>
    %cst_24 = arith.constant dense<0.000000e+00> : vector<208x208xf32>
    %27 = tpu.matmul %14, %26, %cst_24 {dimension_numbers = #tpu.dot_dimension_numbers<[1], [0], [0], [1], [0, 0, 1, 1], [], []>} : vector<208x216xf32>, vector<216x208xf32>, vector<208x208xf32> -> vector<208x208xf32>
    %28 = arith.addf %24, %27 : vector<208x208xf32>
    %29 = arith.maximumf %21, %28 : vector<208x208xf32>
    %30 = vector.extract_strided_slice %29 {offsets = [0, 0], sizes = [200, 208], strides = [1, 1]} : vector<208x208xf32> to vector<200x208xf32>
    %31 = vector.extract_strided_slice %29 {offsets = [8, 0], sizes = [200, 208], strides = [1, 1]} : vector<208x208xf32> to vector<200x208xf32>
    %32 = arith.maximumf %30, %31 : vector<200x208xf32>
    %c0_25 = arith.constant 0 : index
    %c0_26 = arith.constant 0 : index
    %33 = vector.load %arg6[%c0_25, %c0_26] : memref<1x208xf32, #tpu.memory_space<vmem>>, vector<1x208xf32>
    %34 = vector.broadcast %33 : vector<1x208xf32> to vector<200x208xf32>
    %35 = arith.addf %32, %34 : vector<200x208xf32>
    %36 = vector.extract_strided_slice %35 {offsets = [0, 0], sizes = [184, 208], strides = [1, 1]} : vector<200x208xf32> to vector<184x208xf32>
    %37 = vector.extract_strided_slice %35 {offsets = [16, 0], sizes = [184, 208], strides = [1, 1]} : vector<200x208xf32> to vector<184x208xf32>
    %c0_27 = arith.constant 0 : index
    %c0_28 = arith.constant 0 : index
    %c0_29 = arith.constant 0 : index
    %38 = vector.load %arg7[%c0_27, %c0_28, %c0_29] : memref<2x208x96xf32, #tpu.memory_space<vmem>>, vector<1x208x96xf32>
    %39 = vector.shape_cast %38 : vector<1x208x96xf32> to vector<208x96xf32>
    %cst_30 = arith.constant dense<0.000000e+00> : vector<184x96xf32>
    %40 = tpu.matmul %36, %39, %cst_30 {dimension_numbers = #tpu.dot_dimension_numbers<[1], [0], [0], [1], [0, 0, 1, 1], [], []>} : vector<184x208xf32>, vector<208x96xf32>, vector<184x96xf32> -> vector<184x96xf32>
    %c1_31 = arith.constant 1 : index
    %c0_32 = arith.constant 0 : index
    %c0_33 = arith.constant 0 : index
    %41 = vector.load %arg7[%c1_31, %c0_32, %c0_33] : memref<2x208x96xf32, #tpu.memory_space<vmem>>, vector<1x208x96xf32>
    %42 = vector.shape_cast %41 : vector<1x208x96xf32> to vector<208x96xf32>
    %cst_34 = arith.constant dense<0.000000e+00> : vector<184x96xf32>
    %43 = tpu.matmul %37, %42, %cst_34 {dimension_numbers = #tpu.dot_dimension_numbers<[1], [0], [0], [1], [0, 0, 1, 1], [], []>} : vector<184x208xf32>, vector<208x96xf32>, vector<184x96xf32> -> vector<184x96xf32>
    %44 = arith.addf %40, %43 : vector<184x96xf32>
    %c0_35 = arith.constant 0 : index
    %c0_36 = arith.constant 0 : index
    %c0_37 = arith.constant 0 : index
    %45 = vector.load %arg8[%c0_35, %c0_36, %c0_37] : memref<2x208x96xf32, #tpu.memory_space<vmem>>, vector<1x208x96xf32>
    %46 = vector.shape_cast %45 : vector<1x208x96xf32> to vector<208x96xf32>
    %cst_38 = arith.constant dense<0.000000e+00> : vector<184x96xf32>
    %47 = tpu.matmul %36, %46, %cst_38 {dimension_numbers = #tpu.dot_dimension_numbers<[1], [0], [0], [1], [0, 0, 1, 1], [], []>} : vector<184x208xf32>, vector<208x96xf32>, vector<184x96xf32> -> vector<184x96xf32>
    %c1_39 = arith.constant 1 : index
    %c0_40 = arith.constant 0 : index
    %c0_41 = arith.constant 0 : index
    %48 = vector.load %arg8[%c1_39, %c0_40, %c0_41] : memref<2x208x96xf32, #tpu.memory_space<vmem>>, vector<1x208x96xf32>
    %49 = vector.shape_cast %48 : vector<1x208x96xf32> to vector<208x96xf32>
    %cst_42 = arith.constant dense<0.000000e+00> : vector<184x96xf32>
    %50 = tpu.matmul %37, %49, %cst_42 {dimension_numbers = #tpu.dot_dimension_numbers<[1], [0], [0], [1], [0, 0, 1, 1], [], []>} : vector<184x208xf32>, vector<208x96xf32>, vector<184x96xf32> -> vector<184x96xf32>
    %51 = arith.addf %47, %50 : vector<184x96xf32>
    %52 = arith.maximumf %44, %51 : vector<184x96xf32>
    %53 = vector.extract_strided_slice %52 {offsets = [0, 0], sizes = [168, 96], strides = [1, 1]} : vector<184x96xf32> to vector<168x96xf32>
    %54 = vector.extract_strided_slice %52 {offsets = [16, 0], sizes = [168, 96], strides = [1, 1]} : vector<184x96xf32> to vector<168x96xf32>
    %55 = arith.maximumf %53, %54 : vector<168x96xf32>
    %c0_43 = arith.constant 0 : index
    %c0_44 = arith.constant 0 : index
    %56 = vector.load %arg9[%c0_43, %c0_44] : memref<1x96xf32, #tpu.memory_space<vmem>>, vector<1x96xf32>
    %57 = vector.broadcast %56 : vector<1x96xf32> to vector<168x96xf32>
    %58 = arith.addf %55, %57 : vector<168x96xf32>
    %59 = arith.truncf %58 : vector<168x96xf32> to vector<168x96xbf16>
    %c0_45 = arith.constant 0 : index
    %c0_46 = arith.constant 0 : index
    %60 = vector.load %arg11[%c0_45, %c0_46] : memref<1x896xf32, #tpu.memory_space<vmem>>, vector<1x896xf32>
    %61 = vector.extract_strided_slice %59 {offsets = [0, 0], sizes = [8, 96], strides = [1, 1]} : vector<168x96xbf16> to vector<8x96xbf16>
    %c0_47 = arith.constant 0 : index
    %c0_48 = arith.constant 0 : index
    %c0_49 = arith.constant 0 : index
    %62 = vector.load %arg10[%c0_47, %c0_48, %c0_49] : memref<6x96x896xbf16, #tpu.memory_space<vmem>>, vector<1x96x896xbf16>
    %63 = vector.shape_cast %62 : vector<1x96x896xbf16> to vector<96x896xbf16>
    %cst_50 = arith.constant dense<0.000000e+00> : vector<8x896xf32>
    %64 = tpu.matmul %61, %63, %cst_50 {dimension_numbers = #tpu.dot_dimension_numbers<[1], [0], [0], [1], [0, 0, 1, 1], [], []>} : vector<8x96xbf16>, vector<96x896xbf16>, vector<8x896xf32> -> vector<8x896xf32>
    %65 = vector.broadcast %60 : vector<1x896xf32> to vector<8x896xf32>
    %66 = arith.addf %65, %64 : vector<8x896xf32>
    %67 = vector.extract_strided_slice %59 {offsets = [32, 0], sizes = [8, 96], strides = [1, 1]} : vector<168x96xbf16> to vector<8x96xbf16>
    %c1_51 = arith.constant 1 : index
    %c0_52 = arith.constant 0 : index
    %c0_53 = arith.constant 0 : index
    %68 = vector.load %arg10[%c1_51, %c0_52, %c0_53] : memref<6x96x896xbf16, #tpu.memory_space<vmem>>, vector<1x96x896xbf16>
    %69 = vector.shape_cast %68 : vector<1x96x896xbf16> to vector<96x896xbf16>
    %cst_54 = arith.constant dense<0.000000e+00> : vector<8x896xf32>
    %70 = tpu.matmul %67, %69, %cst_54 {dimension_numbers = #tpu.dot_dimension_numbers<[1], [0], [0], [1], [0, 0, 1, 1], [], []>} : vector<8x96xbf16>, vector<96x896xbf16>, vector<8x896xf32> -> vector<8x896xf32>
    %71 = arith.addf %66, %70 : vector<8x896xf32>
    %72 = vector.extract_strided_slice %59 {offsets = [64, 0], sizes = [8, 96], strides = [1, 1]} : vector<168x96xbf16> to vector<8x96xbf16>
    %c2 = arith.constant 2 : index
    %c0_55 = arith.constant 0 : index
    %c0_56 = arith.constant 0 : index
    %73 = vector.load %arg10[%c2, %c0_55, %c0_56] : memref<6x96x896xbf16, #tpu.memory_space<vmem>>, vector<1x96x896xbf16>
    %74 = vector.shape_cast %73 : vector<1x96x896xbf16> to vector<96x896xbf16>
    %cst_57 = arith.constant dense<0.000000e+00> : vector<8x896xf32>
    %75 = tpu.matmul %72, %74, %cst_57 {dimension_numbers = #tpu.dot_dimension_numbers<[1], [0], [0], [1], [0, 0, 1, 1], [], []>} : vector<8x96xbf16>, vector<96x896xbf16>, vector<8x896xf32> -> vector<8x896xf32>
    %76 = arith.addf %71, %75 : vector<8x896xf32>
    %77 = vector.extract_strided_slice %59 {offsets = [96, 0], sizes = [8, 96], strides = [1, 1]} : vector<168x96xbf16> to vector<8x96xbf16>
    %c3 = arith.constant 3 : index
    %c0_58 = arith.constant 0 : index
    %c0_59 = arith.constant 0 : index
    %78 = vector.load %arg10[%c3, %c0_58, %c0_59] : memref<6x96x896xbf16, #tpu.memory_space<vmem>>, vector<1x96x896xbf16>
    %79 = vector.shape_cast %78 : vector<1x96x896xbf16> to vector<96x896xbf16>
    %cst_60 = arith.constant dense<0.000000e+00> : vector<8x896xf32>
    %80 = tpu.matmul %77, %79, %cst_60 {dimension_numbers = #tpu.dot_dimension_numbers<[1], [0], [0], [1], [0, 0, 1, 1], [], []>} : vector<8x96xbf16>, vector<96x896xbf16>, vector<8x896xf32> -> vector<8x896xf32>
    %81 = arith.addf %76, %80 : vector<8x896xf32>
    %82 = vector.extract_strided_slice %59 {offsets = [128, 0], sizes = [8, 96], strides = [1, 1]} : vector<168x96xbf16> to vector<8x96xbf16>
    %c4 = arith.constant 4 : index
    %c0_61 = arith.constant 0 : index
    %c0_62 = arith.constant 0 : index
    %83 = vector.load %arg10[%c4, %c0_61, %c0_62] : memref<6x96x896xbf16, #tpu.memory_space<vmem>>, vector<1x96x896xbf16>
    %84 = vector.shape_cast %83 : vector<1x96x896xbf16> to vector<96x896xbf16>
    %cst_63 = arith.constant dense<0.000000e+00> : vector<8x896xf32>
    %85 = tpu.matmul %82, %84, %cst_63 {dimension_numbers = #tpu.dot_dimension_numbers<[1], [0], [0], [1], [0, 0, 1, 1], [], []>} : vector<8x96xbf16>, vector<96x896xbf16>, vector<8x896xf32> -> vector<8x896xf32>
    %86 = arith.addf %81, %85 : vector<8x896xf32>
    %87 = vector.extract_strided_slice %59 {offsets = [160, 0], sizes = [8, 96], strides = [1, 1]} : vector<168x96xbf16> to vector<8x96xbf16>
    %c5 = arith.constant 5 : index
    %c0_64 = arith.constant 0 : index
    %c0_65 = arith.constant 0 : index
    %88 = vector.load %arg10[%c5, %c0_64, %c0_65] : memref<6x96x896xbf16, #tpu.memory_space<vmem>>, vector<1x96x896xbf16>
    %89 = vector.shape_cast %88 : vector<1x96x896xbf16> to vector<96x896xbf16>
    %cst_66 = arith.constant dense<0.000000e+00> : vector<8x896xf32>
    %90 = tpu.matmul %87, %89, %cst_66 {dimension_numbers = #tpu.dot_dimension_numbers<[1], [0], [0], [1], [0, 0, 1, 1], [], []>} : vector<8x96xbf16>, vector<96x896xbf16>, vector<8x896xf32> -> vector<8x896xf32>
    %91 = arith.addf %86, %90 : vector<8x896xf32>
    %cst_67 = arith.constant 0.000000e+00 : f32
    %92 = vector.broadcast %cst_67 : f32 to vector<8x896xf32>
    %93 = arith.subf %92, %91 : vector<8x896xf32>
    %94 = math.exp %93 : vector<8x896xf32>
    %cst_68 = arith.constant 1.000000e+00 : f32
    %95 = vector.broadcast %cst_68 : f32 to vector<8x896xf32>
    %96 = arith.addf %95, %94 : vector<8x896xf32>
    %cst_69 = arith.constant 1.000000e+00 : f32
    %97 = vector.broadcast %cst_69 : f32 to vector<8x896xf32>
    %98 = arith.divf %97, %96 : vector<8x896xf32>
    %99 = arith.mulf %91, %98 : vector<8x896xf32>
    %100 = arith.truncf %99 : vector<8x896xf32> to vector<8x896xbf16>
    %c0_70 = arith.constant 0 : index
    %c0_71 = arith.constant 0 : index
    %101 = vector.load %arg12[%c0_70, %c0_71] : memref<896x128xbf16, #tpu.memory_space<vmem>>, vector<896x128xbf16>
    %cst_72 = arith.constant dense<0.000000e+00> : vector<8x128xf32>
    %102 = tpu.matmul %100, %101, %cst_72 {dimension_numbers = #tpu.dot_dimension_numbers<[1], [0], [0], [1], [0, 0, 1, 1], [], []>} : vector<8x896xbf16>, vector<896x128xbf16>, vector<8x128xf32> -> vector<8x128xf32>
    %c0_73 = arith.constant 0 : index
    %c0_74 = arith.constant 0 : index
    %103 = vector.load %arg13[%c0_73, %c0_74] : memref<1x128xf32, #tpu.memory_space<vmem>>, vector<1x128xf32>
    %104 = vector.broadcast %103 : vector<1x128xf32> to vector<8x128xf32>
    %105 = arith.addf %102, %104 : vector<8x128xf32>
    %cst_75 = arith.constant 0.000000e+00 : f32
    %106 = vector.broadcast %cst_75 : f32 to vector<8x128xf32>
    %107 = arith.maximumf %105, %106 : vector<8x128xf32>
    %108 = arith.truncf %107 : vector<8x128xf32> to vector<8x128xbf16>
    %c0_76 = arith.constant 0 : index
    %c0_77 = arith.constant 0 : index
    %109 = vector.load %arg14[%c0_76, %c0_77] : memref<128x128xbf16, #tpu.memory_space<vmem>>, vector<128x128xbf16>
    %cst_78 = arith.constant dense<0.000000e+00> : vector<8x128xf32>
    %110 = tpu.matmul %108, %109, %cst_78 {dimension_numbers = #tpu.dot_dimension_numbers<[1], [0], [0], [1], [0, 0, 1, 1], [], []>} : vector<8x128xbf16>, vector<128x128xbf16>, vector<8x128xf32> -> vector<8x128xf32>
    %c0_79 = arith.constant 0 : index
    %c0_80 = arith.constant 0 : index
    %111 = vector.load %arg15[%c0_79, %c0_80] : memref<1x128xf32, #tpu.memory_space<vmem>>, vector<1x128xf32>
    %112 = vector.broadcast %111 : vector<1x128xf32> to vector<8x128xf32>
    %113 = arith.addf %110, %112 : vector<8x128xf32>
    %c0_81 = arith.constant 0 : index
    %c0_82 = arith.constant 0 : index
    %114 = vector.load %arg16[%c0_81, %c0_82] : memref<8x128xf32, #tpu.memory_space<vmem>>, vector<8x128xf32>
    tpu.vector_store %arg16[%c0_81, %c0_82], %113 {strides = array<i32>} : memref<8x128xf32, #tpu.memory_space<vmem>>, vector<8x128xf32>,
    return
  }
  func.func @transform_0(%arg0: i32) -> (i32, i32) {
    %c0_i32 = arith.constant 0 : i32
    %c0_i32_0 = arith.constant 0 : i32
    return %arg0, %c0_i32 : i32, i32
  }
  func.func @transform_1(%arg0: i32) -> (i32, i32, i32) {
    %c0_i32 = arith.constant 0 : i32
    %c0_i32_0 = arith.constant 0 : i32
    %c0_i32_1 = arith.constant 0 : i32
    %c0_i32_2 = arith.constant 0 : i32
    return %c0_i32, %c0_i32_0, %c0_i32_1 : i32, i32, i32
  }
  func.func @transform_2(%arg0: i32) -> (i32, i32) {
    %c0_i32 = arith.constant 0 : i32
    %c0_i32_0 = arith.constant 0 : i32
    %c0_i32_1 = arith.constant 0 : i32
    return %c0_i32, %c0_i32_0 : i32, i32
  }
  func.func @transform_3(%arg0: i32) -> (i32, i32, i32) {
    %c0_i32 = arith.constant 0 : i32
    %c0_i32_0 = arith.constant 0 : i32
    %c0_i32_1 = arith.constant 0 : i32
    %c0_i32_2 = arith.constant 0 : i32
    return %c0_i32, %c0_i32_0, %c0_i32_1 : i32, i32, i32
  }
  func.func @transform_4(%arg0: i32) -> (i32, i32, i32) {
    %c0_i32 = arith.constant 0 : i32
    %c0_i32_0 = arith.constant 0 : i32
    %c0_i32_1 = arith.constant 0 : i32
    %c0_i32_2 = arith.constant 0 : i32
    return %c0_i32, %c0_i32_0, %c0_i32_1 : i32, i32, i32
  }
  func.func @transform_5(%arg0: i32) -> (i32, i32) {
    %c0_i32 = arith.constant 0 : i32
    %c0_i32_0 = arith.constant 0 : i32
    %c0_i32_1 = arith.constant 0 : i32
    return %c0_i32, %c0_i32_0 : i32, i32
  }
  func.func @transform_6(%arg0: i32) -> (i32, i32, i32) {
    %c0_i32 = arith.constant 0 : i32
    %c0_i32_0 = arith.constant 0 : i32
    %c0_i32_1 = arith.constant 0 : i32
    %c0_i32_2 = arith.constant 0 : i32
    return %c0_i32, %c0_i32_0, %c0_i32_1 : i32, i32, i32
  }
  func.func @transform_7(%arg0: i32) -> (i32, i32, i32) {
    %c0_i32 = arith.constant 0 : i32
    %c0_i32_0 = arith.constant 0 : i32
    %c0_i32_1 = arith.constant 0 : i32
    %c0_i32_2 = arith.constant 0 : i32
    return %c0_i32, %c0_i32_0, %c0_i32_1 : i32, i32, i32
  }
  func.func @transform_8(%arg0: i32) -> (i32, i32) {
    %c0_i32 = arith.constant 0 : i32
    %c0_i32_0 = arith.constant 0 : i32
    %c0_i32_1 = arith.constant 0 : i32
    return %c0_i32, %c0_i32_0 : i32, i32
  }
  func.func @transform_9(%arg0: i32) -> (i32, i32, i32) {
    %c0_i32 = arith.constant 0 : i32
    %c0_i32_0 = arith.constant 0 : i32
    %c0_i32_1 = arith.constant 0 : i32
    %c0_i32_2 = arith.constant 0 : i32
    return %c0_i32, %c0_i32_0, %c0_i32_1 : i32, i32, i32
  }
  func.func @transform_10(%arg0: i32) -> (i32, i32) {
    %c0_i32 = arith.constant 0 : i32
    %c0_i32_0 = arith.constant 0 : i32
    %c0_i32_1 = arith.constant 0 : i32
    return %c0_i32, %c0_i32_0 : i32, i32
  }
  func.func @transform_11(%arg0: i32) -> (i32, i32) {
    %c0_i32 = arith.constant 0 : i32
    %c0_i32_0 = arith.constant 0 : i32
    %c0_i32_1 = arith.constant 0 : i32
    return %c0_i32, %c0_i32_0 : i32, i32
  }
  func.func @transform_12(%arg0: i32) -> (i32, i32) {
    %c0_i32 = arith.constant 0 : i32
    %c0_i32_0 = arith.constant 0 : i32
    %c0_i32_1 = arith.constant 0 : i32
    return %c0_i32, %c0_i32_0 : i32, i32
  }
  func.func @transform_13(%arg0: i32) -> (i32, i32) {
    %c0_i32 = arith.constant 0 : i32
    %c0_i32_0 = arith.constant 0 : i32
    %c0_i32_1 = arith.constant 0 : i32
    return %c0_i32, %c0_i32_0 : i32, i32
  }
  func.func @transform_14(%arg0: i32) -> (i32, i32) {
    %c0_i32 = arith.constant 0 : i32
    %c0_i32_0 = arith.constant 0 : i32
    %c0_i32_1 = arith.constant 0 : i32
    return %c0_i32, %c0_i32_0 : i32, i32
  }
  func.func @transform_15(%arg0: i32) -> (i32, i32) {
    %c0_i32 = arith.constant 0 : i32
    %c0_i32_0 = arith.constant 0 : i32
    return %arg0, %c0_i32 : i32, i32
  }
}

</mosaic_0001>

<bundles_post_ra>
// kernel: simple_q_classifier_forward.1
= control target key start
LH: loop header
LB: loop body
LE: loop exit
PB: predicated region body
PF: predicated region fallthrough
CT: control target
= control target key end

     0   :  { %vm178_vm0 = vcmask 1043456   ;;  %v12340_v3 = vmov 0.0   ;;  %vm96_vm1 = vcmask 228352   ;;  %vm823_vm2 = vcmask 719872   ;;  %s12324_s1 = inlined_call_operand.vmem [shape: f32[2,28,216], index: 1, kind: input, shape index: {}]   ;;  %s12325_s0 = inlined_call_operand.vmem [shape: f32[224,28], index: 0, kind: input, shape index: {}]   ;;  %s12326_s3 = inlined_call_operand.vmem [shape: f32[2,216,208], index: 3, kind: input, shape index: {}]   ;;  %s12327_s4 = inlined_call_operand.vmem [shape: f32[2,216,208], index: 4, kind: input, shape index: {}]   ;;  %s12328_s2 = inlined_call_operand.vmem [shape: f32[1,216], index: 2, kind: input, shape index: {}]   ;;  %s12329_s6 = inlined_call_operand.vmem [shape: f32[2,208,96], index: 6, kind: input, shape index: {}]   ;;  %s12330_s5 = inlined_call_operand.vmem [shape: f32[1,208], index: 5, kind: input, shape index: {}]   ;;  %s12331_s7 = inlined_call_operand.vmem [shape: f32[2,208,96], index: 7, kind: input, shape index: {}]   ;;  %s12332_s9 = inlined_call_operand.vmem [shape: bf16[6,96,896], index: 9, kind: input, shape index: {}]   ;;  %s12333_s8 = inlined_call_operand.vmem [shape: f32[1,96], index: 8, kind: input, shape index: {}]   ;;  %s12334_s10 = inlined_call_operand.vmem [shape: f32[1,896], index: 10, kind: input, shape index: {}]   ;;  %s12335_s11 = inlined_call_operand.vmem [shape: bf16[896,128], index: 11, kind: input, shape index: {}]   ;;  %s12336_s13 = inlined_call_operand.vmem [shape: bf16[128,128], index: 13, kind: input, shape index: {}]   ;;  %s12337_s12 = inlined_call_operand.vmem [shape: f32[1,128], index: 12, kind: input, shape index: {}]   ;;  %s12338_s14 = inlined_call_operand.vmem [shape: f32[1,128], index: 14, kind: input, shape index: {}]   ;;  %s12339_s15 = inlined_call_operand.vmem [shape: f32[8,128], index: 15, kind: output, shape index: {}]  }
   0x1   :  { %v6478_v0 = vld [vmem:[%s12324_s1 + $0x78] sm:$0xf]  ;;  %v6477_v1 = vld [vmem:[%s12324_s1 + $0x70] sm:$0xf]  ;;  %v6476_v2 = vld [vmem:[%s12324_s1 + $0x68] sm:$0xff]  ;;  %387 = vmatprep.mubr.f32.mxu1 %v12340_v3  ;;  %249 = vmatprep.mubr.f32.mxu0 %v12340_v3  ;;  %vm2115_vm3 = vcmask 654336  }
   0x2   :  { %7738 = vmatprep.subr.msk.mxu1 %vm178_vm0, %v6478_v0  ;;  %v6475_v4 = vld [vmem:[%s12324_s1 + $0x60] sm:$0xff]  ;;  %6479 = vmatprep.subr.msk.mxu0 %vm178_vm0, %v6478_v0  ;;  %v6474_v5 = vld [vmem:[%s12324_s1 + $0x58] sm:$0xff]  ;;  %v6473_v6 = vld [vmem:[%s12324_s1 + $0x50] sm:$0xff]  ;;  %vm3282_vm4 = vcmask 785408   ;;  %vm8204_vm5 = vmmov 0  }
   0x3   :  { %7742 = vmatpush1.msk.msra.mxu1 %vm178_vm0, %v6477_v1  ;;  %6480 = vmatpush1.msk.msra.mxu0 %vm178_vm0, %v6477_v1  ;;  %v6472_v7 = vld [vmem:[%s12324_s1 + $0x48] sm:$0xff]  ;;  %v6471_v8 = vld [vmem:[%s12324_s1 + $0x40] sm:$0xff]  ;;  %v86_v10 = vld [vmem:[%s12324_s1 + $0x38] sm:$0xf] }
   0x4   :  { %7739 = vmatprep.subr.mxu1 %v6476_v2  ;;  %211 = vmatprep.subr.mxu0 %v6476_v2  ;;  %v8318_v9 = vld [vmem:[%s12325_s0 + $0xc0] sm:$0xff]  ;;  %v85_v11 = vld [vmem:[%s12324_s1 + $0x30] sm:$0xf]  ;;  %v84_v12 = vld [vmem:[%s12324_s1 + $0x28] sm:$0xff] }
   0x5   :  { %7743 = vmatpush1.msra.mxu1 %v6475_v4  ;;  %212 = vmatpush1.msra.mxu0 %v6475_v4  ;;  %v8332_v13 = vld [vmem:[%s12325_s0 + $0x8] sm:$0xff]  ;;  %v83_v14 = vld [vmem:[%s12324_s1 + $0x20] sm:$0xff]  ;;  %v82_v16 = vld [vmem:[%s12324_s1 + $0x18] sm:$0xff] }
   0x6   :  { %7740 = vmatprep.subr.mxu1 %v6474_v5  ;;  %213 = vmatprep.subr.mxu0 %v6474_v5  ;;  %v8345_v15 = vld [vmem:[%s12325_s0 + $0xc8] sm:$0xff]  ;;  %v81_v17 = vld [vmem:[%s12324_s1 + $0x10] sm:$0xff]  ;;  %v79_v20 = vld [vmem:[%s12324_s1] sm:$0xff] }
   0x7   :  { %7744 = vmatpush1.msra.mxu1 %v6473_v6  ;;  %214 = vmatpush1.msra.mxu0 %v6473_v6  ;;  %v80_v18 = vld [vmem:[%s12324_s1 + $0x8] sm:$0xff]  ;;  %v8362_v19 = vld [vmem:[%s12325_s0 + $0x10] sm:$0xff]  ;;  %v745_v22 = vld [vmem:[%s12326_s3 + $0xf8] sm:$0xff] }
   0x8   :  { %7741 = vmatprep.subr.mxu1 %v6472_v7  ;;  %215 = vmatprep.subr.mxu0 %v6472_v7  ;;  %v8373_v21 = vld [vmem:[%s12325_s0 + $0xd0] sm:$0xff]  ;;  %v8384_v23 = vld [vmem:[%s12325_s0 + $0x18] sm:$0xff]  ;;  %v6568_v24 = vld [vmem:[%s12326_s3 + $0x2a8] sm:$0xff] }
   0x9   :  { %7745 = vmatpush1.msra.mxu1 %v6471_v8  ;;  %216 = vmatpush1.msra.mxu0 %v6471_v8  ;;  %v78_v25 = vld [vmem:[%s12325_s0 + $0xd8] sm:$0xff]  ;;  %v6567_v26 = vld [vmem:[%s12326_s3 + $0x2a0] sm:$0xff]  ;;  %v6565_v28 = vld [vmem:[%s12326_s3 + $0x290] sm:$0xff] }
   0xa   :  { %6504 = vmatmul.mubr.msk.f32.vlgmr.msra.gmra.mxu1 %vm96_vm1, %v8318_v9  ;;  %6508 = vmatprep.subr.msk.mxu1 %vm178_vm0, %v86_v10  ;;  %v6566_v27 = vld [vmem:[%s12326_s3 + $0x298] sm:$0xff]  ;;  %v8410_v29 = vld [vmem:[%s12325_s0 + $0x20] sm:$0xff]  ;;  %v6564_v30 = vld [vmem:[%s12326_s3 + $0x288] sm:$0xff] }
   0xb   :  { %6509 = vmatpush1.msk.msra.mxu1 %vm178_vm0, %v85_v11  ;;  %393 = vmatprep.mubr.f32.mxu1 %v12340_v3  ;;  %v6563_v31 = vld [vmem:[%s12326_s3 + $0x280] sm:$0xff]  ;;  %v6562_v33 = vld [vmem:[%s12326_s3 + $0x278] sm:$0xff]  ;;  %v744_v34 = vld [vmem:[%s12326_s3 + $0xf0] sm:$0xff] }
   0xc   :  { %447 = vmatprep.subr.mxu1 %v84_v12  ;;  %6481 = vmatmul.mubr.msk.f32.vlgmr.msra.gmra.mxu0 %vm96_vm1, %v8332_v13  ;;  %v51_v32 = vld [vmem:[%s12325_s0] sm:$0xff]  ;;  %v8435_v35 = vld [vmem:[%s12325_s0 + $0x28] sm:$0xff]  ;;  %v741_v38 = vld [vmem:[%s12326_s3 + $0xd8] sm:$0xff] }
   0xd   :  { %448 = vmatpush1.msra.mxu1 %v83_v14  ;;  %255 = vmatprep.mubr.f32.mxu0 %v12340_v3  ;;  %v743_v36 = vld [vmem:[%s12326_s3 + $0xe8] sm:$0xff]  ;;  %v742_v37 = vld [vmem:[%s12326_s3 + $0xe0] sm:$0xff]  ;;  %v740_v39 = vld [vmem:[%s12326_s3 + $0xd0] sm:$0xff] }
   0xe   :  { %6505 = vmatmul.mubr.msk.f32.gmra.mxu1 %vm96_vm1, %v8345_v15  ;;  %449 = vmatprep.subr.mxu1 %v82_v16  ;;  %v8457_v40 = vld [vmem:[%s12325_s0 + $0x30] sm:$0xff]  ;;  %v739_v41 = vld [vmem:[%s12326_s3 + $0xc8] sm:$0xff]  ;;  %v738_v42 = vld [vmem:[%s12326_s3 + $0xc0] sm:$0xff] }
   0xf   :  { %399 = vmatprep.mubr.f32.mxu1 %v12340_v3  ;;  %450 = vmatpush1.msra.mxu1 %v81_v17  ;;  %v737_v43 = vld [vmem:[%s12326_s3 + $0xb8] sm:$0xff]  ;;  %v736_v44 = vld [vmem:[%s12326_s3 + $0xb0] sm:$0xff]  ;;  %v735_v46 = vld [vmem:[%s12326_s3 + $0xa8] sm:$0xff] }
  0x10   :  { %451 = vmatprep.subr.mxu1 %v80_v18  ;;  %6482 = vmatmul.mubr.msk.f32.gmra.mxu0 %vm96_vm1, %v8362_v19  ;;  %v8480_v45 = vld [vmem:[%s12325_s0 + $0x38] sm:$0xff]  ;;  %v734_v47 = vld [vmem:[%s12326_s3 + $0xa0] sm:$0xff]  ;;  %v732_v49 = vld [vmem:[%s12326_s3 + $0x90] sm:$0xff] }
  0x11   :  { %452 = vmatpush1.msra.mxu1 %v79_v20  ;;  %261 = vmatprep.mubr.f32.mxu0 %v12340_v3  ;;  %v733_v48 = vld [vmem:[%s12326_s3 + $0x98] sm:$0xff]  ;;  %v8503_v50 = vld [vmem:[%s12325_s0 + $0x40] sm:$0xff]  ;;  %v731_v51 = vld [vmem:[%s12326_s3 + $0x88] sm:$0xff] }
  0x12   :  { %6506 = vmatmul.mubr.msk.f32.gmra.mxu1 %vm96_vm1, %v8373_v21  ;;  %1126 = vmatprep.subr.mxu1 %v745_v22  ;;  %v6561_v52 = vld [vmem:[%s12326_s3 + $0x270] sm:$0xff]  ;;  %v6560_v53 = vld [vmem:[%s12326_s3 + $0x268] sm:$0xff]  ;;  %v730_v54 = vld [vmem:[%s12326_s3 + $0x80] sm:$0xff] }
  0x13   :  { %405 = vmatprep.mubr.f32.mxu1 %v12340_v3  ;;  %902 = vmatprep.subr.mxu0 %v6568_v24  ;;  %v8526_v55 = vld [vmem:[%s12325_s0 + $0x48] sm:$0xff]  ;;  %v729_v56 = vld [vmem:[%s12326_s3 + $0x78] sm:$0xff]  ;;  %v6559_v57 = vld [vmem:[%s12326_s3 + $0x260] sm:$0xff] }
  0x14   :  { %6483 = vmatmul.mubr.msk.f32.gmra.mxu0 %vm96_vm1, %v8384_v23  ;;  %v6558_v58 = vld [vmem:[%s12326_s3 + $0x258] sm:$0xff]  ;;  %v728_v59 = vld [vmem:[%s12326_s3 + $0x70] sm:$0xff]  ;;  %v727_v61 = vld [vmem:[%s12326_s3 + $0x68] sm:$0xff] }
  0x15   :  { %267 = vmatprep.mubr.f32.mxu0 %v12340_v3  ;;  %903 = vmatpush1.msra.mxu0 %v6567_v26  ;;  %v8549_v60 = vld [vmem:[%s12325_s0 + $0x50] sm:$0xff]  ;;  %v6556_v63 = vld [vmem:[%s12326_s3 + $0x248] sm:$0xff]  ;;  %v726_v0 = vld [vmem:[%s12326_s3 + $0x60] sm:$0xff] }
  0x16   :  { %6507 = vmatmul.mubr.msk.f32.gmra.mxu1 %vm96_vm1, %v78_v25  ;;  %904 = vmatprep.subr.mxu0 %v6566_v27  ;;  %v6557_v62 = vld [vmem:[%s12326_s3 + $0x250] sm:$0xff]  ;;  %v8572_v1 = vld [vmem:[%s12325_s0 + $0x58] sm:$0xff]  ;;  %v6555_v4 = vld [vmem:[%s12326_s3 + $0x240] sm:$0xff] }
  0x17   :  { %485 = vmatprep.mubr.f32.mxu1 %v12340_v3  ;;  %905 = vmatpush1.msra.mxu0 %v6565_v28  ;;  %v725_v2 = vld [vmem:[%s12326_s3 + $0x58] sm:$0xff]  ;;  %v6553_v6 = vld [vmem:[%s12326_s3 + $0x230] sm:$0xff]  ;;  %v8595_v7 = vld [vmem:[%s12325_s0 + $0x60] sm:$0xff] }
  0x18   :  { %6484 = vmatmul.mubr.msk.f32.gmra.mxu0 %vm96_vm1, %v8410_v29  ;;  %906 = vmatprep.subr.mxu0 %v6564_v30  ;;  %v6554_v5 = vld [vmem:[%s12326_s3 + $0x238] sm:$0xff]  ;;  %v724_v8 = vld [vmem:[%s12326_s3 + $0x50] sm:$0xff]  ;;  %v6552_v10 = vld [vmem:[%s12326_s3 + $0x228] sm:$0xff] }
  0x19   :  { %273 = vmatprep.mubr.f32.mxu0 %v12340_v3  ;;  %907 = vmatpush1.msra.mxu0 %v6563_v31  ;;  %v723_v11 = vld [vmem:[%s12326_s3 + $0x48] sm:$0xff]  ;;  %v6551_v12 = vld [vmem:[%s12326_s3 + $0x220] sm:$0xff]  ;;  %v6550_v16 = vld [vmem:[%s12326_s3 + $0x218] sm:$0xff] }
  0x1a   :  { %6510 = vmatmul.mubr.msk.f32.vlgmr.msra.gmra.mxu1 %vm96_vm1, %v51_v32  ;;  %908 = vmatprep.subr.mxu0 %v6562_v33  ;;  %v722_v14 = vld [vmem:[%s12326_s3 + $0x40] sm:$0xff]  ;;  %v6549_v17 = vld [vmem:[%s12326_s3 + $0x210] sm:$0xff]  ;;  %v721_v18 = vld [vmem:[%s12326_s3 + $0x38] sm:$0xff] }
  0x1b   :  { %491 = vmatprep.mubr.f32.mxu1 %v12340_v3  ;;  %1127 = vmatpush1.msra.mxu1 %v744_v34  ;;  %v720_v20 = vld [vmem:[%s12326_s3 + $0x30] sm:$0xff]  ;;  %v6548_v22 = vld [vmem:[%s12326_s3 + $0x208] sm:$0xff]  ;;  %v8664_v25 = vld [vmem:[%s12325_s0 + $0x78] sm:$0xff] }
  0x1c   :  { %6485 = vmatmul.mubr.msk.f32.gmra.mxu0 %vm96_vm1, %v8435_v35  ;;  %1128 = vmatprep.subr.mxu1 %v743_v36  ;;  %v719_v24 = vld [vmem:[%s12326_s3 + $0x28] sm:$0xff]  ;;  %v718_v26 = vld [vmem:[%s12326_s3 + $0x20] sm:$0xff]  ;;  %v6546_v27 = vld [vmem:[%s12326_s3 + $0x1f8] sm:$0xff] }
  0x1d   :  { %279 = vmatprep.mubr.f32.mxu0 %v12340_v3  ;;  %1129 = vmatpush1.msra.mxu1 %v742_v37  ;;  %v6545_v28 = vld [vmem:[%s12326_s3 + $0x1f0] sm:$0xff]  ;;  %v8687_v30 = vld [vmem:[%s12325_s0 + $0x80] sm:$0xff]  ;;  %v6544_v31 = vld [vmem:[%s12326_s3 + $0x1e8] sm:$0xff] }
  0x1e   :  { %6511 = vmatmul.mubr.msk.f32.gmra.mxu1 %vm96_vm1, %v8332_v13  ;;  %1130 = vmatprep.subr.mxu1 %v741_v38  ;;  %v8618_v13 = vld [vmem:[%s12325_s0 + $0x68] sm:$0xff]  ;;  %v716_v32 = vld [vmem:[%s12326_s3 + $0x10] sm:$0xff]  ;;  %v6543_v33 = vld [vmem:[%s12326_s3 + $0x1e0] sm:$0xff] }
  0x1f   :  { %497 = vmatprep.mubr.f32.mxu1 %v12340_v3  ;;  %1131 = vmatpush1.msra.mxu1 %v740_v39  ;;  %v715_v34 = vld [vmem:[%s12326_s3 + $0x8] sm:$0xff]  ;;  %v6542_v36 = vld [vmem:[%s12326_s3 + $0x1d8] sm:$0xff]  ;;  %v714_v37 = vld [vmem:[%s12326_s3] sm:$0xff] }
  0x20   :  { %6486 = vmatmul.mubr.msk.f32.gmra.mxu0 %vm96_vm1, %v8457_v40  ;;  %1132 = vmatprep.subr.mxu1 %v739_v41  ;;  %v6541_v38 = vld [vmem:[%s12326_s3 + $0x1d0] sm:$0xff]  ;;  %v6540_v39 = vld [vmem:[%s12326_s3 + $0x1c8] sm:$0xff] }
  0x21   :  { %285 = vmatprep.mubr.f32.mxu0 %v12340_v3  ;;  %1133 = vmatpush1.msra.mxu1 %v738_v42  ;;  %v767_v41 = vld [vmem:[%s12326_s3 + $0x1a8] sm:$0xff]  ;;  %v6539_v42 = vld [vmem:[%s12326_s3 + $0x1c0] sm:$0xff] }
  0x22   :  { %6512 = vmatmul.mubr.msk.f32.gmra.mxu1 %vm96_vm1, %v8362_v19  ;;  %1134 = vmatprep.subr.mxu1 %v737_v43  ;;  %v8641_v19 = vld [vmem:[%s12325_s0 + $0x70] sm:$0xff]  ;;  %v6538_v43 = vld [vmem:[%s12326_s3 + $0x1b8] sm:$0xff] }
  0x23   :  { %503 = vmatprep.mubr.f32.mxu1 %v12340_v3  ;;  %1135 = vmatpush1.msra.mxu1 %v736_v44  ;;  %v766_v44 = vld [vmem:[%s12326_s3 + $0x1a0] sm:$0xff] }
  0x24   :  { %6487 = vmatmul.mubr.msk.f32.gmra.mxu0 %vm96_vm1, %v8480_v45  ;;  %1136 = vmatprep.subr.mxu1 %v735_v46  ;;  %v765_v46 = vld [vmem:[%s12326_s3 + $0x198] sm:$0xff] }
  0x25   :  { %291 = vmatprep.mubr.f32.mxu0 %v12340_v3  ;;  %1137 = vmatpush1.msra.mxu1 %v734_v47  ;;  %v6537_v47 = vld [vmem:[%s12326_s3 + $0x1b0] sm:$0xff] }
  0x26   :  { %6513 = vmatmul.mubr.msk.f32.gmra.mxu1 %vm96_vm1, %v8384_v23  ;;  %1138 = vmatprep.subr.mxu1 %v733_v48  ;;  %v6547_v23 = vld [vmem:[%s12326_s3 + $0x200] sm:$0xff]  ;;  %v6590_v48 = vld [vmem:[%s12326_s3 + $0x358] sm:$0xff] }
  0x27   :  { %509 = vmatprep.mubr.f32.mxu1 %v12340_v3  ;;  %1139 = vmatpush1.msra.mxu1 %v732_v49  ;;  %v764_v49 = vld [vmem:[%s12326_s3 + $0x190] sm:$0xff] }
  0x28   :  { %6488 = vmatmul.mubr.msk.f32.gmra.mxu0 %vm96_vm1, %v8503_v50  ;;  %1140 = vmatprep.subr.mxu1 %v731_v51  ;;  %v763_v51 = vld [vmem:[%s12326_s3 + $0x188] sm:$0xff] }
  0x29   :  { %297 = vmatprep.mubr.f32.mxu0 %v12340_v3  ;;  %909 = vmatpush1.msra.mxu0 %v6561_v52  ;;  %v6589_v52 = vld [vmem:[%s12326_s3 + $0x350] sm:$0xff] }
  0x2a   :  { %6514 = vmatmul.mubr.msk.f32.gmra.mxu1 %vm96_vm1, %v8410_v29  ;;  %910 = vmatprep.subr.mxu0 %v6560_v53  ;;  %v717_v29 = vld [vmem:[%s12326_s3 + $0x18] sm:$0xff]  ;;  %v6588_v53 = vld [vmem:[%s12326_s3 + $0x348] sm:$0xff] }
  0x2b   :  { %515 = vmatprep.mubr.f32.mxu1 %v12340_v3  ;;  %1141 = vmatpush1.msra.mxu1 %v730_v54  ;;  %v762_v54 = vld [vmem:[%s12326_s3 + $0x180] sm:$0xff] }
  0x2c   :  { %6489 = vmatmul.mubr.msk.f32.gmra.mxu0 %vm96_vm1, %v8526_v55  ;;  %1142 = vmatprep.subr.mxu1 %v729_v56  ;;  %v761_v56 = vld [vmem:[%s12326_s3 + $0x178] sm:$0xff] }
  0x2d   :  { %303 = vmatprep.mubr.f32.mxu0 %v12340_v3  ;;  %911 = vmatpush1.msra.mxu0 %v6559_v57  ;;  %v6587_v57 = vld [vmem:[%s12326_s3 + $0x340] sm:$0xff] }
  0x2e   :  { %6515 = vmatmul.mubr.msk.f32.gmra.mxu1 %vm96_vm1, %v8435_v35  ;;  %912 = vmatprep.subr.mxu0 %v6558_v58  ;;  %v8710_v35 = vld [vmem:[%s12325_s0 + $0x88] sm:$0xff]  ;;  %v6586_v58 = vld [vmem:[%s12326_s3 + $0x338] sm:$0xff] }
  0x2f   :  { %521 = vmatprep.mubr.f32.mxu1 %v12340_v3  ;;  %1143 = vmatpush1.msra.mxu1 %v728_v59  ;;  %v760_v59 = vld [vmem:[%s12326_s3 + $0x170] sm:$0xff] }
  0x30   :  { %6490 = vmatmul.mubr.msk.f32.gmra.mxu0 %vm96_vm1, %v8549_v60  ;;  %1144 = vmatprep.subr.mxu1 %v727_v61  ;;  %v759_v61 = vld [vmem:[%s12326_s3 + $0x168] sm:$0xff] }
  0x31   :  { %309 = vmatprep.mubr.f32.mxu0 %v12340_v3  ;;  %913 = vmatpush1.msra.mxu0 %v6557_v62  ;;  %v6585_v62 = vld [vmem:[%s12326_s3 + $0x330] sm:$0xff] }
  0x32   :  { %6516 = vmatmul.mubr.msk.f32.gmra.mxu1 %vm96_vm1, %v8457_v40  ;;  %914 = vmatprep.subr.mxu0 %v6556_v63  ;;  %v8733_v40 = vld [vmem:[%s12325_s0 + $0x90] sm:$0xff]  ;;  %v6584_v63 = vld [vmem:[%s12326_s3 + $0x328] sm:$0xff] }
  0x33   :  { %527 = vmatprep.mubr.f32.mxu1 %v12340_v3  ;;  %1145 = vmatpush1.msra.mxu1 %v726_v0  ;;  %v758_v0 = vld [vmem:[%s12326_s3 + $0x160] sm:$0xff] }
  0x34   :  { %6491 = vmatmul.mubr.msk.f32.gmra.mxu0 %vm96_vm1, %v8572_v1  ;;  %1146 = vmatprep.subr.mxu1 %v725_v2  ;;  %v757_v2 = vld [vmem:[%s12326_s3 + $0x158] sm:$0xff] }
  0x35   :  { %315 = vmatprep.mubr.f32.mxu0 %v12340_v3  ;;  %915 = vmatpush1.msra.mxu0 %v6555_v4  ;;  %v6583_v4 = vld [vmem:[%s12326_s3 + $0x320] sm:$0xff] }
  0x36   :  { %6517 = vmatmul.mubr.msk.f32.gmra.mxu1 %vm96_vm1, %v8480_v45  ;;  %916 = vmatprep.subr.mxu0 %v6554_v5  ;;  %v8756_v45 = vld [vmem:[%s12325_s0 + $0x98] sm:$0xff]  ;;  %v756_v5 = vld [vmem:[%s12326_s3 + $0x150] sm:$0xff] }
  0x37   :  { %533 = vmatprep.mubr.f32.mxu1 %v12340_v3  ;;  %917 = vmatpush1.msra.mxu0 %v6553_v6  ;;  %v6582_v6 = vld [vmem:[%s12326_s3 + $0x318] sm:$0xff] }
  0x38   :  { %6492 = vmatmul.mubr.msk.f32.gmra.mxu0 %vm96_vm1, %v8595_v7  ;;  %1147 = vmatpush1.msra.mxu1 %v724_v8  ;;  %v6580_v8 = vld [vmem:[%s12326_s3 + $0x308] sm:$0xff] }
  0x39   :  { %321 = vmatprep.mubr.f32.mxu0 %v12340_v3  ;;  %918 = vmatprep.subr.mxu0 %v6552_v10  ;;  %v755_v10 = vld [vmem:[%s12326_s3 + $0x148] sm:$0xff] }
  0x3a   :  { %6518 = vmatmul.mubr.msk.f32.gmra.mxu1 %vm96_vm1, %v8503_v50  ;;  %1148 = vmatprep.subr.mxu1 %v723_v11  ;;  %v8779_v50 = vld [vmem:[%s12325_s0 + $0xa0] sm:$0xff] }
  0x3b   :  { %539 = vmatprep.mubr.f32.mxu1 %v12340_v3  ;;  %919 = vmatpush1.msra.mxu0 %v6551_v12  ;;  %v6579_v11 = vld [vmem:[%s12326_s3 + $0x300] sm:$0xff] }
  0x3c   :  { %6493 = vmatmul.mubr.msk.f32.gmra.mxu0 %vm96_vm1, %v8618_v13  ;;  %1149 = vmatpush1.msra.mxu1 %v722_v14  ;;  %v754_v12 = vld [vmem:[%s12326_s3 + $0x140] sm:$0xff]  ;;  %v6577_v14 = vld [vmem:[%s12326_s3 + $0x2f0] sm:$0xff] }
  0x3d   :  { %327 = vmatprep.mubr.f32.mxu0 %v12340_v3  ;;  %920 = vmatprep.subr.mxu0 %v6550_v16  ;;  %v753_v16 = vld [vmem:[%s12326_s3 + $0x138] sm:$0xff] }
  0x3e   :  { %6519 = vmatmul.mubr.msk.f32.gmra.mxu1 %vm96_vm1, %v8526_v55  ;;  %921 = vmatpush1.msra.mxu0 %v6549_v17  ;;  %v8802_v55 = vld [vmem:[%s12325_s0 + $0xa8] sm:$0xff] }
  0x3f   :  { %545 = vmatprep.mubr.f32.mxu1 %v12340_v3  ;;  %1150 = vmatprep.subr.mxu1 %v721_v18  ;;  %v6576_v17 = vld [vmem:[%s12326_s3 + $0x2e8] sm:$0xff]  ;;  %v752_v18 = vld [vmem:[%s12326_s3 + $0x130] sm:$0xff] }
  0x40   :  { %6494 = vmatmul.mubr.msk.f32.gmra.mxu0 %vm96_vm1, %v8641_v19  ;;  %1151 = vmatpush1.msra.mxu1 %v720_v20  ;;  %v751_v20 = vld [vmem:[%s12326_s3 + $0x128] sm:$0xff] }
  0x41   :  { %333 = vmatprep.mubr.f32.mxu0 %v12340_v3  ;;  %922 = vmatprep.subr.mxu0 %v6548_v22  ;;  %v750_v22 = vld [vmem:[%s12326_s3 + $0x120] sm:$0xff] }
  0x42   :  { %6520 = vmatmul.mubr.msk.f32.gmra.mxu1 %vm96_vm1, %v8549_v60  ;;  %923 = vmatpush1.msra.mxu0 %v6547_v23  ;;  %v8825_v60 = vld [vmem:[%s12325_s0 + $0xb0] sm:$0xff]  ;;  %v6574_v23 = vld [vmem:[%s12326_s3 + $0x2d8] sm:$0xff] }
  0x43   :  { %551 = vmatprep.mubr.f32.mxu1 %v12340_v3  ;;  %1152 = vmatprep.subr.mxu1 %v719_v24  ;;  %v749_v24 = vld [vmem:[%s12326_s3 + $0x118] sm:$0xff] }
  0x44   :  { %6495 = vmatmul.mubr.msk.f32.gmra.mxu0 %vm96_vm1, %v8664_v25  ;;  %1153 = vmatpush1.msra.mxu1 %v718_v26  ;;  %v748_v26 = vld [vmem:[%s12326_s3 + $0x110] sm:$0xff] }
  0x45   :  { %339 = vmatprep.mubr.f32.mxu0 %v12340_v3  ;;  %924 = vmatprep.subr.mxu0 %v6546_v27  ;;  %v6572_v27 = vld [vmem:[%s12326_s3 + $0x2c8] sm:$0xff] }
  0x46   :  { %6521 = vmatmul.mubr.msk.f32.gmra.mxu1 %vm96_vm1, %v8572_v1  ;;  %925 = vmatpush1.msra.mxu0 %v6545_v28  ;;  %v8848_v1 = vld [vmem:[%s12325_s0 + $0xb8] sm:$0xff]  ;;  %v747_v28 = vld [vmem:[%s12326_s3 + $0x108] sm:$0xff] }
  0x47   :  { %557 = vmatprep.mubr.f32.mxu1 %v12340_v3  ;;  %1154 = vmatprep.subr.mxu1 %v717_v29  ;;  %v6571_v29 = vld [vmem:[%s12326_s3 + $0x2c0] sm:$0xff] }
  0x48   :  { %6496 = vmatmul.mubr.msk.f32.gmra.mxu0 %vm96_vm1, %v8687_v30  ;;  %926 = vmatprep.subr.mxu0 %v6544_v31  ;;  %v6570_v31 = vld [vmem:[%s12326_s3 + $0x2b8] sm:$0xff] }
  0x49   :  { %345 = vmatprep.mubr.f32.mxu0 %v12340_v3  ;;  %1155 = vmatpush1.msra.mxu1 %v716_v32  ;;  %v1378_v32 = vld [vmem:[%s12327_s4 + $0xf8] sm:$0xff] }
  0x4a   :  { %6522 = vmatmul.mubr.msk.f32.gmra.mxu1 %vm96_vm1, %v8595_v7  ;;  %927 = vmatpush1.msra.mxu0 %v6543_v33  ;;  %v6581_v7 = vld [vmem:[%s12326_s3 + $0x310] sm:$0xff] }
  0x4b   :  { %563 = vmatprep.mubr.f32.mxu1 %v12340_v3  ;;  %1156 = vmatprep.subr.mxu1 %v715_v34  ;;  %v6569_v33 = vld [vmem:[%s12326_s3 + $0x2b0] sm:$0xff]  ;;  %v6674_v34 = vld [vmem:[%s12327_s4 + $0x2a8] sm:$0xff] }
  0x4c   :  { %6497 = vmatmul.mubr.msk.f32.gmra.mxu0 %vm96_vm1, %v8710_v35  ;;  %928 = vmatprep.subr.mxu0 %v6542_v36 }
  0x4d   :  { %351 = vmatprep.mubr.f32.mxu0 %v12340_v3  ;;  %1157 = vmatpush1.msra.mxu1 %v714_v37 }
  0x4e   :  { %6523 = vmatmul.mubr.msk.f32.gmra.mxu1 %vm96_vm1, %v8618_v13  ;;  %929 = vmatpush1.msra.mxu0 %v6541_v38  ;;  %v6578_v13 = vld [vmem:[%s12326_s3 + $0x2f8] sm:$0xff] }
  0x4f   :  { %569 = vmatprep.mubr.f32.mxu1 %v12340_v3  ;;  %930 = vmatprep.subr.mxu0 %v6540_v39 }
  0x50   :  { %6498 = vmatmul.mubr.msk.f32.gmra.mxu0 %vm96_vm1, %v8733_v40  ;;  %1168 = vmatprep.subr.mxu1 %v767_v41 }
  0x51   :  { %357 = vmatprep.mubr.f32.mxu0 %v12340_v3  ;;  %931 = vmatpush1.msra.mxu0 %v6539_v42 }
  0x52   :  { %6524 = vmatmul.mubr.msk.f32.gmra.mxu1 %vm96_vm1, %v8641_v19  ;;  %932 = vmatprep.subr.mxu0 %v6538_v43  ;;  %v6575_v19 = vld [vmem:[%s12326_s3 + $0x2e0] sm:$0xff] }
  0x53   :  { %575 = vmatprep.mubr.f32.mxu1 %v12340_v3  ;;  %1169 = vmatpush2.msra.mxu1 %v766_v44 }
  0x54   :  { %6499 = vmatmul.mubr.msk.f32.gmra.mxu0 %vm96_vm1, %v8756_v45  ;;  %1170 = vmatprep.subr.mxu1 %v765_v46 }
  0x55   :  { %363 = vmatprep.mubr.f32.mxu0 %v12340_v3  ;;  %933 = vmatpush1.msra.mxu0 %v6537_v47 }
  0x56   :  { %6525 = vmatmul.mubr.msk.f32.gmra.mxu1 %vm96_vm1, %v8664_v25  ;;  %944 = vmatprep.subr.mxu0 %v6590_v48  ;;  %v6573_v25 = vld [vmem:[%s12326_s3 + $0x2d0] sm:$0xff] }
  0x57   :  { %581 = vmatprep.mubr.f32.mxu1 %v12340_v3  ;;  %1171 = vmatpush2.msra.mxu1 %v764_v49 }
  0x58   :  { %6500 = vmatmul.mubr.msk.f32.gmra.mxu0 %vm96_vm1, %v8779_v50  ;;  %1172 = vmatprep.subr.mxu1 %v763_v51  ;;  %v648_v51 = vld [vmem:[%s12328_s2] sm:$0x3] }
  0x59   :  { %369 = vmatprep.mubr.f32.mxu0 %v12340_v3  ;;  %945 = vmatpush2.msra.mxu0 %v6589_v52 }
  0x5a   :  { %6526 = vmatmul.mubr.msk.f32.gmra.mxu1 %vm96_vm1, %v8687_v30  ;;  %946 = vmatprep.subr.mxu0 %v6588_v53  ;;  %v746_v30 = vld [vmem:[%s12326_s3 + $0x100] sm:$0xff] }
  0x5b   :  { %587 = vmatprep.mubr.f32.mxu1 %v12340_v3  ;;  %1173 = vmatpush2.msra.mxu1 %v762_v54 }
  0x5c   :  { %6501 = vmatmul.mubr.msk.f32.gmra.mxu0 %vm96_vm1, %v8802_v55  ;;  %1174 = vmatprep.subr.mxu1 %v761_v56 }
  0x5d   :  { %375 = vmatprep.mubr.f32.mxu0 %v12340_v3  ;;  %947 = vmatpush2.msra.mxu0 %v6587_v57 }
  0x5e   :  { %6527 = vmatmul.mubr.msk.f32.gmra.mxu1 %vm96_vm1, %v8710_v35  ;;  %948 = vmatprep.subr.mxu0 %v6586_v58 }
  0x5f   :  { %593 = vmatprep.mubr.f32.mxu1 %v12340_v3  ;;  %1175 = vmatpush2.msra.mxu1 %v760_v59 }
  0x60   :  { %6502 = vmatmul.mubr.msk.f32.gmra.mxu0 %vm96_vm1, %v8825_v60  ;;  %1176 = vmatprep.subr.mxu1 %v759_v61 }
  0x61   :  { %381 = vmatprep.mubr.f32.mxu0 %v12340_v3  ;;  %949 = vmatpush2.msra.mxu0 %v6585_v62 }
  0x62   :  { %6528 = vmatmul.mubr.msk.f32.gmra.mxu1 %vm96_vm1, %v8733_v40  ;;  %950 = vmatprep.subr.mxu0 %v6584_v63 }
  0x63   :  { %599 = vmatprep.mubr.f32.mxu1 %v12340_v3  ;;  %1177 = vmatpush2.msra.mxu1 %v758_v0 }
  0x64   :  { %6503 = vmatmul.mubr.msk.f32.gmra.mxu0 %vm96_vm1, %v8848_v1  ;;  %1178 = vmatprep.subr.mxu1 %v757_v2  ;;  %v1377_v2 = vld [vmem:[%s12327_s4 + $0xf0] sm:$0xff] }
  0x65   :  { %951 = vmatpush2.msra.mxu0 %v6583_v4  ;;  %1179 = vmatpush2.msra.mxu1 %v756_v5 }
  0x66   :  { %6529 = vmatmul.mubr.msk.f32.gmra.mxu1 %vm96_vm1, %v8756_v45  ;;  %952 = vmatprep.subr.mxu0 %v6582_v6  ;;  %v1376_v6 = vld [vmem:[%s12327_s4 + $0xe8] sm:$0xff] }
  0x67   :  { %605 = vmatprep.mubr.f32.mxu1 %v12340_v3  ;;  %953 = vmatpush2.msra.mxu0 %v6581_v7 }
  0x68   :  { %954 = vmatprep.subr.mxu0 %v6580_v8  ;;  %1180 = vmatprep.subr.mxu1 %v755_v10 }
  0x69   :  { %955 = vmatpush2.msra.mxu0 %v6579_v11  ;;  %1181 = vmatpush2.msra.mxu1 %v754_v12 }
  0x6a   :  { %6530 = vmatmul.mubr.msk.f32.gmra.mxu1 %vm96_vm1, %v8779_v50  ;;  %956 = vmatprep.subr.mxu0 %v6578_v13 }
  0x6b   :  { %611 = vmatprep.mubr.f32.mxu1 %v12340_v3  ;;  %957 = vmatpush2.msra.mxu0 %v6577_v14  ;;  %v6673_v14 = vld [vmem:[%s12327_s4 + $0x2a0] sm:$0xff] }
  0x6c   :  { %1182 = vmatprep.subr.mxu1 %v753_v16  ;;  %958 = vmatprep.subr.mxu0 %v6576_v17  ;;  %v1375_v16 = vld [vmem:[%s12327_s4 + $0xe0] sm:$0xff] }
  0x6d   :  { %1183 = vmatpush2.msra.mxu1 %v752_v18  ;;  %959 = vmatpush2.msra.mxu0 %v6575_v19  ;;  %v6672_v19 = vld [vmem:[%s12327_s4 + $0x298] sm:$0xff] }
  0x6e   :  { %6531 = vmatmul.mubr.msk.f32.gmra.mxu1 %vm96_vm1, %v8802_v55  ;;  %1184 = vmatprep.subr.mxu1 %v751_v20  ;;  %v1374_v20 = vld [vmem:[%s12327_s4 + $0xd8] sm:$0xff] }
  0x6f   :  { %617 = vmatprep.mubr.f32.mxu1 %v12340_v3  ;;  %1185 = vmatpush2.msra.mxu1 %v750_v22 }
  0x70   :  { %960 = vmatprep.subr.mxu0 %v6574_v23  ;;  %1186 = vmatprep.subr.mxu1 %v749_v24 }
  0x71   :  { %961 = vmatpush2.msra.mxu0 %v6573_v25  ;;  %1187 = vmatpush2.msra.mxu1 %v748_v26 }
  0x72   :  { %6532 = vmatmul.mubr.msk.f32.gmra.mxu1 %vm96_vm1, %v8825_v60  ;;  %962 = vmatprep.subr.mxu0 %v6572_v27 }
  0x73   :  { %623 = vmatprep.mubr.f32.mxu1 %v12340_v3  ;;  %1188 = vmatprep.subr.mxu1 %v747_v28  ;;  %v6671_v28 = vld [vmem:[%s12327_s4 + $0x290] sm:$0xff] }
  0x74   :  { %963 = vmatpush2.msra.mxu0 %v6571_v29  ;;  %1189 = vmatpush2.msra.mxu1 %v746_v30  ;;  %v1373_v29 = vld [vmem:[%s12327_s4 + $0xd0] sm:$0xff] }
  0x75   :  { %964 = vmatprep.subr.mxu0 %v6570_v31  ;;  %1677 = vmatprep.subr.mxu1 %v1378_v32  ;;  %v6670_v32 = vld [vmem:[%s12327_s4 + $0x288] sm:$0xff] }
  0x76   :  { %6533 = vmatmul.mubr.msk.f32.gmra.mxu1 %vm96_vm1, %v8848_v1  ;;  %965 = vmatpush2.msra.mxu0 %v6569_v33  ;;  %v1372_v33 = vld [vmem:[%s12327_s4 + $0xc8] sm:$0xff] }
  0x77   :  { %629 = vmatprep.mubr.f32.mxu1 %v12340_v3  ;;  %1456 = vmatprep.subr.mxu0 %v6674_v34 }
  0x7a   :  { %6534 = vmatmul.mubr.msk.f32.gmra.mxu1 %vm96_vm1, %v8318_v9  ;;  %v650_v9 = vlaneseq }
  0x7b   :  { %635 = vmatprep.mubr.f32.mxu1 %v12340_v3 }
  0x7c   :  { %v8977_v44 = vshrl.u32 %v650_v9, 7 }
  0x7e   :  { %6535 = vmatmul.mubr.msk.f32.gmra.mxu1 %vm96_vm1, %v8345_v15  ;;  %12358 = vst [vmem:[#allocation2_spill] sm:$0xff] %v8977_v44  ;;  %v8982_v47 = vsub.s32 1, %v8977_v44  ;;  %v8987_v49 = vsub.s32 0, %v8977_v44 }
  0x7f   :  { %641 = vmatprep.mubr.f32.mxu1 %v12340_v3 }
  0x80   :  { %12359 = vst [vmem:[#allocation3_spill] sm:$0xff] %v8982_v47  ;;  %12360 = vst [vmem:[#allocation4_spill] sm:$0xff] %v8987_v49  ;;  %v8993_v54 = vrot.slane %v648_v51, %v8982_v47  ;;  %v8996_v56 = vrot.slane %v648_v51, %v8987_v49 }
  0x82   :  { %6536 = vmatmul.mubr.msk.f32.gmra.mxu1 %vm96_vm1, %v8373_v21 }
  0xca   :  { %v8965_v35 = vpop.f32.mrf.mxu1 }
  0xcc   :  { %v8967_v36 = vpop.f32.mrf.mxu1  ;;  %v251_v37 = vpop.f32.mrf.mxu0 }
  0xce   :  { %v8969_v38 = vpop.f32.mrf.mxu1  ;;  %v253_v39 = vpop.f32.mrf.mxu0 }
  0xd0   :  { %v8971_v40 = vpop.f32.mrf.mxu1  ;;  %v257_v41 = vpop.f32.mrf.mxu0 }
  0xd2   :  { %v8973_v42 = vpop.f32.mrf.mxu1  ;;  %v259_v15 = vpop.f32.mrf.mxu0 }
  0xd4   :  { %v8975_v43 = vpop.f32.mrf.mxu1  ;;  %v263_v21 = vpop.f32.mrf.mxu0 }
  0xd6   :  { %v8979_v45 = vpop.f32.mrf.mxu1  ;;  %v265_v46 = vpop.f32.mrf.mxu0 }
  0xd8   :  { %v8984_v48 = vpop.f32.mrf.mxu1  ;;  %v269_v50 = vpop.f32.mrf.mxu0 }
  0xda   :  { %v487_v52 = vpop.f32.mrf.mxu1  ;;  %v271_v53 = vpop.f32.mrf.mxu0 }
  0xdb   :  { %v488_v55 = vadd.f32 %v487_v52, %v251_v37  ;;  %v6668_v52 = vld [vmem:[%s12327_s4 + $0x278] sm:$0xff] }
  0xdc   :  { %v489_v57 = vpop.f32.mrf.mxu1  ;;  %v275_v58 = vpop.f32.mrf.mxu0 }
  0xdd   :  { %v490_v59 = vadd.f32 %v489_v57, %v253_v39  ;;  %v9002_v63 = vadd.f32 %v8996_v56, %v488_v55 }
  0xde   :  { %v493_v60 = vpop.f32.mrf.mxu1  ;;  %v277_v61 = vpop.f32.mrf.mxu0 }
  0xdf   :  { %v8999_v62 = vadd.f32 %v8993_v54, %v490_v59  ;;  %v494_v0 = vadd.f32 %v493_v60, %v257_v41 }
  0xe0   :  { %v495_v1 = vpop.f32.mrf.mxu1  ;;  %v9007_v4 = vpop.f32.mrf.mxu0 }
  0xe1   :  { %v496_v5 = vadd.f32 %v495_v1, %v259_v15  ;;  %6617 = vmatprep.mubr.msk.f32.mxu1 %vm823_vm2, %v8999_v62  ;;  %v9021_v11 = vadd.f32 %v8996_v56, %v494_v0  ;;  %v6667_v0 = vld [vmem:[%s12327_s4 + $0x270] sm:$0xff] }
  0xe2   :  { %v499_v7 = vpop.f32.mrf.mxu1  ;;  %1191 = vmatmul.mubr.f32.vlgmr.msra.gmra.mxu1 %v9002_v63  ;;  %v9015_v8 = vpop.f32.mrf.mxu0  ;;  %v1369_v1 = vld [vmem:[%s12327_s4 + $0xb0] sm:$0xff] }
  0xe3   :  { %v9018_v10 = vadd.f32 %v8993_v54, %v496_v5  ;;  %1678 = vmatpush1.msra.mxu1 %v1377_v2  ;;  %v500_v12 = vadd.f32 %v499_v7, %v263_v21  ;;  %v6669_v21 = vld [vmem:[%s12327_s4 + $0x280] sm:$0xff] }
  0xe4   :  { %v501_v13 = vpop.f32.mrf.mxu1  ;;  %1679 = vmatprep.subr.mxu1 %v1376_v6  ;;  %v9029_v17 = vpop.f32.mrf.mxu0  ;;  %v1368_v6 = vld [vmem:[%s12327_s4 + $0xa8] sm:$0xff] }
  0xe5   :  { %v502_v18 = vadd.f32 %v501_v13, %v265_v46  ;;  %6591 = vmatprep.mubr.msk.f32.mxu0 %vm823_vm2, %v9018_v10  ;;  %6618 = vmatprep.mubr.msk.f32.mxu1 %vm823_vm2, %v9018_v10  ;;  %v9049_v25 = vadd.f32 %v8996_v56, %v500_v12  ;;  %v1371_v46 = vld [vmem:[%s12327_s4 + $0xc0] sm:$0xff] }
  0xe6   :  { %v505_v22 = vpop.f32.mrf.mxu1  ;;  %967 = vmatmul.mubr.f32.vlgmr.msra.gmra.mxu0 %v9021_v11  ;;  %1197 = vmatmul.mubr.f32.gmra.mxu1 %v9021_v11  ;;  %v9043_v23 = vpop.f32.mrf.mxu0 }
  0xe7   :  { %v9046_v24 = vadd.f32 %v8993_v54, %v502_v18  ;;  %1457 = vmatpush1.msra.mxu0 %v6673_v14  ;;  %1680 = vmatpush1.msra.mxu1 %v1375_v16  ;;  %v506_v26 = vadd.f32 %v505_v22, %v269_v50  ;;  %v6665_v18 = vld [vmem:[%s12327_s4 + $0x260] sm:$0xff] }
  0xe8   :  { %v507_v27 = vpop.f32.mrf.mxu1  ;;  %1458 = vmatprep.subr.mxu0 %v6672_v19  ;;  %1681 = vmatprep.subr.mxu1 %v1374_v20  ;;  %v9057_v30 = vpop.f32.mrf.mxu0  ;;  %v1367_v19 = vld [vmem:[%s12327_s4 + $0xa0] sm:$0xff] }
  0xe9   :  { %v508_v31 = vadd.f32 %v507_v27, %v271_v53  ;;  %6592 = vmatprep.mubr.msk.f32.mxu0 %vm823_vm2, %v9046_v24  ;;  %6619 = vmatprep.mubr.msk.f32.mxu1 %vm823_vm2, %v9046_v24  ;;  %v9077_v9 = vadd.f32 %v8996_v56, %v506_v26  ;;  %v1370_v53 = vld [vmem:[%s12327_s4 + $0xb8] sm:$0xff] }
  0xea   :  { %v511_v34 = vpop.f32.mrf.mxu1  ;;  %973 = vmatmul.mubr.f32.gmra.mxu0 %v9049_v25  ;;  %1203 = vmatmul.mubr.f32.gmra.mxu1 %v9049_v25  ;;  %v9071_v37 = vpop.f32.mrf.mxu0  ;;  %v1366_v26 = vld [vmem:[%s12327_s4 + $0x98] sm:$0xff] }
  0xeb   :  { %v9074_v39 = vadd.f32 %v8993_v54, %v508_v31  ;;  %1459 = vmatpush1.msra.mxu0 %v6671_v28  ;;  %1682 = vmatpush1.msra.mxu1 %v1373_v29  ;;  %v512_v41 = vadd.f32 %v511_v34, %v275_v58  ;;  %v1365_v34 = vld [vmem:[%s12327_s4 + $0x90] sm:$0xff] }
  0xec   :  { %v513_v15 = vpop.f32.mrf.mxu1  ;;  %1460 = vmatprep.subr.mxu0 %v6670_v32  ;;  %1683 = vmatprep.subr.mxu1 %v1372_v33  ;;  %v9085_v50 = vpop.f32.mrf.mxu0  ;;  %v6663_v33 = vld [vmem:[%s12327_s4 + $0x250] sm:$0xff] }
  0xed   :  { %v514_v51 = vadd.f32 %v513_v15, %v277_v61  ;;  %6593 = vmatprep.mubr.msk.f32.mxu0 %vm823_vm2, %v9074_v39  ;;  %6620 = vmatprep.mubr.msk.f32.mxu1 %vm823_vm2, %v9074_v39  ;;  %v9105_v59 = vadd.f32 %v8996_v56, %v512_v41 }
  0xee   :  { %v517_v55 = vpop.f32.mrf.mxu1  ;;  %979 = vmatmul.mubr.f32.gmra.mxu0 %v9077_v9  ;;  %1209 = vmatmul.mubr.f32.gmra.mxu1 %v9077_v9  ;;  %v9099_v57 = vpop.f32.mrf.mxu0 }
  0xef   :  { %v9102_v58 = vadd.f32 %v8993_v54, %v514_v51  ;;  %1461 = vmatpush1.msra.mxu0 %v6669_v21  ;;  %1684 = vmatpush1.msra.mxu1 %v1371_v46  ;;  %v518_v60 = vadd.f32 %v517_v55, %v9007_v4  ;;  %v6666_v4 = vld [vmem:[%s12327_s4 + $0x268] sm:$0xff] }
  0xf0   :  { %v519_v61 = vpop.f32.mrf.mxu1  ;;  %1462 = vmatprep.subr.mxu0 %v6668_v52  ;;  %1685 = vmatprep.subr.mxu1 %v1370_v53  ;;  %v9114_v2 = vpop.f32.mrf.mxu0  ;;  %v1364_v21 = vld [vmem:[%s12327_s4 + $0x88] sm:$0xff] }
  0xf1   :  { %v520_v5 = vadd.f32 %v519_v61, %v9015_v8  ;;  %6594 = vmatprep.mubr.msk.f32.mxu0 %vm823_vm2, %v9102_v58  ;;  %6621 = vmatprep.mubr.msk.f32.mxu1 %vm823_vm2, %v9102_v58  ;;  %v9135_v13 = vadd.f32 %v8996_v56, %v518_v60  ;;  %v6661_v60 = vld [vmem:[%s12327_s4 + $0x240] sm:$0xff] }
  0xf2   :  { %v523_v7 = vpop.f32.mrf.mxu1  ;;  %985 = vmatmul.mubr.f32.gmra.mxu0 %v9105_v59  ;;  %1215 = vmatmul.mubr.f32.gmra.mxu1 %v9105_v59  ;;  %v9129_v8 = vpop.f32.mrf.mxu0  ;;  %v1363_v61 = vld [vmem:[%s12327_s4 + $0x80] sm:$0xff] }
  0xf3   :  { %v9132_v12 = vadd.f32 %v8993_v54, %v520_v5  ;;  %1463 = vmatpush1.msra.mxu0 %v6667_v0  ;;  %1686 = vmatpush1.msra.mxu1 %v1369_v1  ;;  %v524_v14 = vadd.f32 %v523_v7, %v9029_v17  ;;  %v6664_v17 = vld [vmem:[%s12327_s4 + $0x258] sm:$0xff] }
  0xf4   :  { %v525_v16 = vpop.f32.mrf.mxu1  ;;  %1464 = vmatprep.subr.mxu0 %v6666_v4  ;;  %1687 = vmatprep.subr.mxu1 %v1368_v6  ;;  %v9144_v20 = vpop.f32.mrf.mxu0  ;;  %v1362_v5 = vld [vmem:[%s12327_s4 + $0x78] sm:$0xff] }
  0xf5   :  { %v526_v22 = vadd.f32 %v525_v16, %v9043_v23  ;;  %6595 = vmatprep.mubr.msk.f32.mxu0 %vm823_vm2, %v9132_v12  ;;  %6622 = vmatprep.mubr.msk.f32.mxu1 %vm823_vm2, %v9132_v12  ;;  %v9165_v29 = vadd.f32 %v8996_v56, %v524_v14 }
  0xf6   :  { %v529_v27 = vpop.f32.mrf.mxu1  ;;  %991 = vmatmul.mubr.f32.gmra.mxu0 %v9135_v13  ;;  %1221 = vmatmul.mubr.f32.gmra.mxu1 %v9135_v13  ;;  %v9159_v23 = vpop.f32.mrf.mxu0 }
  0xf7   :  { %v9162_v28 = vadd.f32 %v8993_v54, %v526_v22  ;;  %1465 = vmatpush1.msra.mxu0 %v6665_v18  ;;  %1688 = vmatpush1.msra.mxu1 %v1367_v19  ;;  %v530_v31 = vadd.f32 %v529_v27, %v9057_v30  ;;  %v6662_v30 = vld [vmem:[%s12327_s4 + $0x248] sm:$0xff]  ;;  %v6659_v18 = vld [vmem:[%s12327_s4 + $0x230] sm:$0xff] }
  0xf8   :  { %v531_v32 = vpop.f32.mrf.mxu1  ;;  %1466 = vmatprep.subr.mxu0 %v6664_v17  ;;  %1689 = vmatprep.subr.mxu1 %v1366_v26  ;;  %v9174_v41 = vpop.f32.mrf.mxu0  ;;  %v1361_v19 = vld [vmem:[%s12327_s4 + $0x70] sm:$0xff]  ;;  %v1360_v26 = vld [vmem:[%s12327_s4 + $0x68] sm:$0xff] }
  0xf9   :  { %v532_v15 = vadd.f32 %v531_v32, %v9071_v37  ;;  %6596 = vmatprep.mubr.msk.f32.mxu0 %vm823_vm2, %v9162_v28  ;;  %6623 = vmatprep.mubr.msk.f32.mxu1 %vm823_vm2, %v9162_v28  ;;  %v9195_v52 = vadd.f32 %v8996_v56, %v530_v31 }
  0xfa   :  { %v535_v46 = vpop.f32.mrf.mxu1  ;;  %997 = vmatmul.mubr.f32.gmra.mxu0 %v9165_v29  ;;  %1227 = vmatmul.mubr.f32.gmra.mxu1 %v9165_v29  ;;  %v9189_v37 = vpop.f32.mrf.mxu0 }
  0xfb   :  { %v9192_v51 = vadd.f32 %v8993_v54, %v532_v15  ;;  %1467 = vmatpush1.msra.mxu0 %v6663_v33  ;;  %1690 = vmatpush1.msra.mxu1 %v1365_v34  ;;  %v536_v53 = vadd.f32 %v535_v46, %v9085_v50  ;;  %v6660_v50 = vld [vmem:[%s12327_s4 + $0x238] sm:$0xff]  ;;  %v6657_v15 = vld [vmem:[%s12327_s4 + $0x220] sm:$0xff] }
  0xfc   :  { %v537_v55 = vpop.f32.mrf.mxu1  ;;  %1468 = vmatprep.subr.mxu0 %v6662_v30  ;;  %1691 = vmatprep.subr.mxu1 %v1364_v21  ;;  %v9204_v0 = vpop.f32.mrf.mxu0  ;;  %v1359_v30 = vld [vmem:[%s12327_s4 + $0x60] sm:$0xff] }
  0xfd   :  { %v538_v1 = vadd.f32 %v537_v55, %v9099_v57  ;;  %6597 = vmatprep.mubr.msk.f32.mxu0 %vm823_vm2, %v9192_v51  ;;  %6624 = vmatprep.mubr.msk.f32.mxu1 %vm823_vm2, %v9192_v51  ;;  %v9225_v7 = vadd.f32 %v8996_v56, %v536_v53  ;;  %v1358_v53 = vld [vmem:[%s12327_s4 + $0x58] sm:$0xff] }
  0xfe   :  { %v541_v4 = vpop.f32.mrf.mxu1  ;;  %1003 = vmatmul.mubr.f32.gmra.mxu0 %v9195_v52  ;;  %1233 = vmatmul.mubr.f32.gmra.mxu1 %v9195_v52  ;;  %v9219_v57 = vpop.f32.mrf.mxu0 }
  0xff   :  { %v9222_v6 = vadd.f32 %v8993_v54, %v538_v1  ;;  %1469 = vmatpush1.msra.mxu0 %v6661_v60  ;;  %1692 = vmatpush1.msra.mxu1 %v1363_v61  ;;  %v542_v14 = vadd.f32 %v541_v4, %v9114_v2  ;;  %v6658_v2 = vld [vmem:[%s12327_s4 + $0x228] sm:$0xff]  ;;  %v1357_v4 = vld [vmem:[%s12327_s4 + $0x50] sm:$0xff] }
 0x100   :  { %v543_v16 = vpop.f32.mrf.mxu1  ;;  %1470 = vmatprep.subr.mxu0 %v6660_v50  ;;  %1693 = vmatprep.subr.mxu1 %v1362_v5  ;;  %v9234_v22 = vpop.f32.mrf.mxu0  ;;  %v6655_v5 = vld [vmem:[%s12327_s4 + $0x210] sm:$0xff] }
 0x101   :  { %v544_v17 = vadd.f32 %v543_v16, %v9129_v8  ;;  %6598 = vmatprep.mubr.msk.f32.mxu0 %vm823_vm2, %v9222_v6  ;;  %6625 = vmatprep.mubr.msk.f32.mxu1 %vm823_vm2, %v9222_v6  ;;  %v9255_v32 = vadd.f32 %v8996_v56, %v542_v14 }
 0x102   :  { %v547_v27 = vpop.f32.mrf.mxu1  ;;  %1009 = vmatmul.mubr.f32.gmra.mxu0 %v9225_v7  ;;  %1239 = vmatmul.mubr.f32.gmra.mxu1 %v9225_v7  ;;  %v9249_v8 = vpop.f32.mrf.mxu0 }
 0x103   :  { %v9252_v31 = vadd.f32 %v8993_v54, %v544_v17  ;;  %1471 = vmatpush1.msra.mxu0 %v6659_v18  ;;  %1694 = vmatpush1.msra.mxu1 %v1361_v19  ;;  %v548_v33 = vadd.f32 %v547_v27, %v9144_v20  ;;  %v6656_v20 = vld [vmem:[%s12327_s4 + $0x218] sm:$0xff]  ;;  %v1356_v18 = vld [vmem:[%s12327_s4 + $0x48] sm:$0xff] }
 0x104   :  { %v549_v34 = vpop.f32.mrf.mxu1  ;;  %1472 = vmatprep.subr.mxu0 %v6658_v2  ;;  %1695 = vmatprep.subr.mxu1 %v1360_v26  ;;  %v9264_v21 = vpop.f32.mrf.mxu0 }
 0x105   :  { %v550_v46 = vadd.f32 %v549_v34, %v9159_v23  ;;  %6599 = vmatprep.mubr.msk.f32.mxu0 %vm823_vm2, %v9252_v31  ;;  %6626 = vmatprep.mubr.msk.f32.mxu1 %vm823_vm2, %v9252_v31  ;;  %v9285_v61 = vadd.f32 %v8996_v56, %v548_v33  ;;  %v6653_v33 = vld [vmem:[%s12327_s4 + $0x200] sm:$0xff] }
 0x106   :  { %v553_v55 = vpop.f32.mrf.mxu1  ;;  %1015 = vmatmul.mubr.f32.gmra.mxu0 %v9255_v32  ;;  %1245 = vmatmul.mubr.f32.gmra.mxu1 %v9255_v32  ;;  %v9279_v23 = vpop.f32.mrf.mxu0  ;;  %v1355_v34 = vld [vmem:[%s12327_s4 + $0x40] sm:$0xff] }
 0x107   :  { %v9282_v60 = vadd.f32 %v8993_v54, %v550_v46  ;;  %1473 = vmatpush1.msra.mxu0 %v6657_v15  ;;  %1696 = vmatpush1.msra.mxu1 %v1359_v30  ;;  %v554_v1 = vadd.f32 %v553_v55, %v9174_v41  ;;  %v6654_v41 = vld [vmem:[%s12327_s4 + $0x208] sm:$0xff]  ;;  %v1354_v46 = vld [vmem:[%s12327_s4 + $0x38] sm:$0xff] }
 0x108   :  { %v555_v50 = vpop.f32.mrf.mxu1  ;;  %1474 = vmatprep.subr.mxu0 %v6656_v20  ;;  %1697 = vmatprep.subr.mxu1 %v1358_v53  ;;  %v9294_v14 = vpop.f32.mrf.mxu0 }
 0x109   :  { %v556_v16 = vadd.f32 %v555_v50, %v9189_v37  ;;  %6600 = vmatprep.mubr.msk.f32.mxu0 %vm823_vm2, %v9282_v60  ;;  %6627 = vmatprep.mubr.msk.f32.mxu1 %vm823_vm2, %v9282_v60  ;;  %v9315_v2 = vadd.f32 %v8996_v56, %v554_v1 }
 0x10a   :  { %v559_v19 = vpop.f32.mrf.mxu1  ;;  %1021 = vmatmul.mubr.f32.gmra.mxu0 %v9285_v61  ;;  %1251 = vmatmul.mubr.f32.gmra.mxu1 %v9285_v61  ;;  %v9309_v37 = vpop.f32.mrf.mxu0 }
 0x10b   :  { %v9312_v17 = vadd.f32 %v8993_v54, %v556_v16  ;;  %1475 = vmatpush1.msra.mxu0 %v6655_v5  ;;  %1698 = vmatpush1.msra.mxu1 %v1357_v4  ;;  %v560_v26 = vadd.f32 %v559_v19, %v9204_v0  ;;  %v6652_v0 = vld [vmem:[%s12327_s4 + $0x1f8] sm:$0xff]  ;;  %v6651_v5 = vld [vmem:[%s12327_s4 + $0x1f0] sm:$0xff] }
 0x10c   :  { %v561_v27 = vpop.f32.mrf.mxu1  ;;  %1476 = vmatprep.subr.mxu0 %v6654_v41  ;;  %1699 = vmatprep.subr.mxu1 %v1356_v18  ;;  %v9324_v15 = vpop.f32.mrf.mxu0  ;;  %v1353_v4 = vld [vmem:[%s12327_s4 + $0x30] sm:$0xff]  ;;  %v1352_v18 = vld [vmem:[%s12327_s4 + $0x28] sm:$0xff] }
 0x10d   :  { %v562_v30 = vadd.f32 %v561_v27, %v9219_v57  ;;  %6601 = vmatprep.mubr.msk.f32.mxu0 %vm823_vm2, %v9312_v17  ;;  %6628 = vmatprep.mubr.msk.f32.mxu1 %vm823_vm2, %v9312_v17  ;;  %v9345_v55 = vadd.f32 %v8996_v56, %v560_v26 }
 0x10e   :  { %v565_v20 = vpop.f32.mrf.mxu1  ;;  %1027 = vmatmul.mubr.f32.gmra.mxu0 %v9315_v2  ;;  %1257 = vmatmul.mubr.f32.gmra.mxu1 %v9315_v2  ;;  %v9339_v57 = vpop.f32.mrf.mxu0 }
 0x10f   :  { %v9342_v53 = vadd.f32 %v8993_v54, %v562_v30  ;;  %1477 = vmatpush1.msra.mxu0 %v6653_v33  ;;  %1700 = vmatpush1.msra.mxu1 %v1355_v34  ;;  %v566_v1 = vadd.f32 %v565_v20, %v9234_v22  ;;  %v6650_v22 = vld [vmem:[%s12327_s4 + $0x1e8] sm:$0xff]  ;;  %v6649_v30 = vld [vmem:[%s12327_s4 + $0x1e0] sm:$0xff] }
 0x110   :  { %v567_v50 = vpop.f32.mrf.mxu1  ;;  %1478 = vmatprep.subr.mxu0 %v6652_v0  ;;  %1701 = vmatprep.subr.mxu1 %v1354_v46  ;;  %v9354_v16 = vpop.f32.mrf.mxu0  ;;  %v1351_v0 = vld [vmem:[%s12327_s4 + $0x20] sm:$0xff] }
 0x111   :  { %v568_v41 = vadd.f32 %v567_v50, %v9249_v8  ;;  %6602 = vmatprep.mubr.msk.f32.mxu0 %vm823_vm2, %v9342_v53  ;;  %6629 = vmatprep.mubr.msk.f32.mxu1 %vm823_vm2, %v9342_v53  ;;  %v9375_v27 = vadd.f32 %v8996_v56, %v566_v1  ;;  %v1350_v1 = vld [vmem:[%s12327_s4 + $0x18] sm:$0xff] }
 0x112   :  { %v571_v19 = vpop.f32.mrf.mxu1  ;;  %1033 = vmatmul.mubr.f32.gmra.mxu0 %v9345_v55  ;;  %1263 = vmatmul.mubr.f32.gmra.mxu1 %v9345_v55  ;;  %v9369_v8 = vpop.f32.mrf.mxu0 }
 0x113   :  { %v9372_v26 = vadd.f32 %v8993_v54, %v568_v41  ;;  %1479 = vmatpush1.msra.mxu0 %v6651_v5  ;;  %1702 = vmatpush1.msra.mxu1 %v1353_v4  ;;  %v572_v33 = vadd.f32 %v571_v19, %v9264_v21  ;;  %v6648_v21 = vld [vmem:[%s12327_s4 + $0x1d8] sm:$0xff]  ;;  %v1349_v19 = vld [vmem:[%s12327_s4 + $0x10] sm:$0xff] }
 0x114   :  { %v573_v34 = vpop.f32.mrf.mxu1  ;;  %1480 = vmatprep.subr.mxu0 %v6650_v22  ;;  %1703 = vmatprep.subr.mxu1 %v1352_v18  ;;  %v9384_v46 = vpop.f32.mrf.mxu0  ;;  %v6647_v18 = vld [vmem:[%s12327_s4 + $0x1d0] sm:$0xff] }
 0x115   :  { %v574_v20 = vadd.f32 %v573_v34, %v9279_v23  ;;  %6603 = vmatprep.mubr.msk.f32.mxu0 %vm823_vm2, %v9372_v26  ;;  %6630 = vmatprep.mubr.msk.f32.mxu1 %vm823_vm2, %v9372_v26  ;;  %v9405_v4 = vadd.f32 %v8996_v56, %v572_v33  ;;  %v1348_v33 = vld [vmem:[%s12327_s4 + $0x8] sm:$0xff] }
 0x116   :  { %v577_v50 = vpop.f32.mrf.mxu1  ;;  %1039 = vmatmul.mubr.f32.gmra.mxu0 %v9375_v27  ;;  %1269 = vmatmul.mubr.f32.gmra.mxu1 %v9375_v27  ;;  %v9399_v23 = vpop.f32.mrf.mxu0 }
 0x117   :  { %v9402_v5 = vadd.f32 %v8993_v54, %v574_v20  ;;  %1481 = vmatpush1.msra.mxu0 %v6649_v30  ;;  %1704 = vmatpush1.msra.mxu1 %v1351_v0  ;;  %v578_v41 = vadd.f32 %v577_v50, %v9294_v14  ;;  %v6646_v14 = vld [vmem:[%s12327_s4 + $0x1c8] sm:$0xff]  ;;  %v6645_v20 = vld [vmem:[%s12327_s4 + $0x1c0] sm:$0xff] }
 0x118   :  { %v579_v22 = vpop.f32.mrf.mxu1  ;;  %1482 = vmatprep.subr.mxu0 %v6648_v21  ;;  %1705 = vmatprep.subr.mxu1 %v1350_v1  ;;  %v9414_v34 = vpop.f32.mrf.mxu0 }
 0x119   :  { %v580_v30 = vadd.f32 %v579_v22, %v9309_v37  ;;  %6604 = vmatprep.mubr.msk.f32.mxu0 %vm823_vm2, %v9402_v5  ;;  %6631 = vmatprep.mubr.msk.f32.mxu1 %vm823_vm2, %v9402_v5  ;;  %v9436_v21 = vadd.f32 %v8996_v56, %v578_v41  ;;  %v6644_v22 = vld [vmem:[%s12327_s4 + $0x1b8] sm:$0xff]  ;;  %v1347_v41 = vld [vmem:[%s12327_s4] sm:$0xff] }
 0x11a   :  { %v583_v0 = vpop.f32.mrf.mxu1  ;;  %1045 = vmatmul.mubr.f32.gmra.mxu0 %v9405_v4  ;;  %1275 = vmatmul.mubr.f32.gmra.mxu1 %v9405_v4 }
 0x11b   :  { %v9430_v37 = vadd.f32 %v8993_v54, %v580_v30  ;;  %1483 = vmatpush1.msra.mxu0 %v6647_v18  ;;  %1706 = vmatpush1.msra.mxu1 %v1349_v19  ;;  %v584_v1 = vadd.f32 %v583_v0, %v9324_v15  ;;  %v367_v30 = vpop.f32.mrf.mxu0  ;;  %v6643_v15 = vld [vmem:[%s12327_s4 + $0x1b0] sm:$0xff] }
 0x11c   :  { %v585_v50 = vpop.f32.mrf.mxu1  ;;  %1484 = vmatprep.subr.mxu0 %v6646_v14  ;;  %1707 = vmatprep.subr.mxu1 %v1348_v33  ;;  %v6696_v14 = vld [vmem:[%s12327_s4 + $0x358] sm:$0xff] }
 0x11d   :  { %v586_v18 = vadd.f32 %v585_v50, %v9339_v57  ;;  %6605 = vmatprep.mubr.msk.f32.mxu0 %vm823_vm2, %v9430_v37  ;;  %6632 = vmatprep.mubr.msk.f32.mxu1 %vm823_vm2, %v9430_v37  ;;  %v9462_v33 = vadd.f32 %v8996_v56, %v584_v1  ;;  %v1399_v1 = vld [vmem:[%s12327_s4 + $0x1a0] sm:$0xff] }
 0x11e   :  { %1485 = vmatpush1.msra.mxu0 %v6645_v20  ;;  %v589_v19 = vpop.f32.mrf.mxu1  ;;  %1281 = vmatmul.mubr.f32.gmra.mxu1 %v9436_v21  ;;  %v1400_v20 = vld [vmem:[%s12327_s4 + $0x1a8] sm:$0xff] }
 0x11f   :  { %v9455_v57 = vadd.f32 %v8993_v54, %v586_v18  ;;  %1051 = vmatmul.mubr.f32.gmra.mxu0 %v9436_v21  ;;  %1486 = vmatprep.subr.mxu0 %v6644_v22  ;;  %v590_v0 = vadd.f32 %v589_v19, %v9354_v16  ;;  %v371_v18 = vpop.f32.mrf.mxu0  ;;  %v6695_v16 = vld [vmem:[%s12327_s4 + $0x350] sm:$0xff] }
 0x120   :  { %v591_v50 = vpop.f32.mrf.mxu1  ;;  %1487 = vmatpush1.msra.mxu0 %v6643_v15  ;;  %1708 = vmatpush1.msra.mxu1 %v1347_v41  ;;  %v6694_v15 = vld [vmem:[%s12327_s4 + $0x348] sm:$0xff] }
 0x121   :  { %v592_v3 = vadd.f32 %v591_v50, %v9369_v8  ;;  %6606 = vmatprep.mubr.msk.f32.mxu0 %vm823_vm2, %v9455_v57  ;;  %6633 = vmatprep.mubr.msk.f32.mxu1 %vm823_vm2, %v9455_v57  ;;  %v9488_v41 = vadd.f32 %v8996_v56, %v590_v0  ;;  %v1397_v0 = vld [vmem:[%s12327_s4 + $0x190] sm:$0xff] }
 0x122   :  { %v595_v22 = vpop.f32.mrf.mxu1  ;;  %1287 = vmatmul.mubr.f32.gmra.mxu1 %v9462_v33  ;;  %1498 = vmatprep.subr.mxu0 %v6696_v14  ;;  %v373_v14 = vpop.f32.mrf.mxu0 }
 0x123   :  { %v9481_v8 = vadd.f32 %v8993_v54, %v592_v3  ;;  %1057 = vmatmul.mubr.f32.gmra.mxu0 %v9462_v33  ;;  %1719 = vmatprep.subr.mxu1 %v1400_v20  ;;  %v596_v19 = vadd.f32 %v595_v22, %v9384_v46  ;;  %v1398_v3 = vld [vmem:[%s12327_s4 + $0x198] sm:$0xff]  ;;  %v6693_v46 = vld [vmem:[%s12327_s4 + $0x340] sm:$0xff] }
 0x124   :  { %v597_v50 = vpop.f32.mrf.mxu1  ;;  %1499 = vmatpush2.msra.mxu0 %v6695_v16  ;;  %1720 = vmatpush2.msra.mxu1 %v1399_v1  ;;  %v6692_v16 = vld [vmem:[%s12327_s4 + $0x338] sm:$0xff] }
 0x125   :  { %v598_v44 = vadd.f32 %v597_v50, %v9399_v23  ;;  %6607 = vmatprep.mubr.msk.f32.mxu0 %vm823_vm2, %v9481_v8  ;;  %6634 = vmatprep.mubr.msk.f32.mxu1 %vm823_vm2, %v9481_v8  ;;  %v9514_v1 = vadd.f32 %v8996_v56, %v596_v19  ;;  %v6691_v19 = vld [vmem:[%s12327_s4 + $0x330] sm:$0xff] }
 0x126   :  { %v601_v20 = vpop.f32.mrf.mxu1  ;;  %1293 = vmatmul.mubr.f32.gmra.mxu1 %v9488_v41  ;;  %1500 = vmatprep.subr.mxu0 %v6694_v15  ;;  %v377_v15 = vpop.f32.mrf.mxu0 }
 0x127   :  { %v9507_v23 = vadd.f32 %v8993_v54, %v598_v44  ;;  %1063 = vmatmul.mubr.f32.gmra.mxu0 %v9488_v41  ;;  %1721 = vmatprep.subr.mxu1 %v1398_v3  ;;  %v602_v22 = vadd.f32 %v601_v20, %v9414_v34  ;;  %v1396_v44 = vld [vmem:[%s12327_s4 + $0x188] sm:$0xff]  ;;  %v1395_v34 = vld [vmem:[%s12327_s4 + $0x180] sm:$0xff] }
 0x128   :  { %v603_v50 = vpop.f32.mrf.mxu1  ;;  %1501 = vmatpush2.msra.mxu0 %v6693_v46  ;;  %1722 = vmatpush2.msra.mxu1 %v1397_v0  ;;  %v6690_v46 = vld [vmem:[%s12327_s4 + $0x328] sm:$0xff]  ;;  %v379_v47 = vpop.f32.mrf.mxu0 }
 0x129   :  { %v604_v49 = vadd.f32 %v603_v50, %v367_v30  ;;  %6608 = vmatprep.mubr.msk.f32.mxu0 %vm823_vm2, %v9507_v23  ;;  %6635 = vmatprep.mubr.msk.f32.mxu1 %vm823_vm2, %v9507_v23  ;;  %v9539_v0 = vadd.f32 %v8996_v56, %v602_v22  ;;  %v6689_v22 = vld [vmem:[%s12327_s4 + $0x320] sm:$0xff] }
 0x12a   :  { %v607_v3 = vpop.f32.mrf.mxu1  ;;  %1299 = vmatmul.mubr.f32.gmra.mxu1 %v9514_v1  ;;  %1502 = vmatprep.subr.mxu0 %v6692_v16 }
 0x12b   :  { %v9532_v30 = vadd.f32 %v8993_v54, %v604_v49  ;;  %1069 = vmatmul.mubr.f32.gmra.mxu0 %v9514_v1  ;;  %1723 = vmatprep.subr.mxu1 %v1396_v44  ;;  %v608_v20 = vadd.f32 %v607_v3, %v371_v18  ;;  %v1394_v49 = vld [vmem:[%s12327_s4 + $0x178] sm:$0xff]  ;;  %v1393_v18 = vld [vmem:[%s12327_s4 + $0x170] sm:$0xff] }
 0x12c   :  { %v609_v50 = vpop.f32.mrf.mxu1  ;;  %1503 = vmatpush2.msra.mxu0 %v6691_v19  ;;  %1724 = vmatpush2.msra.mxu1 %v1395_v34  ;;  %v6688_v19 = vld [vmem:[%s12327_s4 + $0x318] sm:$0xff] }
 0x12d   :  { %12361 = vst [vmem:[#allocation5_spill] sm:$0xff] %v9532_v30  ;;  %v610_v16 = vadd.f32 %v609_v50, %v373_v14  ;;  %6609 = vmatprep.mubr.msk.f32.mxu0 %vm823_vm2, %v9532_v30  ;;  %6636 = vmatprep.mubr.msk.f32.mxu1 %vm823_vm2, %v9532_v30  ;;  %v9563_v34 = vadd.f32 %v8996_v56, %v608_v20  ;;  %v383_v30 = vpop.f32.mrf.mxu0  ;;  %v6687_v20 = vld [vmem:[%s12327_s4 + $0x310] sm:$0xff] }
 0x12e   :  { %v613_v44 = vpop.f32.mrf.mxu1  ;;  %1305 = vmatmul.mubr.f32.gmra.mxu1 %v9539_v0  ;;  %1504 = vmatprep.subr.mxu0 %v6690_v46  ;;  %v1392_v46 = vld [vmem:[%s12327_s4 + $0x168] sm:$0xff] }
 0x12f   :  { %v9556_v14 = vadd.f32 %v8993_v54, %v610_v16  ;;  %1075 = vmatmul.mubr.f32.gmra.mxu0 %v9539_v0  ;;  %1725 = vmatprep.subr.mxu1 %v1394_v49  ;;  %v614_v3 = vadd.f32 %v613_v44, %v377_v15  ;;  %v1391_v15 = vld [vmem:[%s12327_s4 + $0x160] sm:$0xff] }
 0x130   :  { %v615_v50 = vpop.f32.mrf.mxu1  ;;  %1505 = vmatpush2.msra.mxu0 %v6689_v22  ;;  %1726 = vmatpush2.msra.mxu1 %v1393_v18  ;;  %v6686_v22 = vld [vmem:[%s12327_s4 + $0x308] sm:$0xff] }
 0x131   :  { %12362 = vst [vmem:[#allocation6_spill] sm:$0xff] %v9556_v14  ;;  %v616_v16 = vadd.f32 %v615_v50, %v379_v47  ;;  %6610 = vmatprep.mubr.msk.f32.mxu0 %vm823_vm2, %v9556_v14  ;;  %6637 = vmatprep.mubr.msk.f32.mxu1 %vm823_vm2, %v9556_v14  ;;  %v9587_v18 = vadd.f32 %v8996_v56, %v614_v3  ;;  %v385_v50 = vpop.f32.mrf.mxu0  ;;  %v6685_v3 = vld [vmem:[%s12327_s4 + $0x300] sm:$0xff] }
 0x132   :  { %v619_v49 = vpop.f32.mrf.mxu1  ;;  %1311 = vmatmul.mubr.f32.gmra.mxu1 %v9563_v34  ;;  %1506 = vmatprep.subr.mxu0 %v6688_v19  ;;  %v1390_v19 = vld [vmem:[%s12327_s4 + $0x158] sm:$0xff] }
 0x133   :  { %v9580_v47 = vadd.f32 %v8993_v54, %v616_v16  ;;  %1081 = vmatmul.mubr.f32.gmra.mxu0 %v9563_v34  ;;  %1727 = vmatprep.subr.mxu1 %v1392_v46  ;;  %v620_v44 = vadd.f32 %v619_v49, %v383_v30  ;;  %v1389_v30 = vld [vmem:[%s12327_s4 + $0x150] sm:$0xff] }
 0x134   :  { %v621_v14 = vpop.f32.mrf.mxu1  ;;  %1507 = vmatpush2.msra.mxu0 %v6687_v20  ;;  %1728 = vmatpush2.msra.mxu1 %v1391_v15  ;;  %v6684_v20 = vld [vmem:[%s12327_s4 + $0x2f8] sm:$0xff] }
 0x135   :  { %v622_v16 = vadd.f32 %v621_v14, %v385_v50  ;;  %6611 = vmatprep.mubr.msk.f32.mxu0 %vm823_vm2, %v9580_v47  ;;  %6638 = vmatprep.mubr.msk.f32.mxu1 %vm823_vm2, %v9580_v47  ;;  %v9611_v15 = vadd.f32 %v8996_v56, %v620_v44  ;;  %v6683_v44 = vld [vmem:[%s12327_s4 + $0x2f0] sm:$0xff] }
 0x136   :  { %v625_v46 = vpop.f32.mrf.mxu1  ;;  %1317 = vmatmul.mubr.f32.gmra.mxu1 %v9587_v18  ;;  %1508 = vmatprep.subr.mxu0 %v6686_v22  ;;  %v1388_v22 = vld [vmem:[%s12327_s4 + $0x148] sm:$0xff] }
 0x137   :  { %v9604_v14 = vadd.f32 %v8993_v54, %v622_v16  ;;  %1087 = vmatmul.mubr.f32.gmra.mxu0 %v9587_v18  ;;  %1729 = vmatprep.subr.mxu1 %v1390_v19  ;;  %v626_v49 = vadd.f32 %v625_v46, %v8965_v35  ;;  %v1387_v35 = vld [vmem:[%s12327_s4 + $0x140] sm:$0xff] }
 0x138   :  { %v627_v50 = vpop.f32.mrf.mxu1  ;;  %1509 = vmatpush2.msra.mxu0 %v6685_v3  ;;  %1730 = vmatpush2.msra.mxu1 %v1389_v30  ;;  %v6682_v3 = vld [vmem:[%s12327_s4 + $0x2e8] sm:$0xff] }
 0x139   :  { %v628_v16 = vadd.f32 %v627_v50, %v8967_v36  ;;  %6612 = vmatprep.mubr.msk.f32.mxu0 %vm823_vm2, %v9604_v14  ;;  %6639 = vmatprep.mubr.msk.f32.mxu1 %vm823_vm2, %v9604_v14  ;;  %v9637_v30 = vadd.f32 %v8996_v56, %v626_v49  ;;  %v6681_v49 = vld [vmem:[%s12327_s4 + $0x2e0] sm:$0xff] }
 0x13a   :  { %v631_v19 = vpop.f32.mrf.mxu1  ;;  %1323 = vmatmul.mubr.f32.gmra.mxu1 %v9611_v15  ;;  %1510 = vmatprep.subr.mxu0 %v6684_v20  ;;  %v1386_v20 = vld [vmem:[%s12327_s4 + $0x138] sm:$0xff] }
 0x13b   :  { %v9630_v36 = vadd.f32 %v8993_v54, %v628_v16  ;;  %1093 = vmatmul.mubr.f32.gmra.mxu0 %v9611_v15  ;;  %1731 = vmatprep.subr.mxu1 %v1388_v22  ;;  %v632_v46 = vadd.f32 %v631_v19, %v8969_v38  ;;  %v1385_v38 = vld [vmem:[%s12327_s4 + $0x130] sm:$0xff] }
 0x13c   :  { %v633_v50 = vpop.f32.mrf.mxu1  ;;  %1511 = vmatpush2.msra.mxu0 %v6683_v44  ;;  %1732 = vmatpush2.msra.mxu1 %v1387_v35  ;;  %v6680_v44 = vld [vmem:[%s12327_s4 + $0x2d8] sm:$0xff] }
 0x13d   :  { %v634_v16 = vadd.f32 %v633_v50, %v8971_v40  ;;  %6613 = vmatprep.mubr.msk.f32.mxu0 %vm823_vm2, %v9630_v36  ;;  %6640 = vmatprep.mubr.msk.f32.mxu1 %vm823_vm2, %v9630_v36  ;;  %v9663_v35 = vadd.f32 %v8996_v56, %v632_v46  ;;  %v6679_v46 = vld [vmem:[%s12327_s4 + $0x2d0] sm:$0xff] }
 0x13e   :  { %v637_v22 = vpop.f32.mrf.mxu1  ;;  %1329 = vmatmul.mubr.f32.gmra.mxu1 %v9637_v30  ;;  %1512 = vmatprep.subr.mxu0 %v6682_v3  ;;  %v1384_v3 = vld [vmem:[%s12327_s4 + $0x128] sm:$0xff] }
 0x13f   :  { %v9656_v40 = vadd.f32 %v8993_v54, %v634_v16  ;;  %1099 = vmatmul.mubr.f32.gmra.mxu0 %v9637_v30  ;;  %1733 = vmatprep.subr.mxu1 %v1386_v20  ;;  %v638_v19 = vadd.f32 %v637_v22, %v8973_v42  ;;  %v1383_v42 = vld [vmem:[%s12327_s4 + $0x120] sm:$0xff] }
 0x140   :  { %v639_v50 = vpop.f32.mrf.mxu1  ;;  %1513 = vmatpush2.msra.mxu0 %v6681_v49  ;;  %1734 = vmatpush2.msra.mxu1 %v1385_v38  ;;  %v1382_v49 = vld [vmem:[%s12327_s4 + $0x118] sm:$0xff] }
 0x141   :  { %v640_v16 = vadd.f32 %v639_v50, %v8975_v43  ;;  %6614 = vmatprep.mubr.msk.f32.mxu0 %vm823_vm2, %v9656_v40  ;;  %6641 = vmatprep.mubr.msk.f32.mxu1 %vm823_vm2, %v9656_v40  ;;  %v9689_v38 = vadd.f32 %v8996_v56, %v638_v19  ;;  %v1381_v19 = vld [vmem:[%s12327_s4 + $0x110] sm:$0xff] }
 0x142   :  { %v643_v20 = vpop.f32.mrf.mxu1  ;;  %1335 = vmatmul.mubr.f32.gmra.mxu1 %v9663_v35  ;;  %1514 = vmatprep.subr.mxu0 %v6680_v44  ;;  %v6678_v44 = vld [vmem:[%s12327_s4 + $0x2c8] sm:$0xff] }
 0x143   :  { %v9682_v43 = vadd.f32 %v8993_v54, %v640_v16  ;;  %1105 = vmatmul.mubr.f32.gmra.mxu0 %v9663_v35  ;;  %1735 = vmatprep.subr.mxu1 %v1384_v3  ;;  %v644_v50 = vadd.f32 %v643_v20, %v8979_v45  ;;  %v6677_v3 = vld [vmem:[%s12327_s4 + $0x2c0] sm:$0xff]  ;;  %v1380_v45 = vld [vmem:[%s12327_s4 + $0x108] sm:$0xff]  ;;  %v6675_v20 = vld [vmem:[%s12327_s4 + $0x2b0] sm:$0xff] }
 0x144   :  { %v645_v22 = vpop.f32.mrf.mxu1  ;;  %1515 = vmatpush2.msra.mxu0 %v6679_v46  ;;  %1736 = vmatpush2.msra.mxu1 %v1383_v42  ;;  %v1379_v46 = vld [vmem:[%s12327_s4 + $0x100] sm:$0xff] }
 0x145   :  { %v646_v16 = vadd.f32 %v645_v22, %v8984_v48  ;;  %6615 = vmatprep.mubr.msk.f32.mxu0 %vm823_vm2, %v9682_v43  ;;  %6642 = vmatprep.mubr.msk.f32.mxu1 %vm823_vm2, %v9682_v43  ;;  %v9720_v42 = vadd.f32 %v8996_v56, %v644_v50  ;;  %v12363_v56 = vmov 0.0   ;;  %v12365_v22 = vld [vmem:[#allocation6_spill] sm:$0xff]  ;;  %v6770_v50 = vld [vmem:[%s12329_s6 + $0x178] sm:$0xff] }
 0x146   :  { %1341 = vmatmul.mubr.f32.gmra.mxu1 %v9689_v38  ;;  %1737 = vmatprep.subr.mxu1 %v1382_v49  ;;  %v12364_v49 = vld [vmem:[#allocation5_spill] sm:$0xff] }
 0x147   :  { %v9711_v48 = vadd.f32 %v8993_v54, %v646_v16  ;;  %1111 = vmatmul.mubr.f32.gmra.mxu0 %v9689_v38  ;;  %1516 = vmatprep.subr.mxu0 %v6678_v44  ;;  %v6676_v54 = vld [vmem:[%s12327_s4 + $0x2b8] sm:$0xff]  ;;  %v6771_v44 = vld [vmem:[%s12329_s6 + $0x180] sm:$0xff]  ;;  %v6769_v16 = vld [vmem:[%s12329_s6 + $0x170] sm:$0xff] }
 0x148   :  { %1738 = vmatpush2.msra.mxu1 %v1381_v19  ;;  %6723 = vmatprep.mubr.msk.f32.mxu1 %vm823_vm2, %v8999_v62  ;;  %v6764_v62 = vld [vmem:[%s12329_s6 + $0x148] sm:$0xff] }
 0x149   :  { %1517 = vmatpush2.msra.mxu0 %v6677_v3  ;;  %1739 = vmatprep.subr.mxu1 %v1380_v45  ;;  %v2081_v45 = vld [vmem:[%s12329_s6 + $0x98] sm:$0xff] }
 0x14a   :  { %6616 = vmatprep.mubr.msk.f32.mxu0 %vm823_vm2, %v9711_v48  ;;  %1740 = vmatpush2.msra.mxu1 %v1379_v46 }
 0x14b   :  { %1117 = vmatmul.mubr.f32.gmra.mxu0 %v9720_v42  ;;  %1742 = vmatmul.mubr.f32.vlgmr.msra.gmra.mxu1 %v9002_v63  ;;  %v2077_v63 = vld [vmem:[%s12329_s6 + $0x78] sm:$0xff] }
 0x14c   :  { %1518 = vmatprep.subr.mxu0 %v6676_v54  ;;  %6697 = vmatprep.mubr.msk.f32.mxu0 %vm823_vm2, %v9018_v10 }
 0x14d   :  { %6724 = vmatprep.mubr.msk.f32.mxu1 %vm823_vm2, %v9018_v10  ;;  %1519 = vmatpush2.msra.mxu0 %v6675_v20  ;;  %v6763_v10 = vld [vmem:[%s12329_s6 + $0x140] sm:$0xff] }
 0x14e   :  { %2185 = vmatprep.subr.mxu0 %v12363_v56  ;;  %2370 = vmatprep.subr.mxu1 %v12363_v56 }
 0x14f   :  { %1521 = vmatmul.mubr.f32.vlgmr.msra.gmra.mxu0 %v9021_v11  ;;  %1748 = vmatmul.mubr.f32.gmra.mxu1 %v9021_v11  ;;  %v2076_v11 = vld [vmem:[%s12329_s6 + $0x70] sm:$0xff] }
 0x150   :  { %6698 = vmatprep.mubr.msk.f32.mxu0 %vm823_vm2, %v9046_v24  ;;  %6725 = vmatprep.mubr.msk.f32.mxu1 %vm823_vm2, %v9046_v24  ;;  %v6762_v24 = vld [vmem:[%s12329_s6 + $0x138] sm:$0xff] }
 0x151   :  { %2186 = vmatpush1.msra.mxu0 %v6764_v62  ;;  %2371 = vmatpush1.msra.mxu1 %v2077_v63 }
 0x152   :  { %2187 = vmatprep.subr.mxu0 %v12363_v56  ;;  %2372 = vmatprep.subr.mxu1 %v12363_v56 }
 0x153   :  { %1527 = vmatmul.mubr.f32.gmra.mxu0 %v9049_v25  ;;  %1754 = vmatmul.mubr.f32.gmra.mxu1 %v9049_v25  ;;  %v2075_v25 = vld [vmem:[%s12329_s6 + $0x68] sm:$0xff] }
 0x154   :  { %6699 = vmatprep.mubr.msk.f32.mxu0 %vm823_vm2, %v9074_v39  ;;  %6726 = vmatprep.mubr.msk.f32.mxu1 %vm823_vm2, %v9074_v39  ;;  %v6761_v39 = vld [vmem:[%s12329_s6 + $0x130] sm:$0xff] }
 0x155   :  { %2188 = vmatpush1.msra.mxu0 %v6763_v10  ;;  %2373 = vmatpush1.msra.mxu1 %v2076_v11 }
 0x156   :  { %2189 = vmatprep.subr.mxu0 %v12363_v56  ;;  %2374 = vmatprep.subr.mxu1 %v12363_v56 }
 0x157   :  { %1533 = vmatmul.mubr.f32.gmra.mxu0 %v9077_v9  ;;  %1760 = vmatmul.mubr.f32.gmra.mxu1 %v9077_v9  ;;  %v2074_v9 = vld [vmem:[%s12329_s6 + $0x60] sm:$0xff] }
 0x158   :  { %6700 = vmatprep.mubr.msk.f32.mxu0 %vm823_vm2, %v9102_v58  ;;  %6727 = vmatprep.mubr.msk.f32.mxu1 %vm823_vm2, %v9102_v58  ;;  %v6760_v58 = vld [vmem:[%s12329_s6 + $0x128] sm:$0xff] }
 0x159   :  { %2190 = vmatpush1.msra.mxu0 %v6762_v24  ;;  %2375 = vmatpush1.msra.mxu1 %v2075_v25  ;;  %v2079_v24 = vld [vmem:[%s12329_s6 + $0x88] sm:$0xff] }
 0x15a   :  { %2191 = vmatprep.subr.mxu0 %v12363_v56  ;;  %2376 = vmatprep.subr.mxu1 %v12363_v56 }
 0x15b   :  { %1539 = vmatmul.mubr.f32.gmra.mxu0 %v9105_v59  ;;  %1766 = vmatmul.mubr.f32.gmra.mxu1 %v9105_v59  ;;  %v2073_v59 = vld [vmem:[%s12329_s6 + $0x58] sm:$0xff] }
 0x15c   :  { %6701 = vmatprep.mubr.msk.f32.mxu0 %vm823_vm2, %v9132_v12  ;;  %6728 = vmatprep.mubr.msk.f32.mxu1 %vm823_vm2, %v9132_v12  ;;  %v6759_v12 = vld [vmem:[%s12329_s6 + $0x120] sm:$0xff] }
 0x15d   :  { %2192 = vmatpush1.msra.mxu0 %v6761_v39  ;;  %2377 = vmatpush1.msra.mxu1 %v2074_v9  ;;  %v2078_v9 = vld [vmem:[%s12329_s6 + $0x80] sm:$0xff] }
 0x15e   :  { %2193 = vmatprep.subr.mxu0 %v12363_v56  ;;  %2378 = vmatprep.subr.mxu1 %v12363_v56 }
 0x15f   :  { %1545 = vmatmul.mubr.f32.gmra.mxu0 %v9135_v13  ;;  %1772 = vmatmul.mubr.f32.gmra.mxu1 %v9135_v13  ;;  %v2072_v13 = vld [vmem:[%s12329_s6 + $0x50] sm:$0xff] }
 0x160   :  { %6702 = vmatprep.mubr.msk.f32.mxu0 %vm823_vm2, %v9162_v28  ;;  %6729 = vmatprep.mubr.msk.f32.mxu1 %vm823_vm2, %v9162_v28  ;;  %v6758_v28 = vld [vmem:[%s12329_s6 + $0x118] sm:$0xff] }
 0x161   :  { %2194 = vmatpush1.msra.mxu0 %v6760_v58  ;;  %2379 = vmatpush1.msra.mxu1 %v2073_v59 }
 0x162   :  { %2195 = vmatprep.subr.mxu0 %v12363_v56  ;;  %2380 = vmatprep.subr.mxu1 %v12363_v56 }
 0x163   :  { %1551 = vmatmul.mubr.f32.gmra.mxu0 %v9165_v29  ;;  %1778 = vmatmul.mubr.f32.gmra.mxu1 %v9165_v29  ;;  %v2071_v29 = vld [vmem:[%s12329_s6 + $0x48] sm:$0xff] }
 0x164   :  { %6703 = vmatprep.mubr.msk.f32.mxu0 %vm823_vm2, %v9192_v51  ;;  %6730 = vmatprep.mubr.msk.f32.mxu1 %vm823_vm2, %v9192_v51  ;;  %v6757_v51 = vld [vmem:[%s12329_s6 + $0x110] sm:$0xff] }
 0x165   :  { %2196 = vmatpush1.msra.mxu0 %v6759_v12  ;;  %2381 = vmatpush1.msra.mxu1 %v2072_v13  ;;  %v6765_v12 = vld [vmem:[%s12329_s6 + $0x150] sm:$0xff] }
 0x166   :  { %2197 = vmatprep.subr.mxu0 %v12363_v56  ;;  %2382 = vmatprep.subr.mxu1 %v12363_v56 }
 0x167   :  { %1557 = vmatmul.mubr.f32.gmra.mxu0 %v9195_v52  ;;  %1784 = vmatmul.mubr.f32.gmra.mxu1 %v9195_v52  ;;  %v2070_v52 = vld [vmem:[%s12329_s6 + $0x40] sm:$0xff] }
 0x168   :  { %6704 = vmatprep.mubr.msk.f32.mxu0 %vm823_vm2, %v9222_v6  ;;  %6731 = vmatprep.mubr.msk.f32.mxu1 %vm823_vm2, %v9222_v6  ;;  %v6756_v6 = vld [vmem:[%s12329_s6 + $0x108] sm:$0xff] }
 0x169   :  { %2198 = vmatpush1.msra.mxu0 %v6758_v28  ;;  %2383 = vmatpush1.msra.mxu1 %v2071_v29 }
 0x16a   :  { %2199 = vmatprep.subr.mxu0 %v12363_v56  ;;  %2384 = vmatprep.subr.mxu1 %v12363_v56 }
 0x16b   :  { %1563 = vmatmul.mubr.f32.gmra.mxu0 %v9225_v7  ;;  %1790 = vmatmul.mubr.f32.gmra.mxu1 %v9225_v7  ;;  %v2069_v7 = vld [vmem:[%s12329_s6 + $0x38] sm:$0xff] }
 0x16c   :  { %6705 = vmatprep.mubr.msk.f32.mxu0 %vm823_vm2, %v9252_v31  ;;  %6732 = vmatprep.mubr.msk.f32.mxu1 %vm823_vm2, %v9252_v31  ;;  %v6755_v31 = vld [vmem:[%s12329_s6 + $0x100] sm:$0xff] }
 0x16d   :  { %2200 = vmatpush1.msra.mxu0 %v6757_v51  ;;  %2385 = vmatpush1.msra.mxu1 %v2070_v52 }
 0x16e   :  { %2201 = vmatprep.subr.mxu0 %v12363_v56  ;;  %2386 = vmatprep.subr.mxu1 %v12363_v56 }
 0x16f   :  { %1569 = vmatmul.mubr.f32.gmra.mxu0 %v9255_v32  ;;  %1796 = vmatmul.mubr.f32.gmra.mxu1 %v9255_v32  ;;  %v2068_v32 = vld [vmem:[%s12329_s6 + $0x30] sm:$0xff] }
 0x170   :  { %6706 = vmatprep.mubr.msk.f32.mxu0 %vm823_vm2, %v9282_v60  ;;  %6733 = vmatprep.mubr.msk.f32.mxu1 %vm823_vm2, %v9282_v60  ;;  %v6754_v60 = vld [vmem:[%s12329_s6 + $0xf8] sm:$0xff] }
 0x171   :  { %2202 = vmatpush1.msra.mxu0 %v6756_v6  ;;  %2387 = vmatpush1.msra.mxu1 %v2069_v7 }
 0x172   :  { %2203 = vmatprep.subr.mxu0 %v12363_v56  ;;  %2388 = vmatprep.subr.mxu1 %v12363_v56 }
 0x173   :  { %1575 = vmatmul.mubr.f32.gmra.mxu0 %v9285_v61  ;;  %1802 = vmatmul.mubr.f32.gmra.mxu1 %v9285_v61  ;;  %v2067_v61 = vld [vmem:[%s12329_s6 + $0x28] sm:$0xff] }
 0x174   :  { %6707 = vmatprep.mubr.msk.f32.mxu0 %vm823_vm2, %v9312_v17  ;;  %6734 = vmatprep.mubr.msk.f32.mxu1 %vm823_vm2, %v9312_v17  ;;  %v6753_v17 = vld [vmem:[%s12329_s6 + $0xf0] sm:$0xff] }
 0x175   :  { %2204 = vmatpush1.msra.mxu0 %v6755_v31  ;;  %2389 = vmatpush1.msra.mxu1 %v2068_v32 }
 0x176   :  { %2205 = vmatprep.subr.mxu0 %v12363_v56  ;;  %2390 = vmatprep.subr.mxu1 %v12363_v56 }
 0x177   :  { %1581 = vmatmul.mubr.f32.gmra.mxu0 %v9315_v2  ;;  %1808 = vmatmul.mubr.f32.gmra.mxu1 %v9315_v2  ;;  %v2066_v2 = vld [vmem:[%s12329_s6 + $0x20] sm:$0xff] }
 0x178   :  { %6708 = vmatprep.mubr.msk.f32.mxu0 %vm823_vm2, %v9342_v53  ;;  %6735 = vmatprep.mubr.msk.f32.mxu1 %vm823_vm2, %v9342_v53  ;;  %v6752_v53 = vld [vmem:[%s12329_s6 + $0xe8] sm:$0xff] }
 0x179   :  { %2206 = vmatpush1.msra.mxu0 %v6754_v60  ;;  %2391 = vmatpush1.msra.mxu1 %v2067_v61 }
 0x17a   :  { %2207 = vmatprep.subr.mxu0 %v12363_v56  ;;  %2392 = vmatprep.subr.mxu1 %v12363_v56 }
 0x17b   :  { %1587 = vmatmul.mubr.f32.gmra.mxu0 %v9345_v55  ;;  %1814 = vmatmul.mubr.f32.gmra.mxu1 %v9345_v55  ;;  %v2065_v55 = vld [vmem:[%s12329_s6 + $0x18] sm:$0xff] }
 0x17c   :  { %6709 = vmatprep.mubr.msk.f32.mxu0 %vm823_vm2, %v9372_v26  ;;  %6736 = vmatprep.mubr.msk.f32.mxu1 %vm823_vm2, %v9372_v26  ;;  %v6751_v26 = vld [vmem:[%s12329_s6 + $0xe0] sm:$0xff] }
 0x17d   :  { %2208 = vmatpush1.msra.mxu0 %v6753_v17  ;;  %2393 = vmatpush1.msra.mxu1 %v2066_v2 }
 0x17e   :  { %2209 = vmatprep.subr.mxu0 %v12363_v56  ;;  %2394 = vmatprep.subr.mxu1 %v12363_v56 }
 0x17f   :  { %1593 = vmatmul.mubr.f32.gmra.mxu0 %v9375_v27  ;;  %1820 = vmatmul.mubr.f32.gmra.mxu1 %v9375_v27  ;;  %v2064_v27 = vld [vmem:[%s12329_s6 + $0x10] sm:$0xff] }
 0x180   :  { %6710 = vmatprep.mubr.msk.f32.mxu0 %vm823_vm2, %v9402_v5  ;;  %6737 = vmatprep.mubr.msk.f32.mxu1 %vm823_vm2, %v9402_v5  ;;  %v6750_v5 = vld [vmem:[%s12329_s6 + $0xd8] sm:$0xff] }
 0x181   :  { %2210 = vmatpush1.msra.mxu0 %v6752_v53  ;;  %2395 = vmatpush1.msra.mxu1 %v2065_v55 }
 0x182   :  { %2211 = vmatprep.subr.mxu0 %v12363_v56  ;;  %2396 = vmatprep.subr.mxu1 %v12363_v56 }
 0x183   :  { %1599 = vmatmul.mubr.f32.gmra.mxu0 %v9405_v4  ;;  %1826 = vmatmul.mubr.f32.gmra.mxu1 %v9405_v4  ;;  %v2063_v4 = vld [vmem:[%s12329_s6 + $0x8] sm:$0xff] }
 0x184   :  { %6711 = vmatprep.mubr.msk.f32.mxu0 %vm823_vm2, %v9430_v37  ;;  %6738 = vmatprep.mubr.msk.f32.mxu1 %vm823_vm2, %v9430_v37  ;;  %v6749_v37 = vld [vmem:[%s12329_s6 + $0xd0] sm:$0xff] }
 0x185   :  { %2212 = vmatpush1.msra.mxu0 %v6751_v26  ;;  %2397 = vmatpush1.msra.mxu1 %v2064_v27 }
 0x186   :  { %2213 = vmatprep.subr.mxu0 %v12363_v56  ;;  %2398 = vmatprep.subr.mxu1 %v12363_v56 }
 0x187   :  { %1605 = vmatmul.mubr.f32.gmra.mxu0 %v9436_v21  ;;  %1832 = vmatmul.mubr.f32.gmra.mxu1 %v9436_v21  ;;  %v2062_v21 = vld [vmem:[%s12329_s6] sm:$0xff] }
 0x188   :  { %6712 = vmatprep.mubr.msk.f32.mxu0 %vm823_vm2, %v9455_v57  ;;  %6739 = vmatprep.mubr.msk.f32.mxu1 %vm823_vm2, %v9455_v57  ;;  %v6774_v57 = vld [vmem:[%s12329_s6 + $0x198] sm:$0xff] }
 0x189   :  { %2214 = vmatpush1.msra.mxu0 %v6750_v5  ;;  %2399 = vmatpush1.msra.mxu1 %v2063_v4 }
 0x18a   :  { %2215 = vmatprep.subr.mxu0 %v12363_v56  ;;  %2400 = vmatprep.subr.mxu1 %v12363_v56 }
 0x18b   :  { %1611 = vmatmul.mubr.f32.gmra.mxu0 %v9462_v33  ;;  %1838 = vmatmul.mubr.f32.gmra.mxu1 %v9462_v33  ;;  %v2087_v33 = vld [vmem:[%s12329_s6 + $0xc8] sm:$0xff] }
 0x18c   :  { %6713 = vmatprep.mubr.msk.f32.mxu0 %vm823_vm2, %v9481_v8  ;;  %6740 = vmatprep.mubr.msk.f32.mxu1 %vm823_vm2, %v9481_v8  ;;  %v6773_v8 = vld [vmem:[%s12329_s6 + $0x190] sm:$0xff] }
 0x18d   :  { %2216 = vmatpush1.msra.mxu0 %v6749_v37  ;;  %2401 = vmatpush1.msra.mxu1 %v2062_v21 }
 0x18e   :  { %2229 = vmatprep.subr.mxu0 %v12363_v56  ;;  %2414 = vmatprep.subr.mxu1 %v12363_v56 }
 0x18f   :  { %1617 = vmatmul.mubr.f32.gmra.mxu0 %v9488_v41  ;;  %1844 = vmatmul.mubr.f32.gmra.mxu1 %v9488_v41  ;;  %v2086_v41 = vld [vmem:[%s12329_s6 + $0xc0] sm:$0xff] }
 0x190   :  { %6714 = vmatprep.mubr.msk.f32.mxu0 %vm823_vm2, %v9507_v23  ;;  %6741 = vmatprep.mubr.msk.f32.mxu1 %vm823_vm2, %v9507_v23  ;;  %v6772_v23 = vld [vmem:[%s12329_s6 + $0x188] sm:$0xff] }
 0x191   :  { %2230 = vmatpush2.msra.mxu0 %v6774_v57  ;;  %2415 = vmatpush2.msra.mxu1 %v2087_v33 }
 0x192   :  { %2231 = vmatprep.subr.mxu0 %v12363_v56  ;;  %2416 = vmatprep.subr.mxu1 %v12363_v56 }
 0x193   :  { %1623 = vmatmul.mubr.f32.gmra.mxu0 %v9514_v1  ;;  %1850 = vmatmul.mubr.f32.gmra.mxu1 %v9514_v1  ;;  %v2085_v1 = vld [vmem:[%s12329_s6 + $0xb8] sm:$0xff] }
 0x194   :  { %6715 = vmatprep.mubr.msk.f32.mxu0 %vm823_vm2, %v12364_v49  ;;  %6742 = vmatprep.mubr.msk.f32.mxu1 %vm823_vm2, %v12364_v49 }
 0x195   :  { %2232 = vmatpush2.msra.mxu0 %v6773_v8  ;;  %2417 = vmatpush2.msra.mxu1 %v2086_v41 }
 0x196   :  { %2233 = vmatprep.subr.mxu0 %v12363_v56  ;;  %2418 = vmatprep.subr.mxu1 %v12363_v56 }
 0x197   :  { %1629 = vmatmul.mubr.f32.gmra.mxu0 %v9539_v0  ;;  %1856 = vmatmul.mubr.f32.gmra.mxu1 %v9539_v0  ;;  %v2084_v0 = vld [vmem:[%s12329_s6 + $0xb0] sm:$0xff] }
 0x198   :  { %6716 = vmatprep.mubr.msk.f32.mxu0 %vm823_vm2, %v12365_v22  ;;  %6743 = vmatprep.mubr.msk.f32.mxu1 %vm823_vm2, %v12365_v22 }
 0x199   :  { %2234 = vmatpush2.msra.mxu0 %v6772_v23  ;;  %2419 = vmatpush2.msra.mxu1 %v2085_v1 }
 0x19a   :  { %2235 = vmatprep.subr.mxu0 %v12363_v56  ;;  %2420 = vmatprep.subr.mxu1 %v12363_v56 }
 0x19b   :  { %1635 = vmatmul.mubr.f32.gmra.mxu0 %v9563_v34  ;;  %1862 = vmatmul.mubr.f32.gmra.mxu1 %v9563_v34  ;;  %v2083_v34 = vld [vmem:[%s12329_s6 + $0xa8] sm:$0xff] }
 0x19c   :  { %6717 = vmatprep.mubr.msk.f32.mxu0 %vm823_vm2, %v9580_v47  ;;  %6744 = vmatprep.mubr.msk.f32.mxu1 %vm823_vm2, %v9580_v47 }
 0x19d   :  { %2236 = vmatpush2.msra.mxu0 %v6771_v44  ;;  %2421 = vmatpush2.msra.mxu1 %v2084_v0 }
 0x19e   :  { %2237 = vmatprep.subr.mxu0 %v12363_v56  ;;  %2422 = vmatprep.subr.mxu1 %v12363_v56 }
 0x19f   :  { %1641 = vmatmul.mubr.f32.gmra.mxu0 %v9587_v18  ;;  %1868 = vmatmul.mubr.f32.gmra.mxu1 %v9587_v18  ;;  %v2082_v18 = vld [vmem:[%s12329_s6 + $0xa0] sm:$0xff] }
 0x1a0   :  { %6718 = vmatprep.mubr.msk.f32.mxu0 %vm823_vm2, %v9604_v14  ;;  %6745 = vmatprep.mubr.msk.f32.mxu1 %vm823_vm2, %v9604_v14 }
 0x1a1   :  { %2238 = vmatpush2.msra.mxu0 %v6770_v50  ;;  %2423 = vmatpush2.msra.mxu1 %v2083_v34 }
 0x1a2   :  { %v1192_v47 = vpop.f32.mrf.mxu1  ;;  %2239 = vmatprep.subr.mxu0 %v12363_v56  ;;  %2424 = vmatprep.subr.mxu1 %v12363_v56 }
 0x1a3   :  { %1647 = vmatmul.mubr.f32.gmra.mxu0 %v9611_v15  ;;  %1874 = vmatmul.mubr.f32.gmra.mxu1 %v9611_v15  ;;  %v6768_v15 = vld [vmem:[%s12329_s6 + $0x168] sm:$0xff] }
 0x1a4   :  { %6719 = vmatprep.mubr.msk.f32.mxu0 %vm823_vm2, %v9630_v36  ;;  %6746 = vmatprep.mubr.msk.f32.mxu1 %vm823_vm2, %v9630_v36  ;;  %v10044_v14 = vpop.f32.mrf.mxu1 }
 0x1a5   :  { %2240 = vmatpush2.msra.mxu0 %v6769_v16  ;;  %2425 = vmatpush2.msra.mxu1 %v2082_v18 }
 0x1a6   :  { %v968_v19 = vpop.f32.mrf.mxu0  ;;  %v1198_v3 = vpop.f32.mrf.mxu1  ;;  %2241 = vmatprep.subr.mxu0 %v12363_v56  ;;  %2426 = vmatprep.subr.mxu1 %v12363_v56 }
 0x1a7   :  { %v10054_v46 = vadd.f32 %v1192_v47, %v968_v19  ;;  %1653 = vmatmul.mubr.f32.gmra.mxu0 %v9637_v30  ;;  %1880 = vmatmul.mubr.f32.gmra.mxu1 %v9637_v30  ;;  %v2080_v30 = vld [vmem:[%s12329_s6 + $0x90] sm:$0xff] }
 0x1a8   :  { %6720 = vmatprep.mubr.msk.f32.mxu0 %vm823_vm2, %v9656_v40  ;;  %6747 = vmatprep.mubr.msk.f32.mxu1 %vm823_vm2, %v9656_v40  ;;  %v10062_v36 = vpop.f32.mrf.mxu0  ;;  %v10064_v54 = vpop.f32.mrf.mxu1  ;;  %v6767_v40 = vld [vmem:[%s12329_s6 + $0x160] sm:$0xff] }
 0x1a9   :  { %2242 = vmatpush2.msra.mxu0 %v6768_v15  ;;  %2427 = vmatpush2.msra.mxu1 %v2081_v45 }
 0x1aa   :  { %v974_v20 = vpop.f32.mrf.mxu0  ;;  %v1204_v62 = vpop.f32.mrf.mxu1  ;;  %2428 = vmatprep.subr.mxu1 %v12363_v56  ;;  %2243 = vmatprep.subr.mxu0 %v12363_v56 }
 0x1ab   :  { %v10074_v63 = vadd.f32 %v1198_v3, %v974_v20  ;;  %1659 = vmatmul.mubr.f32.gmra.mxu0 %v9663_v35  ;;  %1886 = vmatmul.mubr.f32.gmra.mxu1 %v9663_v35  ;;  %v6766_v35 = vld [vmem:[%s12329_s6 + $0x158] sm:$0xff] }
 0x1ac   :  { %6721 = vmatprep.mubr.msk.f32.mxu0 %vm823_vm2, %v9682_v43  ;;  %6748 = vmatprep.mubr.msk.f32.mxu1 %vm823_vm2, %v9682_v43  ;;  %v10082_v10 = vpop.f32.mrf.mxu0  ;;  %v10084_v11 = vpop.f32.mrf.mxu1 }
 0x1ad   :  { %2429 = vmatpush2.msra.mxu1 %v2080_v30  ;;  %2244 = vmatpush2.msra.mxu0 %v6767_v40 }
 0x1ae   :  { %v980_v25 = vpop.f32.mrf.mxu0  ;;  %v1210_v39 = vpop.f32.mrf.mxu1  ;;  %2430 = vmatprep.subr.mxu1 %v12363_v56  ;;  %2245 = vmatprep.subr.mxu0 %v12363_v56 }
 0x1af   :  { %v10094_v43 = vadd.f32 %v1204_v62, %v980_v25  ;;  %1665 = vmatmul.mubr.f32.gmra.mxu0 %v9689_v38  ;;  %1892 = vmatmul.mubr.f32.gmra.mxu1 %v9689_v38 }
 0x1b0   :  { %6722 = vmatprep.mubr.msk.f32.mxu0 %vm823_vm2, %v9711_v48  ;;  %v10103_v58 = vpop.f32.mrf.mxu0  ;;  %v10105_v59 = vpop.f32.mrf.mxu1  ;;  %2431 = vmatpush2.msra.mxu1 %v2079_v24 }
 0x1b1   :  { %2432 = vmatprep.subr.mxu1 %v12363_v56  ;;  %2246 = vmatpush2.msra.mxu0 %v6766_v35 }
 0x1b2   :  { %v986_v38 = vpop.f32.mrf.mxu0  ;;  %v1216_v13 = vpop.f32.mrf.mxu1  ;;  %2433 = vmatpush2.msra.mxu1 %v2078_v9  ;;  %2247 = vmatprep.subr.mxu0 %v12363_v56 }
 0x1b3   :  { %v10112_v28 = vadd.f32 %v1210_v39, %v986_v38  ;;  %1671 = vmatmul.mubr.f32.gmra.mxu0 %v9720_v42  ;;  %2781 = vmatprep.subr.mxu1 %v12363_v56 }
 0x1b4   :  { %v10116_v48 = vpop.f32.mrf.mxu0  ;;  %v10118_v29 = vpop.f32.mrf.mxu1  ;;  %2248 = vmatpush2.msra.mxu0 %v6765_v12 }
 0x1b5   :  { %2602 = vmatprep.subr.mxu0 %v12363_v56 }
 0x1b6   :  { %v992_v51 = vpop.f32.mrf.mxu0  ;;  %v1222_v52 = vpop.f32.mrf.mxu1 }
 0x1b7   :  { %v10121_v6 = vadd.f32 %v1216_v13, %v992_v51 }
 0x1b8   :  { %v10123_v7 = vpop.f32.mrf.mxu0  ;;  %v10125_v31 = vpop.f32.mrf.mxu1 }
 0x1ba   :  { %v998_v32 = vpop.f32.mrf.mxu0  ;;  %v1228_v60 = vpop.f32.mrf.mxu1 }
 0x1bb   :  { %v10127_v42 = vadd.f32 %v1222_v52, %v998_v32 }
 0x1bc   :  { %v10129_v61 = vpop.f32.mrf.mxu0  ;;  %v10131_v17 = vpop.f32.mrf.mxu1 }
 0x1be   :  { %v1004_v2 = vpop.f32.mrf.mxu0  ;;  %v1234_v53 = vpop.f32.mrf.mxu1 }
 0x1bf   :  { %v10133_v55 = vadd.f32 %v1228_v60, %v1004_v2 }
 0x1c0   :  { %v10135_v26 = vpop.f32.mrf.mxu0  ;;  %v10137_v27 = vpop.f32.mrf.mxu1 }
 0x1c2   :  { %v1010_v5 = vpop.f32.mrf.mxu0  ;;  %v1240_v4 = vpop.f32.mrf.mxu1 }
 0x1c3   :  { %v10139_v37 = vadd.f32 %v1234_v53, %v1010_v5 }
 0x1c4   :  { %v10141_v21 = vpop.f32.mrf.mxu0  ;;  %v10143_v57 = vpop.f32.mrf.mxu1 }
 0x1c6   :  { %v1016_v33 = vpop.f32.mrf.mxu0  ;;  %v1246_v8 = vpop.f32.mrf.mxu1 }
 0x1c7   :  { %v10145_v41 = vadd.f32 %v1240_v4, %v1016_v33 }
 0x1c8   :  { %v10147_v49 = vpop.f32.mrf.mxu0  ;;  %v10149_v23 = vpop.f32.mrf.mxu1 }
 0x1ca   :  { %v1022_v1 = vpop.f32.mrf.mxu0  ;;  %v1252_v22 = vpop.f32.mrf.mxu1 }
 0x1cb   :  { %v10151_v44 = vadd.f32 %v1246_v8, %v1022_v1 }
 0x1cc   :  { %v10153_v0 = vpop.f32.mrf.mxu0  ;;  %v10155_v50 = vpop.f32.mrf.mxu1 }
 0x1ce   :  { %v1028_v34 = vpop.f32.mrf.mxu0  ;;  %v1258_v47 = vpop.f32.mrf.mxu1 }
 0x1cf   :  { %v10157_v16 = vadd.f32 %v1252_v22, %v1028_v34 }
 0x1d0   :  { %v10159_v18 = vpop.f32.mrf.mxu0  ;;  %v10161_v19 = vpop.f32.mrf.mxu1 }
 0x1d2   :  { %v1034_v3 = vpop.f32.mrf.mxu0  ;;  %v1264_v15 = vpop.f32.mrf.mxu1 }
 0x1d3   :  { %v10163_v45 = vadd.f32 %v1258_v47, %v1034_v3 }
 0x1d4   :  { %v10165_v20 = vpop.f32.mrf.mxu0  ;;  %v10167_v62 = vpop.f32.mrf.mxu1 }
 0x1d6   :  { %v1040_v30 = vpop.f32.mrf.mxu0  ;;  %v1270_v40 = vpop.f32.mrf.mxu1 }
 0x1d7   :  { %v10169_v24 = vadd.f32 %v1264_v15, %v1040_v30 }
 0x1d8   :  { %v10171_v25 = vpop.f32.mrf.mxu0  ;;  %v10173_v39 = vpop.f32.mrf.mxu1 }
 0x1da   :  { %v1046_v35 = vpop.f32.mrf.mxu0  ;;  %v1276_v9 = vpop.f32.mrf.mxu1 }
 0x1db   :  { %v10175_v12 = vadd.f32 %v1270_v40, %v1046_v35 }
 0x1dc   :  { %v10177_v38 = vpop.f32.mrf.mxu0  ;;  %v10179_v13 = vpop.f32.mrf.mxu1 }
 0x1dd   :  { %12366 = vst [vmem:[#allocation5_spill] sm:$0xff] %v10179_v13 }
 0x1de   :  { %v1282_v51 = vpop.f32.mrf.mxu1 }
 0x1df   :  { %v1052_v52 = vpop.f32.mrf.mxu0 }
 0x1e0   :  { %v10181_v32 = vadd.f32 %v1276_v9, %v1052_v52  ;;  %v10183_v60 = vpop.f32.mrf.mxu1 }
 0x1e1   :  { %12368 = vst [vmem:[#allocation7_spill] sm:$0xff] %v10183_v60  ;;  %v10185_v2 = vpop.f32.mrf.mxu0 }
 0x1e2   :  { %12367 = vst [vmem:[#allocation6_spill] sm:$0xff] %v10181_v32  ;;  %12369 = vst [vmem:[#allocation8_spill] sm:$0xff] %v10185_v2  ;;  %v1288_v53 = vpop.f32.mrf.mxu1  ;;  %v12403_v2 = vld [vmem:[#allocation4_spill] sm:$0xff] }
 0x1e3   :  { %v1058_v5 = vpop.f32.mrf.mxu0 }
 0x1e4   :  { %v10187_v4 = vadd.f32 %v1282_v51, %v1058_v5  ;;  %v10189_v33 = vpop.f32.mrf.mxu1 }
 0x1e5   :  { %12371 = vst [vmem:[#allocation10_spill] sm:$0xff] %v10189_v33  ;;  %v10191_v8 = vpop.f32.mrf.mxu0 }
 0x1e6   :  { %12370 = vst [vmem:[#allocation9_spill] sm:$0xff] %v10187_v4  ;;  %12372 = vst [vmem:[#allocation11_spill] sm:$0xff] %v10191_v8  ;;  %v1294_v1 = vpop.f32.mrf.mxu1 }
 0x1e7   :  { %v1064_v22 = vpop.f32.mrf.mxu0 }
 0x1e8   :  { %v10193_v34 = vadd.f32 %v1288_v53, %v1064_v22  ;;  %v10195_v47 = vpop.f32.mrf.mxu1 }
 0x1e9   :  { %12374 = vst [vmem:[#allocation13_spill] sm:$0xff] %v10195_v47  ;;  %v10197_v3 = vpop.f32.mrf.mxu0 }
 0x1ea   :  { %12373 = vst [vmem:[#allocation12_spill] sm:$0xff] %v10193_v34  ;;  %12375 = vst [vmem:[#allocation14_spill] sm:$0xff] %v10197_v3  ;;  %v1300_v15 = vpop.f32.mrf.mxu1 }
 0x1eb   :  { %v1070_v30 = vpop.f32.mrf.mxu0 }
 0x1ec   :  { %v10199_v40 = vadd.f32 %v1294_v1, %v1070_v30  ;;  %v10201_v35 = vpop.f32.mrf.mxu1 }
 0x1ed   :  { %12377 = vst [vmem:[#allocation16_spill] sm:$0xff] %v10201_v35  ;;  %v10203_v9 = vpop.f32.mrf.mxu0 }
 0x1ee   :  { %12376 = vst [vmem:[#allocation15_spill] sm:$0xff] %v10199_v40  ;;  %12378 = vst [vmem:[#allocation17_spill] sm:$0xff] %v10203_v9  ;;  %v1306_v51 = vpop.f32.mrf.mxu1 }
 0x1ef   :  { %v1076_v52 = vpop.f32.mrf.mxu0 }
 0x1f0   :  { %v10205_v5 = vadd.f32 %v1300_v15, %v1076_v52  ;;  %v10207_v33 = vpop.f32.mrf.mxu1 }
 0x1f1   :  { %12380 = vst [vmem:[#allocation19_spill] sm:$0xff] %v10207_v33  ;;  %v10209_v53 = vpop.f32.mrf.mxu0 }
 0x1f2   :  { %12379 = vst [vmem:[#allocation18_spill] sm:$0xff] %v10205_v5  ;;  %12381 = vst [vmem:[#allocation20_spill] sm:$0xff] %v10209_v53  ;;  %v1312_v22 = vpop.f32.mrf.mxu1 }
 0x1f3   :  { %v1082_v47 = vpop.f32.mrf.mxu0 }
 0x1f4   :  { %v10211_v34 = vadd.f32 %v1306_v51, %v1082_v47  ;;  %v10213_v3 = vpop.f32.mrf.mxu1 }
 0x1f5   :  { %12383 = vst [vmem:[#allocation22_spill] sm:$0xff] %v10213_v3  ;;  %v10215_v1 = vpop.f32.mrf.mxu0 }
 0x1f6   :  { %12382 = vst [vmem:[#allocation21_spill] sm:$0xff] %v10211_v34  ;;  %12384 = vst [vmem:[#allocation23_spill] sm:$0xff] %v10215_v1  ;;  %v1318_v30 = vpop.f32.mrf.mxu1 }
 0x1f7   :  { %v1088_v35 = vpop.f32.mrf.mxu0 }
 0x1f8   :  { %v10217_v40 = vadd.f32 %v1312_v22, %v1088_v35  ;;  %v10219_v9 = vpop.f32.mrf.mxu1 }
 0x1f9   :  { %12386 = vst [vmem:[#allocation25_spill] sm:$0xff] %v10219_v9  ;;  %v10221_v15 = vpop.f32.mrf.mxu0 }
 0x1fa   :  { %12385 = vst [vmem:[#allocation24_spill] sm:$0xff] %v10217_v40  ;;  %12387 = vst [vmem:[#allocation26_spill] sm:$0xff] %v10221_v15  ;;  %v1324_v52 = vpop.f32.mrf.mxu1 }
 0x1fb   :  { %v1094_v33 = vpop.f32.mrf.mxu0 }
 0x1fc   :  { %v10223_v5 = vadd.f32 %v1318_v30, %v1094_v33  ;;  %v10225_v53 = vpop.f32.mrf.mxu1 }
 0x1fd   :  { %12389 = vst [vmem:[#allocation28_spill] sm:$0xff] %v10225_v53  ;;  %v10227_v47 = vpop.f32.mrf.mxu0 }
 0x1fe   :  { %12388 = vst [vmem:[#allocation27_spill] sm:$0xff] %v10223_v5  ;;  %12390 = vst [vmem:[#allocation29_spill] sm:$0xff] %v10227_v47  ;;  %v1330_v51 = vpop.f32.mrf.mxu1 }
 0x1ff   :  { %v1100_v3 = vpop.f32.mrf.mxu0 }
 0x200   :  { %v10229_v34 = vadd.f32 %v1324_v52, %v1100_v3  ;;  %v10231_v1 = vpop.f32.mrf.mxu1 }
 0x201   :  { %12392 = vst [vmem:[#allocation31_spill] sm:$0xff] %v10231_v1  ;;  %v10233_v35 = vpop.f32.mrf.mxu0 }
 0x202   :  { %12391 = vst [vmem:[#allocation30_spill] sm:$0xff] %v10229_v34  ;;  %12393 = vst [vmem:[#allocation32_spill] sm:$0xff] %v10233_v35  ;;  %v1336_v22 = vpop.f32.mrf.mxu1 }
 0x203   :  { %v1106_v9 = vpop.f32.mrf.mxu0 }
 0x204   :  { %v10235_v40 = vadd.f32 %v1330_v51, %v1106_v9  ;;  %v10237_v15 = vpop.f32.mrf.mxu1 }
 0x205   :  { %12395 = vst [vmem:[#allocation34_spill] sm:$0xff] %v10237_v15  ;;  %v10239_v33 = vpop.f32.mrf.mxu0 }
 0x206   :  { %12394 = vst [vmem:[#allocation33_spill] sm:$0xff] %v10235_v40  ;;  %12396 = vst [vmem:[#allocation35_spill] sm:$0xff] %v10239_v33  ;;  %v1342_v30 = vpop.f32.mrf.mxu1 }
 0x207   :  { %v1112_v53 = vpop.f32.mrf.mxu0 }
 0x208   :  { %v10241_v5 = vadd.f32 %v1336_v22, %v1112_v53  ;;  %v10243_v47 = vpop.f32.mrf.mxu1 }
 0x209   :  { %12398 = vst [vmem:[#allocation37_spill] sm:$0xff] %v10243_v47  ;;  %v10245_v3 = vpop.f32.mrf.mxu0  ;;  %v1195_v47 = vadd.f32 %v10044_v14, %v10062_v36 }
 0x20a   :  { %12397 = vst [vmem:[#allocation36_spill] sm:$0xff] %v10241_v5  ;;  %12399 = vst [vmem:[#allocation38_spill] sm:$0xff] %v10245_v3 }
 0x20b   :  { %v1118_v52 = vpop.f32.mrf.mxu0  ;;  %v1743_v1 = vpop.f32.mrf.mxu1 }
 0x20c   :  { %v10247_v34 = vadd.f32 %v1342_v30, %v1118_v52  ;;  %v1201_v30 = vadd.f32 %v10064_v54, %v10082_v10 }
 0x20d   :  { %v10249_v35 = vpop.f32.mrf.mxu0  ;;  %v1745_v9 = vpop.f32.mrf.mxu1 }
 0x20e   :  { %12400 = vst [vmem:[#allocation39_spill] sm:$0xff] %v10247_v34  ;;  %12401 = vst [vmem:[#allocation40_spill] sm:$0xff] %v10249_v35 }
 0x20f   :  { %v1522_v51 = vpop.f32.mrf.mxu0  ;;  %v1749_v40 = vpop.f32.mrf.mxu1 }
 0x210   :  { %v1744_v33 = vadd.f32 %v1743_v1, %v1522_v51  ;;  %v2000_v1 = vld [vmem:[%s12330_s5] sm:$0x3] }
 0x211   :  { %v1524_v15 = vpop.f32.mrf.mxu0  ;;  %v1751_v4 = vpop.f32.mrf.mxu1  ;;  %v10264_v54 = vrot.slane %v2000_v1, %v12403_v2 }
 0x212   :  { %v1746_v53 = vadd.f32 %v1745_v9, %v1524_v15  ;;  %v1898_v52 = vmax.f32 %v10054_v46, %v1744_v33 }
 0x213   :  { %v1528_v60 = vpop.f32.mrf.mxu0  ;;  %v1755_v8 = vpop.f32.mrf.mxu1 }
 0x214   :  { %v1750_v22 = vadd.f32 %v1749_v40, %v1528_v60  ;;  %v12402_v60 = vld [vmem:[#allocation3_spill] sm:$0xff]  ;;  %v1899_v14 = vmax.f32 %v1195_v47, %v1746_v53 }
 0x215   :  { %v1530_v3 = vpop.f32.mrf.mxu0  ;;  %v1757_v5 = vpop.f32.mrf.mxu1  ;;  %v10261_v40 = vrot.slane %v2000_v1, %v12402_v60 }
 0x216   :  { %v1900_v35 = vmax.f32 %v10074_v63, %v1750_v22  ;;  %v1752_v51 = vadd.f32 %v1751_v4, %v1530_v3  ;;  %v1207_v63 = vadd.f32 %v10084_v11, %v10103_v58  ;;  %v2564_v11 = vld [vmem:[%s12331_s7 + $0x78] sm:$0xff] }
 0x217   :  { %v1534_v34 = vpop.f32.mrf.mxu0  ;;  %v1761_v15 = vpop.f32.mrf.mxu1 }
 0x218   :  { %v1950_v36 = vmax.f32 %v1898_v52, %v1900_v35  ;;  %v1901_v9 = vmax.f32 %v1201_v30, %v1752_v51  ;;  %v1756_v13 = vadd.f32 %v1755_v8, %v1534_v34 }
 0x219   :  { %v1536_v46 = vpop.f32.mrf.mxu0  ;;  %v1763_v10 = vpop.f32.mrf.mxu1 }
 0x21a   :  { %v1951_v33 = vmax.f32 %v1899_v14, %v1901_v9  ;;  %v1902_v4 = vmax.f32 %v10094_v43, %v1756_v13  ;;  %v1758_v3 = vadd.f32 %v1757_v5, %v1536_v46  ;;  %v10273_v34 = vadd.f32 %v10264_v54, %v1950_v36 }
 0x21b   :  { %v1540_v22 = vpop.f32.mrf.mxu0  ;;  %v1767_v32 = vpop.f32.mrf.mxu1  ;;  %v1213_v43 = vadd.f32 %v10105_v59, %v10116_v48  ;;  %v1219_v46 = vadd.f32 %v10118_v29, %v10123_v7 }
 0x21c   :  { %v1952_v60 = vmax.f32 %v1900_v35, %v1902_v4  ;;  %v1903_v47 = vmax.f32 %v1207_v63, %v1758_v3  ;;  %v1762_v53 = vadd.f32 %v1761_v15, %v1540_v22  ;;  %v10270_v8 = vadd.f32 %v10261_v40, %v1951_v33 }
 0x21d   :  { %v1542_v30 = vpop.f32.mrf.mxu0  ;;  %v1769_v52 = vpop.f32.mrf.mxu1 }
 0x21e   :  { %v1953_v58 = vmax.f32 %v1901_v9, %v1903_v47  ;;  %v1904_v13 = vmax.f32 %v10112_v28, %v1762_v53  ;;  %v1764_v5 = vadd.f32 %v1763_v10, %v1542_v30  ;;  %6798 = vmatprep.mubr.msk.f32.mxu1 %vm2115_vm3, %v10270_v8  ;;  %v10288_v59 = vadd.f32 %v10264_v54, %v1952_v60  ;;  %v2563_v9 = vld [vmem:[%s12331_s7 + $0x70] sm:$0xff] }
 0x21f   :  { %v1546_v35 = vpop.f32.mrf.mxu0  ;;  %v1773_v1 = vpop.f32.mrf.mxu1  ;;  %2435 = vmatmul.mubr.f32.vlgmr.msra.gmra.mxu1 %v10273_v34  ;;  %v1225_v30 = vadd.f32 %v10125_v31, %v10129_v61  ;;  %v6835_v31 = vld [vmem:[%s12331_s7 + $0x140] sm:$0xff] }
 0x220   :  { %v1954_v51 = vmax.f32 %v1902_v4, %v1904_v13  ;;  %v1905_v15 = vmax.f32 %v1213_v43, %v1764_v5  ;;  %v1768_v14 = vadd.f32 %v1767_v32, %v1546_v35  ;;  %v10285_v36 = vadd.f32 %v10261_v40, %v1953_v58  ;;  %2782 = vmatpush1.msra.mxu1 %v2564_v11  ;;  %v2562_v58 = vld [vmem:[%s12331_s7 + $0x68] sm:$0xff] }
 0x221   :  { %v1548_v48 = vpop.f32.mrf.mxu0  ;;  %v1775_v28 = vpop.f32.mrf.mxu1  ;;  %2783 = vmatprep.subr.mxu1 %v12363_v56 }
 0x222   :  { %v1955_v10 = vmax.f32 %v1903_v47, %v1905_v15  ;;  %v1906_v32 = vmax.f32 %v10121_v6, %v1768_v14  ;;  %v1770_v63 = vadd.f32 %v1769_v52, %v1548_v48  ;;  %6799 = vmatprep.mubr.msk.f32.mxu1 %vm2115_vm3, %v10285_v36  ;;  %2784 = vmatpush1.msra.mxu1 %v2563_v9  ;;  %v6836_v47 = vld [vmem:[%s12331_s7 + $0x148] sm:$0xff] }
 0x223   :  { %v1552_v60 = vpop.f32.mrf.mxu0  ;;  %v1779_v33 = vpop.f32.mrf.mxu1  ;;  %2440 = vmatmul.mubr.f32.gmra.mxu1 %v10288_v59  ;;  %v10304_v29 = vadd.f32 %v10264_v54, %v1954_v51  ;;  %2785 = vmatprep.subr.mxu1 %v12363_v56 }
 0x224   :  { %v1956_v4 = vmax.f32 %v1904_v13, %v1906_v32  ;;  %v1907_v3 = vmax.f32 %v1219_v46, %v1770_v63  ;;  %v1774_v22 = vadd.f32 %v1773_v1, %v1552_v60  ;;  %v10301_v53 = vadd.f32 %v10261_v40, %v1955_v10  ;;  %2786 = vmatpush1.msra.mxu1 %v2562_v58  ;;  %v6834_v10 = vld [vmem:[%s12331_s7 + $0x138] sm:$0xff] }
 0x225   :  { %v1554_v7 = vpop.f32.mrf.mxu0  ;;  %v1781_v6 = vpop.f32.mrf.mxu1  ;;  %v1231_v1 = vadd.f32 %v10131_v17, %v10135_v26  ;;  %v1237_v60 = vadd.f32 %v10137_v27, %v10141_v21  ;;  %2787 = vmatprep.subr.mxu1 %v12363_v56  ;;  %v2561_v27 = vld [vmem:[%s12331_s7 + $0x60] sm:$0xff]  ;;  %v1243_v58 = vadd.f32 %v10143_v57, %v10147_v49 }
 0x226   :  { %v1957_v52 = vmax.f32 %v1905_v15, %v1907_v3  ;;  %v10313_v11 = vmax.f32 %v10127_v42, %v1774_v22  ;;  %v1776_v43 = vadd.f32 %v1775_v28, %v1554_v7  ;;  %6775 = vmatprep.mubr.msk.f32.mxu0 %vm2115_vm3, %v10301_v53  ;;  %6800 = vmatprep.mubr.msk.f32.mxu1 %vm2115_vm3, %v10301_v53 }
 0x227   :  { %v1558_v13 = vpop.f32.mrf.mxu0  ;;  %v1785_v5 = vpop.f32.mrf.mxu1  ;;  %2250 = vmatmul.mubr.f32.vlgmr.msra.gmra.mxu0 %v10304_v29  ;;  %2445 = vmatmul.mubr.f32.gmra.mxu1 %v10304_v29  ;;  %v10335_v48 = vadd.f32 %v10264_v54, %v1956_v4 }
 0x228   :  { %v1958_v42 = vmax.f32 %v1906_v32, %v10313_v11  ;;  %v1909_v61 = vmax.f32 %v1225_v30, %v1776_v43  ;;  %v1780_v35 = vadd.f32 %v1779_v33, %v1558_v13  ;;  %2603 = vmatpush1.msra.mxu0 %v6836_v47  ;;  %v10331_v14 = vadd.f32 %v10261_v40, %v1957_v52  ;;  %v6833_v52 = vld [vmem:[%s12331_s7 + $0x130] sm:$0xff] }
 0x229   :  { %v1560_v51 = vpop.f32.mrf.mxu0  ;;  %v1787_v15 = vpop.f32.mrf.mxu1  ;;  %2604 = vmatprep.subr.mxu0 %v12363_v56  ;;  %2788 = vmatpush1.msra.mxu1 %v2561_v27  ;;  %v6831_v27 = vld [vmem:[%s12331_s7 + $0x120] sm:$0xff] }
 0x22a   :  { %v1959_v28 = vmax.f32 %v1907_v3, %v1909_v61  ;;  %v10338_v9 = vmax.f32 %v10133_v55, %v1780_v35  ;;  %v1782_v46 = vadd.f32 %v1781_v6, %v1560_v51  ;;  %2605 = vmatpush1.msra.mxu0 %v6835_v31  ;;  %6776 = vmatprep.mubr.msk.f32.mxu0 %vm2115_vm3, %v10331_v14  ;;  %v6832_v51 = vld [vmem:[%s12331_s7 + $0x128] sm:$0xff] }
 0x22b   :  { %6801 = vmatprep.mubr.msk.f32.mxu1 %vm2115_vm3, %v10331_v14  ;;  %v1564_v17 = vpop.f32.mrf.mxu0  ;;  %v1791_v26 = vpop.f32.mrf.mxu1  ;;  %2255 = vmatmul.mubr.f32.gmra.mxu0 %v10335_v48  ;;  %v10359_v22 = vadd.f32 %v10264_v54, %v1958_v42 }
 0x22c   :  { %v1960_v32 = vmax.f32 %v10313_v11, %v10338_v9  ;;  %v1911_v63 = vmax.f32 %v1231_v1, %v1782_v46  ;;  %v1786_v55 = vadd.f32 %v1785_v5, %v1564_v17  ;;  %2450 = vmatmul.mubr.f32.gmra.mxu1 %v10335_v48  ;;  %v10354_v3 = vadd.f32 %v10261_v40, %v1959_v28 }
 0x22d   :  { %v1566_v33 = vpop.f32.mrf.mxu0  ;;  %v1793_v4 = vpop.f32.mrf.mxu1  ;;  %2606 = vmatprep.subr.mxu0 %v12363_v56  ;;  %2789 = vmatprep.subr.mxu1 %v12363_v56 }
 0x22e   :  { %v1961_v7 = vmax.f32 %v1909_v61, %v1911_v63  ;;  %v10362_v6 = vmax.f32 %v10139_v37, %v1786_v55  ;;  %v1788_v47 = vadd.f32 %v1787_v15, %v1566_v33  ;;  %2607 = vmatpush1.msra.mxu0 %v6834_v10  ;;  %6777 = vmatprep.mubr.msk.f32.mxu0 %vm2115_vm3, %v10354_v3 }
 0x22f   :  { %6802 = vmatprep.mubr.msk.f32.mxu1 %vm2115_vm3, %v10354_v3  ;;  %v1570_v21 = vpop.f32.mrf.mxu0  ;;  %v1797_v30 = vpop.f32.mrf.mxu1  ;;  %2260 = vmatmul.mubr.f32.gmra.mxu0 %v10359_v22  ;;  %v10385_v42 = vadd.f32 %v10264_v54, %v1960_v32 }
 0x230   :  { %v1962_v37 = vmax.f32 %v10338_v9, %v10362_v6  ;;  %v1913_v11 = vmax.f32 %v1237_v60, %v1788_v47  ;;  %v1792_v43 = vadd.f32 %v1791_v26, %v1570_v21  ;;  %2455 = vmatmul.mubr.f32.gmra.mxu1 %v10359_v22  ;;  %v10381_v31 = vadd.f32 %v10261_v40, %v1961_v7  ;;  %v2559_v21 = vld [vmem:[%s12331_s7 + $0x50] sm:$0xff] }
 0x231   :  { %v1572_v13 = vpop.f32.mrf.mxu0  ;;  %v1799_v5 = vpop.f32.mrf.mxu1  ;;  %2608 = vmatprep.subr.mxu0 %v12363_v56  ;;  %v1249_v9 = vadd.f32 %v10149_v23, %v10153_v0  ;;  %v2560_v23 = vld [vmem:[%s12331_s7 + $0x58] sm:$0xff] }
 0x232   :  { %v1963_v61 = vmax.f32 %v1911_v63, %v1913_v11  ;;  %v10388_v35 = vmax.f32 %v10145_v41, %v1792_v43  ;;  %v1794_v1 = vadd.f32 %v1793_v4, %v1572_v13  ;;  %2609 = vmatpush1.msra.mxu0 %v6833_v52  ;;  %6778 = vmatprep.mubr.msk.f32.mxu0 %vm2115_vm3, %v10381_v31 }
 0x233   :  { %6803 = vmatprep.mubr.msk.f32.mxu1 %vm2115_vm3, %v10381_v31  ;;  %v1576_v57 = vpop.f32.mrf.mxu0  ;;  %v1803_v49 = vpop.f32.mrf.mxu1  ;;  %2265 = vmatmul.mubr.f32.gmra.mxu0 %v10385_v42  ;;  %v10409_v10 = vadd.f32 %v10264_v54, %v1962_v37 }
 0x234   :  { %v1964_v15 = vmax.f32 %v10362_v6, %v10388_v35  ;;  %v1915_v28 = vmax.f32 %v1243_v58, %v1794_v1  ;;  %v1798_v41 = vadd.f32 %v1797_v30, %v1576_v57  ;;  %2460 = vmatmul.mubr.f32.gmra.mxu1 %v10385_v42  ;;  %v10404_v26 = vadd.f32 %v10261_v40, %v1963_v61  ;;  %v6830_v1 = vld [vmem:[%s12331_s7 + $0x118] sm:$0xff] }
 0x235   :  { %v1578_v46 = vpop.f32.mrf.mxu0  ;;  %v1805_v17 = vpop.f32.mrf.mxu1  ;;  %2610 = vmatprep.subr.mxu0 %v12363_v56  ;;  %2790 = vmatpush1.msra.mxu1 %v2560_v23  ;;  %v1255_v30 = vadd.f32 %v10155_v50, %v10159_v18  ;;  %v1261_v57 = vadd.f32 %v10161_v19, %v10165_v20 }
 0x236   :  { %v1965_v32 = vmax.f32 %v1913_v11, %v1915_v28  ;;  %v10412_v63 = vmax.f32 %v10151_v44, %v1798_v41  ;;  %v1800_v55 = vadd.f32 %v1799_v5, %v1578_v46  ;;  %2611 = vmatpush1.msra.mxu0 %v6832_v51  ;;  %6779 = vmatprep.mubr.msk.f32.mxu0 %vm2115_vm3, %v10404_v26 }
 0x237   :  { %6804 = vmatprep.mubr.msk.f32.mxu1 %vm2115_vm3, %v10404_v26  ;;  %v1582_v0 = vpop.f32.mrf.mxu0  ;;  %v1809_v60 = vpop.f32.mrf.mxu1  ;;  %2270 = vmatmul.mubr.f32.gmra.mxu0 %v10409_v10  ;;  %v10442_v43 = vadd.f32 %v10264_v54, %v1964_v15 }
 0x238   :  { %v1966_v33 = vmax.f32 %v10388_v35, %v10412_v63  ;;  %v1917_v4 = vmax.f32 %v1249_v9, %v1800_v55  ;;  %v1804_v44 = vadd.f32 %v1803_v49, %v1582_v0  ;;  %2465 = vmatmul.mubr.f32.gmra.mxu1 %v10409_v10  ;;  %2612 = vmatprep.subr.mxu0 %v12363_v56  ;;  %v2557_v55 = vld [vmem:[%s12331_s7 + $0x40] sm:$0xff] }
 0x239   :  { %v1584_v7 = vpop.f32.mrf.mxu0  ;;  %v1811_v6 = vpop.f32.mrf.mxu1  ;;  %v10427_v47 = vadd.f32 %v10261_v40, %v1965_v32  ;;  %2791 = vmatprep.subr.mxu1 %v12363_v56  ;;  %2613 = vmatpush1.msra.mxu0 %v6831_v27 }
 0x23a   :  { %v1967_v52 = vmax.f32 %v1915_v28, %v1917_v4  ;;  %v10438_v37 = vmax.f32 %v10157_v16, %v1804_v44  ;;  %v1806_v11 = vadd.f32 %v1805_v17, %v1584_v7  ;;  %2792 = vmatpush1.msra.mxu1 %v2559_v21  ;;  %2614 = vmatprep.subr.mxu0 %v12363_v56  ;;  %v2558_v28 = vld [vmem:[%s12331_s7 + $0x48] sm:$0xff]  ;;  %v6829_v17 = vld [vmem:[%s12331_s7 + $0x110] sm:$0xff] }
 0x23b   :  { %6780 = vmatprep.mubr.msk.f32.mxu0 %vm2115_vm3, %v10427_v47  ;;  %6805 = vmatprep.mubr.msk.f32.mxu1 %vm2115_vm3, %v10427_v47  ;;  %v1588_v58 = vpop.f32.mrf.mxu0  ;;  %v1815_v13 = vpop.f32.mrf.mxu1  ;;  %v10468_v41 = vadd.f32 %v10264_v54, %v1966_v33  ;;  %v1267_v33 = vadd.f32 %v10167_v62, %v10171_v25  ;;  %v6828_v62 = vld [vmem:[%s12331_s7 + $0x108] sm:$0xff] }
 0x23c   :  { %v1968_v50 = vmax.f32 %v10412_v63, %v10438_v37  ;;  %v1919_v18 = vmax.f32 %v1255_v30, %v1806_v11  ;;  %v1810_v16 = vadd.f32 %v1809_v60, %v1588_v58  ;;  %2275 = vmatmul.mubr.f32.gmra.mxu0 %v10442_v43  ;;  %2470 = vmatmul.mubr.f32.gmra.mxu1 %v10442_v43 }
 0x23d   :  { %v1590_v5 = vpop.f32.mrf.mxu0  ;;  %v1817_v61 = vpop.f32.mrf.mxu1  ;;  %v10453_v35 = vadd.f32 %v10261_v40, %v1967_v52  ;;  %2793 = vmatprep.subr.mxu1 %v12363_v56  ;;  %2615 = vmatpush1.msra.mxu0 %v6830_v1  ;;  %v1273_v11 = vadd.f32 %v10173_v39, %v10177_v38  ;;  %v2555_v1 = vld [vmem:[%s12331_s7 + $0x30] sm:$0xff] }
 0x23e   :  { %v1969_v49 = vmax.f32 %v1917_v4, %v1919_v18  ;;  %v10461_v51 = vmax.f32 %v10163_v45, %v1810_v16  ;;  %v1812_v15 = vadd.f32 %v1811_v6, %v1590_v5  ;;  %2794 = vmatpush1.msra.mxu1 %v2558_v28  ;;  %2616 = vmatprep.subr.mxu0 %v12363_v56  ;;  %v12404_v28 = vld [vmem:[#allocation6_spill] sm:$0xff] }
 0x23f   :  { %6781 = vmatprep.mubr.msk.f32.mxu0 %vm2115_vm3, %v10453_v35  ;;  %v1594_v19 = vpop.f32.mrf.mxu0  ;;  %v1821_v20 = vpop.f32.mrf.mxu1  ;;  %6806 = vmatprep.mubr.msk.f32.mxu1 %vm2115_vm3, %v10453_v35  ;;  %v10495_v4 = vadd.f32 %v10264_v54, %v1968_v50 }
 0x240   :  { %v1970_v45 = vmax.f32 %v10438_v37, %v10461_v51  ;;  %v1921_v9 = vmax.f32 %v1261_v57, %v1812_v15  ;;  %v1816_v46 = vadd.f32 %v1815_v13, %v1594_v19  ;;  %2280 = vmatmul.mubr.f32.gmra.mxu0 %v10468_v41  ;;  %v10485_v23 = vadd.f32 %v10261_v40, %v1969_v49  ;;  %v2556_v37 = vld [vmem:[%s12331_s7 + $0x38] sm:$0xff] }
 0x241   :  { %v1596_v32 = vpop.f32.mrf.mxu0  ;;  %v1823_v63 = vpop.f32.mrf.mxu1  ;;  %2475 = vmatmul.mubr.f32.gmra.mxu1 %v10468_v41  ;;  %2795 = vmatprep.subr.mxu1 %v12363_v56 }
 0x242   :  { %v1971_v0 = vmax.f32 %v1919_v18, %v1921_v9  ;;  %v10488_v60 = vmax.f32 %v10169_v24, %v1816_v46  ;;  %v1818_v44 = vadd.f32 %v1817_v61, %v1596_v32  ;;  %2617 = vmatpush1.msra.mxu0 %v6829_v17  ;;  %2796 = vmatpush1.msra.mxu1 %v2557_v55  ;;  %v6827_v61 = vld [vmem:[%s12331_s7 + $0x100] sm:$0xff] }
 0x243   :  { %v1600_v7 = vpop.f32.mrf.mxu0  ;;  %v1827_v6 = vpop.f32.mrf.mxu1  ;;  %6782 = vmatprep.mubr.msk.f32.mxu0 %vm2115_vm3, %v10485_v23  ;;  %6807 = vmatprep.mubr.msk.f32.mxu1 %vm2115_vm3, %v10485_v23  ;;  %v10522_v50 = vadd.f32 %v10264_v54, %v1970_v45  ;;  %v12406_v45 = vld [vmem:[#allocation5_spill] sm:$0xff] }
 0x244   :  { %v1972_v24 = vmax.f32 %v10461_v51, %v10488_v60  ;;  %v1822_v27 = vadd.f32 %v1821_v20, %v1600_v7  ;;  %v10506_v25 = vadd.f32 %v10261_v40, %v1971_v0  ;;  %v1923_v21 = vmax.f32 %v1267_v33, %v1818_v44  ;;  %2285 = vmatmul.mubr.f32.gmra.mxu0 %v10495_v4  ;;  %v12405_v20 = vld [vmem:[#allocation8_spill] sm:$0xff]  ;;  %v2554_v7 = vld [vmem:[%s12331_s7 + $0x28] sm:$0xff] }
 0x245   :  { %v1602_v30 = vpop.f32.mrf.mxu0  ;;  %v1829_v52 = vpop.f32.mrf.mxu1  ;;  %2480 = vmatmul.mubr.f32.gmra.mxu1 %v10495_v4  ;;  %2618 = vmatprep.subr.mxu0 %v12363_v56 }
 0x246   :  { %v10517_v58 = vmax.f32 %v10175_v12, %v1822_v27  ;;  %v1824_v13 = vadd.f32 %v1823_v63, %v1602_v30  ;;  %v1973_v18 = vmax.f32 %v1921_v9, %v1923_v21  ;;  %2797 = vmatprep.subr.mxu1 %v12363_v56  ;;  %2619 = vmatpush1.msra.mxu0 %v6828_v62  ;;  %v12407_v27 = vld [vmem:[#allocation11_spill] sm:$0xff]  ;;  %v12409_v30 = vld [vmem:[#allocation9_spill] sm:$0xff] }
 0x247   :  { %v1606_v16 = vpop.f32.mrf.mxu0  ;;  %v1833_v5 = vpop.f32.mrf.mxu1  ;;  %2798 = vmatpush1.msra.mxu1 %v2556_v37  ;;  %6783 = vmatprep.mubr.msk.f32.mxu0 %vm2115_vm3, %v10506_v25  ;;  %v1279_v9 = vadd.f32 %v12406_v45, %v12405_v20  ;;  %v10549_v46 = vadd.f32 %v10264_v54, %v1972_v24  ;;  %v12408_v62 = vld [vmem:[#allocation7_spill] sm:$0xff]  ;;  %v12412_v20 = vld [vmem:[#allocation10_spill] sm:$0xff] }
 0x248   :  { %v1974_v39 = vmax.f32 %v10488_v60, %v10517_v58  ;;  %v1925_v38 = vmax.f32 %v1273_v11, %v1824_v13  ;;  %v1828_v12 = vadd.f32 %v1827_v6, %v1606_v16  ;;  %6808 = vmatprep.mubr.msk.f32.mxu1 %vm2115_vm3, %v10506_v25  ;;  %2290 = vmatmul.mubr.f32.gmra.mxu0 %v10522_v50  ;;  %v6826_v60 = vld [vmem:[%s12331_s7 + $0xf8] sm:$0xff] }
 0x249   :  { %v1608_v57 = vpop.f32.mrf.mxu0  ;;  %v1835_v49 = vpop.f32.mrf.mxu1  ;;  %v10539_v51 = vadd.f32 %v10261_v40, %v1973_v18  ;;  %2485 = vmatmul.mubr.f32.gmra.mxu1 %v10522_v50  ;;  %2620 = vmatprep.subr.mxu0 %v12363_v56 }
 0x24a   :  { %v1975_v15 = vmax.f32 %v1923_v21, %v1925_v38  ;;  %v10542_v19 = vmax.f32 %v12404_v28, %v1828_v12  ;;  %2799 = vmatprep.subr.mxu1 %v12363_v56  ;;  %2621 = vmatpush1.msra.mxu0 %v6827_v61  ;;  %v1830_v17 = vadd.f32 %v1829_v52, %v1608_v57 }
 0x24b   :  { %v1612_v32 = vpop.f32.mrf.mxu0  ;;  %v1839_v63 = vpop.f32.mrf.mxu1  ;;  %2800 = vmatpush1.msra.mxu1 %v2555_v1  ;;  %6784 = vmatprep.mubr.msk.f32.mxu0 %vm2115_vm3, %v10539_v51  ;;  %v1285_v21 = vadd.f32 %v12408_v62, %v12407_v27  ;;  %v10576_v11 = vadd.f32 %v10264_v54, %v1974_v39  ;;  %v6825_v39 = vld [vmem:[%s12331_s7 + $0xf0] sm:$0xff]  ;;  %v12413_v62 = vld [vmem:[#allocation17_spill] sm:$0xff] }
 0x24c   :  { %v1976_v55 = vmax.f32 %v10517_v58, %v10542_v19  ;;  %v1834_v0 = vadd.f32 %v1833_v5, %v1612_v32  ;;  %v10560_v33 = vadd.f32 %v10261_v40, %v1975_v15  ;;  %v1927_v44 = vmax.f32 %v1279_v9, %v1830_v17  ;;  %6809 = vmatprep.mubr.msk.f32.mxu1 %vm2115_vm3, %v10539_v51  ;;  %v12410_v15 = vld [vmem:[#allocation12_spill] sm:$0xff] }
 0x24d   :  { %2295 = vmatmul.mubr.f32.gmra.mxu0 %v10549_v46  ;;  %v1614_v6 = vpop.f32.mrf.mxu0  ;;  %v1841_v24 = vpop.f32.mrf.mxu1  ;;  %2490 = vmatmul.mubr.f32.gmra.mxu1 %v10549_v46 }
 0x24e   :  { %v10571_v52 = vmax.f32 %v12409_v30, %v1834_v0  ;;  %2622 = vmatprep.subr.mxu0 %v12363_v56  ;;  %v1836_v37 = vadd.f32 %v1835_v49, %v1614_v6  ;;  %v1977_v58 = vmax.f32 %v1925_v38, %v1927_v44  ;;  %2801 = vmatprep.subr.mxu1 %v12363_v56  ;;  %v2553_v38 = vld [vmem:[%s12331_s7 + $0x20] sm:$0xff] }
 0x24f   :  { %2623 = vmatpush1.msra.mxu0 %v6826_v60  ;;  %v1618_v13 = vpop.f32.mrf.mxu0  ;;  %v1845_v18 = vpop.f32.mrf.mxu1  ;;  %2802 = vmatpush1.msra.mxu1 %v2554_v7 }
 0x250   :  { %v1978_v16 = vmax.f32 %v10542_v19, %v10571_v52  ;;  %v1929_v5 = vmax.f32 %v1285_v21, %v1836_v37  ;;  %6785 = vmatprep.mubr.msk.f32.mxu0 %vm2115_vm3, %v10560_v33  ;;  %v1840_v12 = vadd.f32 %v1839_v63, %v1618_v13  ;;  %6810 = vmatprep.mubr.msk.f32.mxu1 %vm2115_vm3, %v10560_v33  ;;  %v12411_v19 = vld [vmem:[#allocation14_spill] sm:$0xff]  ;;  %v12414_v21 = vld [vmem:[#allocation13_spill] sm:$0xff] }
 0x251   :  { %2624 = vmatprep.subr.mxu0 %v12363_v56  ;;  %v1620_v61 = vpop.f32.mrf.mxu0  ;;  %v1847_v1 = vpop.f32.mrf.mxu1  ;;  %v10593_v57 = vadd.f32 %v10261_v40, %v1977_v58  ;;  %2803 = vmatprep.subr.mxu1 %v12363_v56  ;;  %v1291_v45 = vadd.f32 %v12412_v20, %v12411_v19  ;;  %v10604_v63 = vadd.f32 %v10264_v54, %v1976_v55  ;;  %v2552_v55 = vld [vmem:[%s12331_s7 + $0x18] sm:$0xff] }
 0x252   :  { %v1979_v49 = vmax.f32 %v1927_v44, %v1929_v5  ;;  %v10597_v28 = vmax.f32 %v12410_v15, %v1840_v12  ;;  %2300 = vmatmul.mubr.f32.gmra.mxu0 %v10576_v11  ;;  %2495 = vmatmul.mubr.f32.gmra.mxu1 %v10576_v11  ;;  %v1842_v9 = vadd.f32 %v1841_v24, %v1620_v61  ;;  %v6824_v44 = vld [vmem:[%s12331_s7 + $0xe8] sm:$0xff] }
 0x253   :  { %2625 = vmatpush1.msra.mxu0 %v6825_v39  ;;  %v1624_v17 = vpop.f32.mrf.mxu0  ;;  %v1851_v32 = vpop.f32.mrf.mxu1  ;;  %2804 = vmatpush1.msra.mxu1 %v2553_v38  ;;  %v1297_v30 = vadd.f32 %v12414_v21, %v12413_v62  ;;  %v2550_v62 = vld [vmem:[%s12331_s7 + $0x8] sm:$0xff] }
 0x254   :  { %v1980_v0 = vmax.f32 %v10571_v52, %v10597_v28  ;;  %6786 = vmatprep.mubr.msk.f32.mxu0 %vm2115_vm3, %v10593_v57  ;;  %v1846_v60 = vadd.f32 %v1845_v18, %v1624_v17  ;;  %v1931_v7 = vmax.f32 %v1291_v45, %v1842_v9  ;;  %6811 = vmatprep.mubr.msk.f32.mxu1 %vm2115_vm3, %v10593_v57  ;;  %v12415_v52 = vld [vmem:[#allocation15_spill] sm:$0xff]  ;;  %v6823_v18 = vld [vmem:[%s12331_s7 + $0xe0] sm:$0xff]  ;;  %v12418_v17 = vld [vmem:[#allocation16_spill] sm:$0xff] }
 0x255   :  { %2626 = vmatprep.subr.mxu0 %v12363_v56  ;;  %v1626_v6 = vpop.f32.mrf.mxu0  ;;  %v1853_v24 = vpop.f32.mrf.mxu1  ;;  %v10620_v27 = vadd.f32 %v10261_v40, %v1979_v49  ;;  %2805 = vmatprep.subr.mxu1 %v12363_v56  ;;  %v10640_v49 = vadd.f32 %v10264_v54, %v1978_v16  ;;  %v12416_v45 = vld [vmem:[#allocation18_spill] sm:$0xff]  ;;  %v12417_v16 = vld [vmem:[#allocation20_spill] sm:$0xff] }
 0x256   :  { %v10626_v37 = vmax.f32 %v12415_v52, %v1846_v60  ;;  %2305 = vmatmul.mubr.f32.gmra.mxu0 %v10604_v63  ;;  %v1848_v58 = vadd.f32 %v1847_v1, %v1626_v6  ;;  %v1981_v13 = vmax.f32 %v1929_v5, %v1931_v7  ;;  %2500 = vmatmul.mubr.f32.gmra.mxu1 %v10604_v63  ;;  %v2551_v5 = vld [vmem:[%s12331_s7 + $0x10] sm:$0xff] }
 0x257   :  { %2627 = vmatpush1.msra.mxu0 %v6824_v44  ;;  %v1630_v12 = vpop.f32.mrf.mxu0  ;;  %v1857_v39 = vpop.f32.mrf.mxu1  ;;  %2806 = vmatpush1.msra.mxu1 %v2552_v55  ;;  %v6822_v44 = vld [vmem:[%s12331_s7 + $0xd8] sm:$0xff] }
 0x258   :  { %v1982_v38 = vmax.f32 %v10597_v28, %v10626_v37  ;;  %v1933_v61 = vmax.f32 %v1297_v30, %v1848_v58  ;;  %2628 = vmatprep.subr.mxu0 %v12363_v56  ;;  %v1852_v1 = vadd.f32 %v1851_v32, %v1630_v12  ;;  %v10643_v15 = vadd.f32 %v10261_v40, %v1981_v13  ;;  %v12419_v13 = vld [vmem:[#allocation23_spill] sm:$0xff] }
 0x259   :  { %2807 = vmatprep.subr.mxu1 %v12363_v56  ;;  %6787 = vmatprep.mubr.msk.f32.mxu0 %vm2115_vm3, %v10620_v27  ;;  %v1632_v28 = vpop.f32.mrf.mxu0  ;;  %v1859_v19 = vpop.f32.mrf.mxu1  ;;  %v1303_v32 = vadd.f32 %v12418_v17, %v12417_v16 }
 0x25a   :  { %v1983_v20 = vmax.f32 %v1931_v7, %v1933_v61  ;;  %6812 = vmatprep.mubr.msk.f32.mxu1 %vm2115_vm3, %v10620_v27  ;;  %2629 = vmatpush1.msra.mxu0 %v6823_v18  ;;  %v10651_v9 = vmax.f32 %v12416_v45, %v1852_v1  ;;  %v1854_v60 = vadd.f32 %v1853_v24, %v1632_v28  ;;  %v12420_v18 = vld [vmem:[#allocation19_spill] sm:$0xff]  ;;  %v6821_v28 = vld [vmem:[%s12331_s7 + $0xd0] sm:$0xff] }
 0x25b   :  { %2808 = vmatpush1.msra.mxu1 %v2551_v5  ;;  %2310 = vmatmul.mubr.f32.gmra.mxu0 %v10640_v49  ;;  %v1636_v55 = vpop.f32.mrf.mxu0  ;;  %v1863_v7 = vpop.f32.mrf.mxu1  ;;  %v10667_v24 = vadd.f32 %v10264_v54, %v1980_v0  ;;  %v1309_v12 = vadd.f32 %v12420_v18, %v12419_v13  ;;  %v12421_v0 = vld [vmem:[#allocation21_spill] sm:$0xff] }
 0x25c   :  { %v1984_v6 = vmax.f32 %v10626_v37, %v10651_v9  ;;  %2505 = vmatmul.mubr.f32.gmra.mxu1 %v10640_v49  ;;  %2630 = vmatprep.subr.mxu0 %v12363_v56  ;;  %v1858_v21 = vadd.f32 %v1857_v39, %v1636_v55  ;;  %v1935_v30 = vmax.f32 %v1303_v32, %v1854_v60 }
 0x25d   :  { %2809 = vmatprep.subr.mxu1 %v12363_v56  ;;  %6788 = vmatprep.mubr.msk.f32.mxu0 %vm2115_vm3, %v10643_v15  ;;  %v1638_v52 = vpop.f32.mrf.mxu0  ;;  %v1865_v37 = vpop.f32.mrf.mxu1  ;;  %v10673_v58 = vadd.f32 %v10261_v40, %v1983_v20  ;;  %v10694_v32 = vadd.f32 %v10264_v54, %v1982_v38  ;;  %v6846_v38 = vld [vmem:[%s12331_s7 + $0x198] sm:$0xff] }
 0x25e   :  { %6813 = vmatprep.mubr.msk.f32.mxu1 %vm2115_vm3, %v10643_v15  ;;  %2631 = vmatpush1.msra.mxu0 %v6822_v44  ;;  %v10680_v39 = vmax.f32 %v12421_v0, %v1858_v21  ;;  %v1860_v5 = vadd.f32 %v1859_v19, %v1638_v52  ;;  %v1985_v1 = vmax.f32 %v1933_v61, %v1935_v30  ;;  %v2549_v61 = vld [vmem:[%s12331_s7] sm:$0xff] }
 0x25f   :  { %2810 = vmatpush1.msra.mxu1 %v2550_v62  ;;  %2315 = vmatmul.mubr.f32.gmra.mxu0 %v10667_v24  ;;  %v1642_v20 = vpop.f32.mrf.mxu0  ;;  %v1869_v45 = vpop.f32.mrf.mxu1  ;;  %v12422_v62 = vld [vmem:[#allocation24_spill] sm:$0xff]  ;;  %v12423_v21 = vld [vmem:[#allocation26_spill] sm:$0xff] }
 0x260   :  { %v1986_v16 = vmax.f32 %v10651_v9, %v10680_v39  ;;  %2510 = vmatmul.mubr.f32.gmra.mxu1 %v10667_v24  ;;  %v1937_v17 = vmax.f32 %v1309_v12, %v1860_v5  ;;  %2632 = vmatprep.subr.mxu0 %v12363_v56  ;;  %v1864_v19 = vadd.f32 %v1863_v7, %v1642_v20  ;;  %v12424_v52 = vld [vmem:[#allocation22_spill] sm:$0xff]  ;;  %v12426_v20 = vld [vmem:[#allocation25_spill] sm:$0xff] }
 0x261   :  { %2811 = vmatprep.subr.mxu1 %v12363_v56  ;;  %6789 = vmatprep.mubr.msk.f32.mxu0 %vm2115_vm3, %v10673_v58  ;;  %v1644_v60 = vpop.f32.mrf.mxu0  ;;  %v1871_v9 = vpop.f32.mrf.mxu1  ;;  %v10700_v44 = vadd.f32 %v10261_v40, %v1985_v1  ;;  %v1315_v13 = vadd.f32 %v12424_v52, %v12423_v21  ;;  %v6845_v52 = vld [vmem:[%s12331_s7 + $0x190] sm:$0xff] }
 0x262   :  { %v1987_v55 = vmax.f32 %v1935_v30, %v1937_v17  ;;  %6814 = vmatprep.mubr.msk.f32.mxu1 %vm2115_vm3, %v10673_v58  ;;  %2633 = vmatpush1.msra.mxu0 %v6821_v28  ;;  %v10705_v7 = vmax.f32 %v12422_v62, %v1864_v19  ;;  %v1866_v18 = vadd.f32 %v1865_v37, %v1644_v60  ;;  %v2574_v30 = vld [vmem:[%s12331_s7 + $0xc8] sm:$0xff]  ;;  %v12425_v28 = vld [vmem:[#allocation29_spill] sm:$0xff] }
 0x263   :  { %2812 = vmatpush1.msra.mxu1 %v2549_v61  ;;  %2320 = vmatmul.mubr.f32.gmra.mxu0 %v10694_v32  ;;  %v1648_v12 = vpop.f32.mrf.mxu0  ;;  %v1875_v0 = vpop.f32.mrf.mxu1  ;;  %v1321_v61 = vadd.f32 %v12426_v20, %v12425_v28  ;;  %v10723_v19 = vadd.f32 %v10264_v54, %v1984_v6 }
 0x264   :  { %v1988_v5 = vmax.f32 %v10680_v39, %v10705_v7  ;;  %2515 = vmatmul.mubr.f32.gmra.mxu1 %v10694_v32  ;;  %2646 = vmatprep.subr.mxu0 %v12363_v56  ;;  %v1870_v1 = vadd.f32 %v1869_v45, %v1648_v12  ;;  %v1939_v37 = vmax.f32 %v1315_v13, %v1866_v18  ;;  %v12427_v39 = vld [vmem:[#allocation27_spill] sm:$0xff] }
 0x265   :  { %2825 = vmatprep.subr.mxu1 %v12363_v56  ;;  %2647 = vmatpush2.msra.mxu0 %v6846_v38  ;;  %v1650_v60 = vpop.f32.mrf.mxu0  ;;  %v1877_v62 = vpop.f32.mrf.mxu1  ;;  %v10735_v6 = vadd.f32 %v10261_v40, %v1987_v55  ;;  %v2573_v38 = vld [vmem:[%s12331_s7 + $0xc0] sm:$0xff] }
 0x266   :  { %2826 = vmatpush2.msra.mxu1 %v2574_v30  ;;  %6790 = vmatprep.mubr.msk.f32.mxu0 %vm2115_vm3, %v10700_v44  ;;  %v10729_v21 = vmax.f32 %v12427_v39, %v1870_v1  ;;  %v1872_v45 = vadd.f32 %v1871_v9, %v1650_v60  ;;  %v1989_v12 = vmax.f32 %v1937_v17, %v1939_v37 }
 0x267   :  { %12428 = vst [vmem:[#allocation6_spill] sm:$0xff] %v10735_v6  ;;  %6815 = vmatprep.mubr.msk.f32.mxu1 %vm2115_vm3, %v10700_v44  ;;  %2325 = vmatmul.mubr.f32.gmra.mxu0 %v10723_v19  ;;  %v1654_v13 = vpop.f32.mrf.mxu0  ;;  %v1881_v18 = vpop.f32.mrf.mxu1  ;;  %v10748_v30 = vadd.f32 %v10264_v54, %v1986_v16  ;;  %v6844_v16 = vld [vmem:[%s12331_s7 + $0x188] sm:$0xff]  ;;  %v10777_v2 = vadd.f32 %v10264_v54, %v1988_v5 }
 0x268   :  { %v1990_v9 = vmax.f32 %v10705_v7, %v10729_v21  ;;  %2520 = vmatmul.mubr.f32.gmra.mxu1 %v10723_v19  ;;  %2648 = vmatprep.subr.mxu0 %v12363_v56  ;;  %v1941_v55 = vmax.f32 %v1321_v61, %v1872_v45  ;;  %v1876_v17 = vadd.f32 %v1875_v0, %v1654_v13  ;;  %v12430_v7 = vld [vmem:[#allocation30_spill] sm:$0xff]  ;;  %v12431_v0 = vld [vmem:[#allocation32_spill] sm:$0xff] }
 0x269   :  { %12429 = vst [vmem:[#allocation8_spill] sm:$0xff] %v10748_v30  ;;  %2827 = vmatprep.subr.mxu1 %v12363_v56  ;;  %2649 = vmatpush2.msra.mxu0 %v6845_v52  ;;  %v1656_v1 = vpop.f32.mrf.mxu0  ;;  %v1883_v28 = vpop.f32.mrf.mxu1  ;;  %v10752_v20 = vadd.f32 %v10261_v40, %v1989_v12  ;;  %v12432_v61 = vld [vmem:[#allocation28_spill] sm:$0xff] }
 0x26a   :  { %v1991_v60 = vmax.f32 %v1939_v37, %v1941_v55  ;;  %2828 = vmatpush2.msra.mxu1 %v2573_v38  ;;  %6791 = vmatprep.mubr.msk.f32.mxu0 %vm2115_vm3, %v10735_v6  ;;  %v10757_v39 = vmax.f32 %v12430_v7, %v1876_v17  ;;  %v1327_v45 = vadd.f32 %v12432_v61, %v12431_v0  ;;  %v2572_v37 = vld [vmem:[%s12331_s7 + $0xb8] sm:$0xff]  ;;  %v12433_v7 = vld [vmem:[#allocation35_spill] sm:$0xff] }
 0x26b   :  { %6816 = vmatprep.mubr.msk.f32.mxu1 %vm2115_vm3, %v10735_v6  ;;  %2330 = vmatmul.mubr.f32.gmra.mxu0 %v10748_v30  ;;  %v1878_v52 = vadd.f32 %v1877_v62, %v1656_v1  ;;  %v1660_v12 = vpop.f32.mrf.mxu0  ;;  %v1887_v38 = vpop.f32.mrf.mxu1  ;;  %v12434_v0 = vld [vmem:[#allocation31_spill] sm:$0xff] }
 0x26c   :  { %v1992_v13 = vmax.f32 %v10729_v21, %v10757_v39  ;;  %2525 = vmatmul.mubr.f32.gmra.mxu1 %v10748_v30  ;;  %2650 = vmatprep.subr.mxu0 %v12363_v56  ;;  %v1882_v17 = vadd.f32 %v1881_v18, %v1660_v12  ;;  %v1333_v61 = vadd.f32 %v12434_v0, %v12433_v7  ;;  %v12435_v21 = vld [vmem:[#allocation33_spill] sm:$0xff]  ;;  %v6843_v18 = vld [vmem:[%s12331_s7 + $0x180] sm:$0xff] }
 0x26d   :  { %2829 = vmatprep.subr.mxu1 %v12363_v56  ;;  %2651 = vmatpush2.msra.mxu0 %v6844_v16  ;;  %v1943_v62 = vmax.f32 %v1327_v45, %v1878_v52  ;;  %v1662_v1 = vpop.f32.mrf.mxu0  ;;  %v1889_v6 = vpop.f32.mrf.mxu1  ;;  %v10789_v5 = vadd.f32 %v10261_v40, %v1991_v60  ;;  %v2571_v16 = vld [vmem:[%s12331_s7 + $0xb0] sm:$0xff] }
 0x26e   :  { %2830 = vmatpush2.msra.mxu1 %v2572_v37  ;;  %6792 = vmatprep.mubr.msk.f32.mxu0 %vm2115_vm3, %v10752_v20  ;;  %v10783_v30 = vmax.f32 %v12435_v21, %v1882_v17  ;;  %v1884_v12 = vadd.f32 %v1883_v28, %v1662_v1  ;;  %v10803_v17 = vadd.f32 %v10264_v54, %v1990_v9  ;;  %v12439_v21 = vld [vmem:[#allocation34_spill] sm:$0xff]  ;;  %v2570_v9 = vld [vmem:[%s12331_s7 + $0xa8] sm:$0xff] }
 0x26f   :  { %12436 = vst [vmem:[#allocation5_spill] sm:$0xff] %v10789_v5  ;;  %v1993_v7 = vmax.f32 %v1941_v55, %v1943_v62  ;;  %6817 = vmatprep.mubr.msk.f32.mxu1 %vm2115_vm3, %v10752_v20  ;;  %2335 = vmatmul.mubr.f32.gmra.mxu0 %v10777_v2  ;;  %v1666_v45 = vpop.f32.mrf.mxu0  ;;  %v1893_v55 = vpop.f32.mrf.mxu1 }
 0x270   :  { %v1994_v37 = vmax.f32 %v10757_v39, %v10783_v30  ;;  %2530 = vmatmul.mubr.f32.gmra.mxu1 %v10777_v2  ;;  %2652 = vmatprep.subr.mxu0 %v12363_v56  ;;  %v1945_v28 = vmax.f32 %v1333_v61, %v1884_v12  ;;  %v1888_v60 = vadd.f32 %v1887_v38, %v1666_v45  ;;  %v12437_v39 = vld [vmem:[#allocation36_spill] sm:$0xff]  ;;  %v6842_v38 = vld [vmem:[%s12331_s7 + $0x178] sm:$0xff]  ;;  %v12438_v61 = vld [vmem:[#allocation38_spill] sm:$0xff] }
 0x271   :  { %2831 = vmatprep.subr.mxu1 %v12363_v56  ;;  %2653 = vmatpush2.msra.mxu0 %v6843_v18  ;;  %v1668_v52 = vpop.f32.mrf.mxu0  ;;  %v10806_v0 = vadd.f32 %v10261_v40, %v1993_v7  ;;  %v1339_v18 = vadd.f32 %v12439_v21, %v12438_v61  ;;  %v2569_v61 = vld [vmem:[%s12331_s7 + $0xa0] sm:$0xff] }
 0x272   :  { %2832 = vmatpush2.msra.mxu1 %v2571_v16  ;;  %6793 = vmatprep.mubr.msk.f32.mxu0 %vm2115_vm3, %v10789_v5  ;;  %v1946_v1 = vmax.f32 %v12437_v39, %v1888_v60  ;;  %v1890_v12 = vadd.f32 %v1889_v6, %v1668_v52  ;;  %v1995_v16 = vmax.f32 %v1943_v62, %v1945_v28  ;;  %v1895_v39 = vpop.f32.mrf.mxu1  ;;  %v12440_v62 = vld [vmem:[#allocation39_spill] sm:$0xff] }
 0x273   :  { %6818 = vmatprep.mubr.msk.f32.mxu1 %vm2115_vm3, %v10789_v5  ;;  %2654 = vmatprep.subr.mxu0 %v12363_v56  ;;  %v1672_v7 = vpop.f32.mrf.mxu0  ;;  %v10833_v5 = vadd.f32 %v10264_v54, %v1992_v13  ;;  %v2568_v13 = vld [vmem:[%s12331_s7 + $0x98] sm:$0xff] }
 0x274   :  { %2833 = vmatprep.subr.mxu1 %v12363_v56  ;;  %v1996_v45 = vmax.f32 %v10783_v30, %v1946_v1  ;;  %2340 = vmatmul.mubr.f32.gmra.mxu0 %v10803_v17  ;;  %v1894_v60 = vadd.f32 %v1893_v55, %v1672_v7  ;;  %v1947_v6 = vmax.f32 %v1339_v18, %v1890_v12  ;;  %v6841_v55 = vld [vmem:[%s12331_s7 + $0x170] sm:$0xff]  ;;  %v12442_v18 = vld [vmem:[#allocation37_spill] sm:$0xff] }
 0x275   :  { %2535 = vmatmul.mubr.f32.gmra.mxu1 %v10803_v17  ;;  %2655 = vmatpush2.msra.mxu0 %v6842_v38  ;;  %v1674_v21 = vpop.f32.mrf.mxu0  ;;  %v12441_v38 = vld [vmem:[#allocation40_spill] sm:$0xff]  ;;  %v10848_v7 = vadd.f32 %v10261_v40, %v1995_v16 }
 0x276   :  { %2834 = vmatpush2.msra.mxu1 %v2570_v9  ;;  %6794 = vmatprep.mubr.msk.f32.mxu0 %vm2115_vm3, %v10806_v0  ;;  %v1948_v52 = vmax.f32 %v12440_v62, %v1894_v60  ;;  %v1896_v30 = vadd.f32 %v1895_v39, %v1674_v21  ;;  %v1345_v9 = vadd.f32 %v12442_v18, %v12441_v38  ;;  %v2567_v16 = vld [vmem:[%s12331_s7 + $0x90] sm:$0xff] }
 0x277   :  { %2835 = vmatprep.subr.mxu1 %v12363_v56  ;;  %6819 = vmatprep.mubr.msk.f32.mxu1 %vm2115_vm3, %v10806_v0  ;;  %v1997_v60 = vmax.f32 %v1945_v28, %v1947_v6  ;;  %v2566_v28 = vld [vmem:[%s12331_s7 + $0x88] sm:$0xff] }
 0x278   :  { %2656 = vmatprep.subr.mxu0 %v12363_v56  ;;  %2836 = vmatpush2.msra.mxu1 %v2569_v61  ;;  %v1998_v12 = vmax.f32 %v1946_v1, %v1948_v52  ;;  %v1949_v39 = vmax.f32 %v1345_v9, %v1896_v30  ;;  %v6840_v1 = vld [vmem:[%s12331_s7 + $0x168] sm:$0xff]  ;;  %v10861_v61 = vadd.f32 %v10264_v54, %v1994_v37  ;;  %v6839_v37 = vld [vmem:[%s12331_s7 + $0x160] sm:$0xff]  ;;  %v6838_v30 = vld [vmem:[%s12331_s7 + $0x158] sm:$0xff] }
 0x279   :  { %2345 = vmatmul.mubr.f32.gmra.mxu0 %v10833_v5  ;;  %2540 = vmatmul.mubr.f32.gmra.mxu1 %v10833_v5  ;;  %v10872_v21 = vadd.f32 %v10261_v40, %v1997_v60  ;;  %v2565_v52 = vld [vmem:[%s12331_s7 + $0x80] sm:$0xff] }
 0x27a   :  { %2657 = vmatpush2.msra.mxu0 %v6841_v55  ;;  %2837 = vmatprep.subr.mxu1 %v12363_v56  ;;  %v1999_v62 = vmax.f32 %v1947_v6, %v1949_v39  ;;  %v10886_v6 = vadd.f32 %v10264_v54, %v1996_v45  ;;  %v6837_v45 = vld [vmem:[%s12331_s7 + $0x150] sm:$0xff]  ;;  %v7751_v55 = vld [vmem:[%s12332_s9 + $0x11c] ss:$28 sps:$4 sm:$0xff]   ;;  %v10908_v38 = vadd.f32 %v10264_v54, %v1998_v12 }
 0x27b   :  { %2838 = vmatpush2.msra.mxu1 %v2568_v13  ;;  %2658 = vmatprep.subr.mxu0 %v12363_v56  ;;  %v7749_v54 = vld [vmem:[%s12332_s9 + $0x118] ss:$28 sps:$4 sm:$0xff]  }
 0x27c   :  { %2839 = vmatprep.subr.mxu1 %v12363_v56  ;;  %6795 = vmatprep.mubr.msk.f32.mxu0 %vm2115_vm3, %v10848_v7 }
 0x27d   :  { %6820 = vmatprep.mubr.msk.f32.mxu1 %vm2115_vm3, %v10848_v7  ;;  %2659 = vmatpush2.msra.mxu0 %v6840_v1 }
 0x27e   :  { %2840 = vmatpush2.msra.mxu1 %v2567_v16  ;;  %2350 = vmatmul.mubr.f32.gmra.mxu0 %v10861_v61 }
 0x27f   :  { %2544 = vmatmul.mubr.f32.gmra.mxu1 %v10861_v61  ;;  %2841 = vmatprep.subr.mxu1 %v12363_v56 }
 0x280   :  { %2842 = vmatpush2.msra.mxu1 %v2566_v28  ;;  %6870 = vmatprep.mubr.msk.f32.mxu1 %vm2115_vm3, %v10270_v8  ;;  %v10896_v8 = vadd.f32 %v10261_v40, %v1999_v62  ;;  %v7752_v40 = vld [vmem:[%s12332_s9 + $0x120] ss:$28 sps:$4 sm:$0xff]  }
 0x281   :  { %2660 = vmatprep.subr.mxu0 %v12363_v56  ;;  %2843 = vmatprep.subr.mxu1 %v12363_v56 }
 0x282   :  { %6796 = vmatprep.mubr.msk.f32.mxu0 %vm2115_vm3, %v10872_v21  ;;  %2661 = vmatpush2.msra.mxu0 %v6839_v37 }
 0x283   :  { %2844 = vmatpush2.msra.mxu1 %v2565_v52  ;;  %2355 = vmatmul.mubr.f32.gmra.mxu0 %v10886_v6 }
 0x284   :  { %2846 = vmatmul.mubr.f32.vlgmr.msra.gmra.mxu1 %v10273_v34  ;;  %2662 = vmatprep.subr.mxu0 %v12363_v56  ;;  %v7754_v34 = vld [vmem:[%s12332_s9 + $0x124] ss:$28 sps:$4 sm:$0xff]  }
 0x285   :  { %6871 = vmatprep.mubr.msk.f32.mxu1 %vm2115_vm3, %v10285_v36  ;;  %2663 = vmatpush2.msra.mxu0 %v6838_v30  ;;  %v7755_v36 = vld [vmem:[%s12332_s9 + $0xe0] ss:$28 sps:$4 sm:$0xff]  }
 0x286   :  { %6797 = vmatprep.mubr.msk.f32.mxu0 %vm2115_vm3, %v10896_v8  ;;  %2664 = vmatprep.subr.mxu0 %v12363_v56 }
 0x287   :  { %2359 = vmatmul.mubr.f32.gmra.mxu0 %v10908_v38  ;;  %3331 = vmatprep.subr.bf16.mxu1 %v7754_v34 }
 0x288   :  { %2851 = vmatmul.mubr.f32.gmra.mxu1 %v10288_v59  ;;  %6847 = vmatprep.mubr.msk.f32.mxu0 %vm2115_vm3, %v10301_v53  ;;  %v7757_v59 = vld [vmem:[%s12332_s9 + $0xe4] ss:$28 sps:$4 sm:$0xff]  }
 0x289   :  { %6872 = vmatprep.mubr.msk.f32.mxu1 %vm2115_vm3, %v10301_v53  ;;  %2665 = vmatpush2.msra.mxu0 %v6837_v45  ;;  %v7758_v53 = vld [vmem:[%s12332_s9 + $0xe8] ss:$28 sps:$4 sm:$0xff]  }
 0x28a   :  { %3290 = vmatprep.subr.bf16.mxu0 %v7751_v55  ;;  %3332 = vmatpush1.bf16.msra.mxu1 %v7752_v40 }
 0x28b   :  { %2667 = vmatmul.mubr.f32.vlgmr.msra.gmra.mxu0 %v10304_v29 }
 0x28c   :  { %2856 = vmatmul.mubr.f32.gmra.mxu1 %v10304_v29  ;;  %6848 = vmatprep.mubr.msk.f32.mxu0 %vm2115_vm3, %v10331_v14  ;;  %v7760_v29 = vld [vmem:[%s12332_s9 + $0xec] ss:$28 sps:$4 sm:$0xff]  }
 0x28d   :  { %6873 = vmatprep.mubr.msk.f32.mxu1 %vm2115_vm3, %v10331_v14  ;;  %3291 = vmatpush1.bf16.msra.mxu0 %v7749_v54  ;;  %v7761_v14 = vld [vmem:[%s12332_s9 + $0xa8] ss:$28 sps:$4 sm:$0xff]  }
 0x28e   :  { %3292 = vmatprep.subr.bf16.mxu0 %v7757_v59  ;;  %3333 = vmatprep.subr.bf16.mxu1 %v7760_v29 }
 0x28f   :  { %2672 = vmatmul.mubr.f32.gmra.mxu0 %v10335_v48  ;;  %3334 = vmatpush1.bf16.msra.mxu1 %v7758_v53 }
 0x290   :  { %2861 = vmatmul.mubr.f32.gmra.mxu1 %v10335_v48  ;;  %6849 = vmatprep.mubr.msk.f32.mxu0 %vm2115_vm3, %v10354_v3  ;;  %v7763_v48 = vld [vmem:[%s12332_s9 + $0xac] ss:$28 sps:$4 sm:$0xff]  }
 0x291   :  { %6874 = vmatprep.mubr.msk.f32.mxu1 %vm2115_vm3, %v10354_v3  ;;  %3293 = vmatpush1.bf16.msra.mxu0 %v7755_v36  ;;  %v7764_v3 = vld [vmem:[%s12332_s9 + $0xb0] ss:$28 sps:$4 sm:$0xff]  }
 0x292   :  { %3294 = vmatprep.subr.bf16.mxu0 %v7763_v48 }
 0x293   :  { %2677 = vmatmul.mubr.f32.gmra.mxu0 %v10359_v22 }
 0x294   :  { %2866 = vmatmul.mubr.f32.gmra.mxu1 %v10359_v22  ;;  %6850 = vmatprep.mubr.msk.f32.mxu0 %vm2115_vm3, %v10381_v31  ;;  %v7766_v22 = vld [vmem:[%s12332_s9 + $0xb4] ss:$28 sps:$4 sm:$0xff]  }
 0x295   :  { %6875 = vmatprep.mubr.msk.f32.mxu1 %vm2115_vm3, %v10381_v31  ;;  %3295 = vmatpush1.bf16.msra.mxu0 %v7761_v14  ;;  %v7767_v31 = vld [vmem:[%s12332_s9 + $0x70] ss:$28 sps:$4 sm:$0xff]  }
 0x296   :  { %3335 = vmatprep.subr.bf16.mxu1 %v7766_v22 }
 0x297   :  { %2682 = vmatmul.mubr.f32.gmra.mxu0 %v10385_v42  ;;  %3336 = vmatpush1.bf16.msra.mxu1 %v7764_v3 }
 0x298   :  { %2871 = vmatmul.mubr.f32.gmra.mxu1 %v10385_v42  ;;  %6851 = vmatprep.mubr.msk.f32.mxu0 %vm2115_vm3, %v10404_v26  ;;  %v7769_v42 = vld [vmem:[%s12332_s9 + $0x74] ss:$28 sps:$4 sm:$0xff]  }
 0x299   :  { %6876 = vmatprep.mubr.msk.f32.mxu1 %vm2115_vm3, %v10404_v26  ;;  %3296 = vmatprep.subr.bf16.mxu0 %v7769_v42  ;;  %v7770_v26 = vld [vmem:[%s12332_s9 + $0x78] ss:$28 sps:$4 sm:$0xff]  }
 0x29a   :  { %3297 = vmatpush1.bf16.msra.mxu0 %v7767_v31 }
 0x29b   :  { %2687 = vmatmul.mubr.f32.gmra.mxu0 %v10409_v10 }
 0x29c   :  { %2876 = vmatmul.mubr.f32.gmra.mxu1 %v10409_v10  ;;  %6852 = vmatprep.mubr.msk.f32.mxu0 %vm2115_vm3, %v10427_v47  ;;  %v7772_v10 = vld [vmem:[%s12332_s9 + $0x7c] ss:$28 sps:$4 sm:$0xff]  }
 0x29d   :  { %6877 = vmatprep.mubr.msk.f32.mxu1 %vm2115_vm3, %v10427_v47  ;;  %3337 = vmatprep.subr.bf16.mxu1 %v7772_v10  ;;  %v7773_v47 = vld [vmem:[%s12332_s9 + $0x38] ss:$28 sps:$4 sm:$0xff]  }
 0x29e   :  { %3338 = vmatpush1.bf16.msra.mxu1 %v7770_v26 }
 0x29f   :  { %2692 = vmatmul.mubr.f32.gmra.mxu0 %v10442_v43 }
 0x2a0   :  { %2881 = vmatmul.mubr.f32.gmra.mxu1 %v10442_v43  ;;  %6853 = vmatprep.mubr.msk.f32.mxu0 %vm2115_vm3, %v10453_v35  ;;  %v7775_v43 = vld [vmem:[%s12332_s9 + $0x3c] ss:$28 sps:$4 sm:$0xff]  }
 0x2a1   :  { %6878 = vmatprep.mubr.msk.f32.mxu1 %vm2115_vm3, %v10453_v35  ;;  %3298 = vmatprep.subr.bf16.mxu0 %v7775_v43  ;;  %v12443_v35 = vld [vmem:[#allocation6_spill] sm:$0xff] }
 0x2a2   :  { %3299 = vmatpush1.bf16.msra.mxu0 %v7773_v47 }
 0x2a3   :  { %2697 = vmatmul.mubr.f32.gmra.mxu0 %v10468_v41 }
 0x2a4   :  { %2886 = vmatmul.mubr.f32.gmra.mxu1 %v10468_v41  ;;  %6854 = vmatprep.mubr.msk.f32.mxu0 %vm2115_vm3, %v10485_v23  ;;  %v7776_v41 = vld [vmem:[%s12332_s9 + $0x40] ss:$28 sps:$4 sm:$0xff]  }
 0x2a5   :  { %6879 = vmatprep.mubr.msk.f32.mxu1 %vm2115_vm3, %v10485_v23  ;;  %v7778_v23 = vld [vmem:[%s12332_s9 + $0x44] ss:$28 sps:$4 sm:$0xff]  }
 0x2a6   :  { %3339 = vmatprep.subr.bf16.mxu1 %v7778_v23 }
 0x2a7   :  { %2702 = vmatmul.mubr.f32.gmra.mxu0 %v10495_v4  ;;  %3340 = vmatpush1.bf16.msra.mxu1 %v7776_v41 }
 0x2a8   :  { %2891 = vmatmul.mubr.f32.gmra.mxu1 %v10495_v4  ;;  %6855 = vmatprep.mubr.msk.f32.mxu0 %vm2115_vm3, %v10506_v25  ;;  %v12444_v4 = vld [vmem:[#allocation8_spill] sm:$0xff] }
 0x2a9   :  { %6880 = vmatprep.mubr.msk.f32.mxu1 %vm2115_vm3, %v10506_v25  ;;  %v12445_v25 = vld [vmem:[#allocation5_spill] sm:$0xff] }
 0x2ab   :  { %2707 = vmatmul.mubr.f32.gmra.mxu0 %v10522_v50 }
 0x2ac   :  { %2896 = vmatmul.mubr.f32.gmra.mxu1 %v10522_v50  ;;  %6856 = vmatprep.mubr.msk.f32.mxu0 %vm2115_vm3, %v10539_v51  ;;  %v7781_v50 = vld [vmem:[%s12332_s9 + $0x4] ss:$28 sps:$4 sm:$0xff]  }
 0x2ad   :  { %6881 = vmatprep.mubr.msk.f32.mxu1 %vm2115_vm3, %v10539_v51  ;;  %v7784_v51 = vld [vmem:[%s12332_s9 + $0xc] ss:$28 sps:$4 sm:$0xff]   ;;  %3300 = vmatprep.subr.bf16.mxu0 %v7781_v50 }
 0x2ae   :  { %3341 = vmatprep.subr.bf16.mxu1 %v7784_v51 }
 0x2af   :  { %2712 = vmatmul.mubr.f32.gmra.mxu0 %v10549_v46 }
 0x2b0   :  { %2901 = vmatmul.mubr.f32.gmra.mxu1 %v10549_v46  ;;  %6857 = vmatprep.mubr.msk.f32.mxu0 %vm2115_vm3, %v10560_v33  ;;  %v7782_v46 = vld [vmem:[%s12332_s9 + $0x8] ss:$28 sps:$4 sm:$0xff]  }
 0x2b1   :  { %6882 = vmatprep.mubr.msk.f32.mxu1 %vm2115_vm3, %v10560_v33  ;;  %3342 = vmatpush1.bf16.msra.mxu1 %v7782_v46 }
 0x2b2   :  { %7602 = vmatprep.subr.bf16.mxu1 %v12363_v56 }
 0x2b3   :  { %2717 = vmatmul.mubr.f32.gmra.mxu0 %v10576_v11 }
 0x2b4   :  { %2906 = vmatmul.mubr.f32.gmra.mxu1 %v10576_v11  ;;  %6858 = vmatprep.mubr.msk.f32.mxu0 %vm2115_vm3, %v10593_v57  ;;  %v7787_v11 = vld [vmem:[%s12332_s9 + $0x12c] ss:$28 sps:$4 sm:$0xff]  }
 0x2b5   :  { %6883 = vmatprep.mubr.msk.f32.mxu1 %vm2115_vm3, %v10593_v57 }
 0x2b7   :  { %2722 = vmatmul.mubr.f32.gmra.mxu0 %v10604_v63 }
 0x2b8   :  { %2911 = vmatmul.mubr.f32.gmra.mxu1 %v10604_v63  ;;  %6859 = vmatprep.mubr.msk.f32.mxu0 %vm2115_vm3, %v10620_v27  ;;  %v8203_v63 = vmov 0  }
 0x2b9   :  { %6884 = vmatprep.mubr.msk.f32.mxu1 %vm2115_vm3, %v10620_v27 }
 0x2bb   :  { %2727 = vmatmul.mubr.f32.gmra.mxu0 %v10640_v49 }
 0x2bc   :  { %2916 = vmatmul.mubr.f32.gmra.mxu1 %v10640_v49  ;;  %6860 = vmatprep.mubr.msk.f32.mxu0 %vm2115_vm3, %v10643_v15 }
 0x2bd   :  { %6885 = vmatprep.mubr.msk.f32.mxu1 %vm2115_vm3, %v10643_v15 }
 0x2bf   :  { %2732 = vmatmul.mubr.f32.gmra.mxu0 %v10667_v24 }
 0x2c0   :  { %2921 = vmatmul.mubr.f32.gmra.mxu1 %v10667_v24  ;;  %6861 = vmatprep.mubr.msk.f32.mxu0 %vm2115_vm3, %v10673_v58 }
 0x2c1   :  { %6886 = vmatprep.mubr.msk.f32.mxu1 %vm2115_vm3, %v10673_v58 }
 0x2c3   :  { %2737 = vmatmul.mubr.f32.gmra.mxu0 %v10694_v32 }
 0x2c4   :  { %2926 = vmatmul.mubr.f32.gmra.mxu1 %v10694_v32  ;;  %6862 = vmatprep.mubr.msk.f32.mxu0 %vm2115_vm3, %v10700_v44 }
 0x2c5   :  { %6887 = vmatprep.mubr.msk.f32.mxu1 %vm2115_vm3, %v10700_v44 }
 0x2c7   :  { %2742 = vmatmul.mubr.f32.gmra.mxu0 %v10723_v19 }
 0x2c8   :  { %2931 = vmatmul.mubr.f32.gmra.mxu1 %v10723_v19  ;;  %6863 = vmatprep.mubr.msk.f32.mxu0 %vm2115_vm3, %v12443_v35 }
 0x2c9   :  { %6888 = vmatprep.mubr.msk.f32.mxu1 %vm2115_vm3, %v12443_v35 }
 0x2cb   :  { %2747 = vmatmul.mubr.f32.gmra.mxu0 %v12444_v4 }
 0x2cc   :  { %2936 = vmatmul.mubr.f32.gmra.mxu1 %v12444_v4  ;;  %6864 = vmatprep.mubr.msk.f32.mxu0 %vm2115_vm3, %v10752_v20 }
 0x2cd   :  { %6889 = vmatprep.mubr.msk.f32.mxu1 %vm2115_vm3, %v10752_v20 }
 0x2cf   :  { %2752 = vmatmul.mubr.f32.gmra.mxu0 %v10777_v2 }
 0x2d0   :  { %2941 = vmatmul.mubr.f32.gmra.mxu1 %v10777_v2  ;;  %6865 = vmatprep.mubr.msk.f32.mxu0 %vm2115_vm3, %v12445_v25  ;;  %v7779_v2 = vld [vmem:[%s12332_s9] ss:$28 sps:$4 sm:$0xff]  }
 0x2d1   :  { %6890 = vmatprep.mubr.msk.f32.mxu1 %vm2115_vm3, %v12445_v25  ;;  %3301 = vmatpush1.bf16.msra.mxu0 %v7779_v2 }
 0x2d2   :  { %3372 = vmatprep.subr.bf16.mxu0 %v7787_v11 }
 0x2d3   :  { %2757 = vmatmul.mubr.f32.gmra.mxu0 %v10803_v17 }
 0x2d4   :  { %2946 = vmatmul.mubr.f32.gmra.mxu1 %v10803_v17  ;;  %6866 = vmatprep.mubr.msk.f32.mxu0 %vm2115_vm3, %v10806_v0 }
 0x2d5   :  { %6891 = vmatprep.mubr.msk.f32.mxu1 %vm2115_vm3, %v10806_v0 }
 0x2d7   :  { %2762 = vmatmul.mubr.f32.gmra.mxu0 %v10833_v5 }
 0x2d8   :  { %2951 = vmatmul.mubr.f32.gmra.mxu1 %v10833_v5  ;;  %6867 = vmatprep.mubr.msk.f32.mxu0 %vm2115_vm3, %v10848_v7 }
 0x2d9   :  { %6892 = vmatprep.mubr.msk.f32.mxu1 %vm2115_vm3, %v10848_v7 }
 0x2db   :  { %2767 = vmatmul.mubr.f32.gmra.mxu0 %v10861_v61 }
 0x2dc   :  { %2955 = vmatmul.mubr.f32.gmra.mxu1 %v10861_v61  ;;  %6868 = vmatprep.mubr.msk.f32.mxu0 %vm2115_vm3, %v10872_v21 }
 0x2dd   :  { %3359 = vmatprep.mubr.bf16.mxu1 %v8203_v63 }
 0x2df   :  { %2772 = vmatmul.mubr.f32.gmra.mxu0 %v10886_v6  ;;  %v2436_v33 = vpop.f32.mrf.mxu1 }
 0x2e0   :  { %6869 = vmatprep.mubr.msk.f32.mxu0 %vm2115_vm3, %v10896_v8 }
 0x2e1   :  { %v2438_v57 = vpop.f32.mrf.mxu1 }
 0x2e3   :  { %2776 = vmatmul.mubr.f32.gmra.mxu0 %v10908_v38  ;;  %v2441_v27 = vpop.f32.mrf.mxu1 }
 0x2e4   :  { %3318 = vmatprep.mubr.bf16.mxu0 %v8203_v63 }
 0x2e5   :  { %v2443_v49 = vpop.f32.mrf.mxu1 }
 0x2e7   :  { %v2251_v15 = vpop.f32.mrf.mxu0  ;;  %v2446_v58 = vpop.f32.mrf.mxu1 }
 0x2e8   :  { %v11124_v24 = vadd.f32 %v2436_v33, %v2251_v15 }
 0x2e9   :  { %v2253_v32 = vpop.f32.mrf.mxu0  ;;  %v2448_v44 = vpop.f32.mrf.mxu1 }
 0x2eb   :  { %v2256_v19 = vpop.f32.mrf.mxu0 }
 0x2ec   :  { %v2451_v20 = vpop.f32.mrf.mxu1  ;;  %v11126_v5 = vadd.f32 %v2441_v27, %v2256_v19 }
 0x2ed   :  { %v2258_v17 = vpop.f32.mrf.mxu0 }
 0x2ee   :  { %v2453_v0 = vpop.f32.mrf.mxu1 }
 0x2ef   :  { %v2261_v18 = vpop.f32.mrf.mxu0 }
 0x2f0   :  { %v2456_v9 = vpop.f32.mrf.mxu1  ;;  %v11128_v12 = vadd.f32 %v2446_v58, %v2261_v18 }
 0x2f1   :  { %v2263_v13 = vpop.f32.mrf.mxu0 }
 0x2f2   :  { %v2458_v7 = vpop.f32.mrf.mxu1 }
 0x2f3   :  { %v2266_v60 = vpop.f32.mrf.mxu0 }
 0x2f4   :  { %v2461_v39 = vpop.f32.mrf.mxu1  ;;  %v11130_v1 = vadd.f32 %v2451_v20, %v2266_v60 }
 0x2f5   :  { %v2268_v16 = vpop.f32.mrf.mxu0 }
 0x2f6   :  { %v2463_v61 = vpop.f32.mrf.mxu1 }
 0x2f7   :  { %v2271_v28 = vpop.f32.mrf.mxu0 }
 0x2f8   :  { %v2466_v21 = vpop.f32.mrf.mxu1  ;;  %v11132_v62 = vadd.f32 %v2456_v9, %v2271_v28 }
 0x2f9   :  { %v2273_v37 = vpop.f32.mrf.mxu0 }
 0x2fa   :  { %v2468_v52 = vpop.f32.mrf.mxu1 }
 0x2fc   :  { %v2276_v6 = vpop.f32.mrf.mxu0  ;;  %v2471_v30 = vpop.f32.mrf.mxu1 }
 0x2fd   :  { %v11134_v8 = vadd.f32 %v2461_v39, %v2276_v6 }
 0x2fe   :  { %v2278_v45 = vpop.f32.mrf.mxu0  ;;  %v2473_v55 = vpop.f32.mrf.mxu1 }
 0x300   :  { %v2281_v38 = vpop.f32.mrf.mxu0 }
 0x301   :  { %v11136_v40 = vadd.f32 %v2466_v21, %v2281_v38  ;;  %v2476_v34 = vpop.f32.mrf.mxu1 }
 0x302   :  { %v2283_v54 = vpop.f32.mrf.mxu0 }
 0x303   :  { %v2478_v36 = vpop.f32.mrf.mxu1 }
 0x304   :  { %v2286_v59 = vpop.f32.mrf.mxu0 }
 0x305   :  { %v11138_v53 = vadd.f32 %v2471_v30, %v2286_v59  ;;  %v2481_v29 = vpop.f32.mrf.mxu1 }
 0x306   :  { %v2288_v14 = vpop.f32.mrf.mxu0 }
 0x307   :  { %v2483_v48 = vpop.f32.mrf.mxu1 }
 0x308   :  { %v2291_v3 = vpop.f32.mrf.mxu0 }
 0x309   :  { %v11140_v22 = vadd.f32 %v2476_v34, %v2291_v3  ;;  %v2486_v31 = vpop.f32.mrf.mxu1 }
 0x30a   :  { %v2293_v42 = vpop.f32.mrf.mxu0 }
 0x30b   :  { %v2488_v26 = vpop.f32.mrf.mxu1 }
 0x30d   :  { %v2296_v10 = vpop.f32.mrf.mxu0  ;;  %v2491_v43 = vpop.f32.mrf.mxu1 }
 0x30e   :  { %v11142_v47 = vadd.f32 %v2481_v29, %v2296_v10 }
 0x30f   :  { %v2298_v35 = vpop.f32.mrf.mxu0  ;;  %v2493_v41 = vpop.f32.mrf.mxu1 }
 0x312   :  { %v2301_v23 = vpop.f32.mrf.mxu0  ;;  %v2496_v25 = vpop.f32.mrf.mxu1 }
 0x313   :  { %v11144_v4 = vadd.f32 %v2486_v31, %v2301_v23 }
 0x314   :  { %v2303_v2 = vpop.f32.mrf.mxu0  ;;  %v2498_v50 = vpop.f32.mrf.mxu1 }
 0x316   :  { %v2306_v51 = vpop.f32.mrf.mxu0  ;;  %v2501_v33 = vpop.f32.mrf.mxu1 }
 0x317   :  { %v11146_v46 = vadd.f32 %v2491_v43, %v2306_v51 }
 0x318   :  { %v2308_v11 = vpop.f32.mrf.mxu0  ;;  %v2503_v57 = vpop.f32.mrf.mxu1 }
 0x31b   :  { %v2311_v27 = vpop.f32.mrf.mxu0 }
 0x31c   :  { %v11148_v49 = vadd.f32 %v2496_v25, %v2311_v27  ;;  %v2506_v15 = vpop.f32.mrf.mxu1 }
 0x31d   :  { %v2313_v58 = vpop.f32.mrf.mxu0 }
 0x31e   :  { %v2508_v32 = vpop.f32.mrf.mxu1 }
 0x31f   :  { %v2316_v44 = vpop.f32.mrf.mxu0 }
 0x320   :  { %v11150_v19 = vadd.f32 %v2501_v33, %v2316_v44  ;;  %v2511_v20 = vpop.f32.mrf.mxu1 }
 0x321   :  { %v2318_v17 = vpop.f32.mrf.mxu0 }
 0x322   :  { %v2513_v0 = vpop.f32.mrf.mxu1 }
 0x323   :  { %v2321_v18 = vpop.f32.mrf.mxu0 }
 0x324   :  { %v11152_v9 = vadd.f32 %v2506_v15, %v2321_v18  ;;  %v2516_v13 = vpop.f32.mrf.mxu1 }
 0x325   :  { %v2323_v7 = vpop.f32.mrf.mxu0 }
 0x326   :  { %v2518_v60 = vpop.f32.mrf.mxu1 }
 0x327   :  { %v2326_v39 = vpop.f32.mrf.mxu0 }
 0x328   :  { %v11154_v16 = vadd.f32 %v2511_v20, %v2326_v39  ;;  %v2521_v61 = vpop.f32.mrf.mxu1 }
 0x329   :  { %v2328_v28 = vpop.f32.mrf.mxu0 }
 0x32a   :  { %v2523_v21 = vpop.f32.mrf.mxu1 }
 0x32b   :  { %v2331_v37 = vpop.f32.mrf.mxu0 }
 0x32c   :  { %v11156_v52 = vadd.f32 %v2516_v13, %v2331_v37  ;;  %v2526_v6 = vpop.f32.mrf.mxu1 }
 0x32d   :  { %v2333_v30 = vpop.f32.mrf.mxu0 }
 0x32e   :  { %v2528_v45 = vpop.f32.mrf.mxu1 }
 0x32f   :  { %v2336_v55 = vpop.f32.mrf.mxu0 }
 0x330   :  { %v11158_v38 = vadd.f32 %v2521_v61, %v2336_v55  ;;  %v2531_v34 = vpop.f32.mrf.mxu1 }
 0x331   :  { %v2338_v54 = vpop.f32.mrf.mxu0 }
 0x332   :  { %v2533_v36 = vpop.f32.mrf.mxu1 }
 0x334   :  { %v2341_v59 = vpop.f32.mrf.mxu0 }
 0x335   :  { %v11160_v29 = vadd.f32 %v2526_v6, %v2341_v59  ;;  %v2536_v14 = vpop.f32.mrf.mxu1 }
 0x336   :  { %v2343_v48 = vpop.f32.mrf.mxu0 }
 0x337   :  { %v2538_v3 = vpop.f32.mrf.mxu1 }
 0x339   :  { %v2346_v31 = vpop.f32.mrf.mxu0  ;;  %v2541_v42 = vpop.f32.mrf.mxu1 }
 0x33a   :  { %v11162_v26 = vadd.f32 %v2531_v34, %v2346_v31  ;;  %v11175_v42 = vld [vmem:[%s12333_s8] ss:$0 sm:$0xff] }
 0x33b   :  { %v2348_v10 = vpop.f32.mrf.mxu0  ;;  %v2542_v43 = vpop.f32.mrf.mxu1 }
 0x33e   :  { %v2351_v35 = vpop.f32.mrf.mxu0 }
 0x33f   :  { %v11164_v41 = vadd.f32 %v2536_v14, %v2351_v35  ;;  %v2545_v23 = vpop.f32.mrf.mxu1 }
 0x340   :  { %v2353_v25 = vpop.f32.mrf.mxu0 }
 0x341   :  { %v2547_v2 = vpop.f32.mrf.mxu1 }
 0x343   :  { %v2356_v50 = vpop.f32.mrf.mxu0 }
 0x344   :  { %v2847_v51 = vpop.f32.mrf.mxu1 }
 0x345   :  { %v2357_v33 = vpop.f32.mrf.mxu0 }
 0x346   :  { %v2849_v11 = vpop.f32.mrf.mxu1  ;;  %v7791_v33 = vld [vmem:[%s12332_s9 + $0xf4] ss:$28 sps:$4 sm:$0xff]  }
 0x347   :  { %v2360_v57 = vpop.f32.mrf.mxu0 }
 0x348   :  { %v11166_v27 = vadd.f32 %v2545_v23, %v2360_v57  ;;  %v2852_v15 = vpop.f32.mrf.mxu1 }
 0x349   :  { %v2362_v58 = vpop.f32.mrf.mxu0 }
 0x34a   :  { %v2854_v32 = vpop.f32.mrf.mxu1 }
 0x34b   :  { %v2668_v44 = vpop.f32.mrf.mxu0  ;;  %v7789_v32 = vld [vmem:[%s12332_s9 + $0xf0] ss:$28 sps:$4 sm:$0xff]  }
 0x34c   :  { %v2857_v20 = vpop.f32.mrf.mxu1  ;;  %v2848_v60 = vadd.f32 %v2847_v51, %v2668_v44  ;;  %v7792_v44 = vld [vmem:[%s12332_s9 + $0xf8] ss:$28 sps:$4 sm:$0xff]  }
 0x34d   :  { %v2670_v17 = vpop.f32.mrf.mxu0 }
 0x34e   :  { %v2859_v0 = vpop.f32.mrf.mxu1  ;;  %v2960_v6 = vmax.f32 %v11124_v24, %v2848_v60 }
 0x34f   :  { %v2673_v18 = vpop.f32.mrf.mxu0  ;;  %v7795_v0 = vld [vmem:[%s12332_s9 + $0xbc] ss:$28 sps:$4 sm:$0xff]  }
 0x350   :  { %v2862_v13 = vpop.f32.mrf.mxu1  ;;  %v2853_v30 = vadd.f32 %v2852_v15, %v2673_v18 }
 0x351   :  { %v2675_v7 = vpop.f32.mrf.mxu0 }
 0x352   :  { %v2864_v39 = vpop.f32.mrf.mxu1  ;;  %v2961_v48 = vmax.f32 %v11126_v5, %v2853_v30  ;;  %v7785_v5 = vld [vmem:[%s12332_s9 + $0x128] ss:$28 sps:$4 sm:$0xff]  }
 0x353   :  { %v2678_v61 = vpop.f32.mrf.mxu0 }
 0x354   :  { %v2858_v28 = vadd.f32 %v2857_v20, %v2678_v61  ;;  %v2867_v21 = vpop.f32.mrf.mxu1 }
 0x355   :  { %v2680_v37 = vpop.f32.mrf.mxu0 }
 0x356   :  { %v2962_v45 = vmax.f32 %v11128_v12, %v2858_v28  ;;  %v2869_v55 = vpop.f32.mrf.mxu1  ;;  %v7793_v28 = vld [vmem:[%s12332_s9 + $0xb8] ss:$28 sps:$4 sm:$0xff]  }
 0x357   :  { %v2683_v34 = vpop.f32.mrf.mxu0 }
 0x358   :  { %v2982_v54 = vmax.f32 %v2960_v6, %v2962_v45  ;;  %v2863_v36 = vadd.f32 %v2862_v13, %v2683_v34  ;;  %v2872_v59 = vpop.f32.mrf.mxu1 }
 0x359   :  { %v2685_v14 = vpop.f32.mrf.mxu0 }
 0x35a   :  { %v2963_v3 = vmax.f32 %v11130_v1, %v2863_v36  ;;  %v2874_v31 = vpop.f32.mrf.mxu1  ;;  %v3000_v35 = vadd.f32 %v11175_v42, %v2982_v54  ;;  %v7788_v1 = vld [vmem:[%s12332_s9 + $0x130] ss:$28 sps:$4 sm:$0xff]   ;;  %v7797_v36 = vld [vmem:[%s12332_s9 + $0x80] ss:$28 sps:$4 sm:$0xff]  }
 0x35b   :  { %v2688_v24 = vpop.f32.mrf.mxu0 }
 0x35c   :  { %v2983_v10 = vmax.f32 %v2961_v48, %v2963_v3  ;;  %v2877_v43 = vpop.f32.mrf.mxu1  ;;  %v2868_v57 = vadd.f32 %v2867_v21, %v2688_v24  ;;  %v7796_v21 = vld [vmem:[%s12332_s9 + $0xc0] ss:$28 sps:$4 sm:$0xff]  }
 0x35d   :  { %v2690_v12 = vpop.f32.mrf.mxu0 }
 0x35e   :  { %v3001_v23 = vadd.f32 %v11175_v42, %v2983_v10  ;;  %v2879_v25 = vpop.f32.mrf.mxu1  ;;  %v2964_v13 = vmax.f32 %v11132_v62, %v2868_v57  ;;  %v7799_v62 = vld [vmem:[%s12332_s9 + $0x84] ss:$28 sps:$4 sm:$0xff]   ;;  %v7805_v57 = vld [vmem:[%s12332_s9 + $0x10] ss:$28 sps:$4 sm:$0xff]  }
 0x35f   :  { %v2693_v2 = vpop.f32.mrf.mxu0 }
 0x360   :  { %v11185_v50 = vpack.c.bf16 %v3001_v23, %v3000_v35  ;;  %v2882_v51 = vpop.f32.mrf.mxu1  ;;  %v2873_v7 = vadd.f32 %v2872_v59, %v2693_v2  ;;  %v7800_v59 = vld [vmem:[%s12332_s9 + $0x88] ss:$28 sps:$4 sm:$0xff]   ;;  %v7804_v23 = vld [vmem:[%s12332_s9 + $0x50] ss:$28 sps:$4 sm:$0xff]  }
 0x361   :  { %v2695_v11 = vpop.f32.mrf.mxu0  ;;  %v7801_v35 = vld [vmem:[%s12332_s9 + $0x48] ss:$28 sps:$4 sm:$0xff]  }
 0x362   :  { %v2884_v15 = vpop.f32.mrf.mxu1  ;;  %6936 = vmatmul.mubr.msk.bf16.vlgmr.msra.gmra.mxu0 %vm3282_vm4, %v11185_v50  ;;  %6937 = vmatmul.mubr.msk.bf16.vlgmr.msra.gmra.mxu1 %vm3282_vm4, %v11185_v50  ;;  %v2965_v45 = vmax.f32 %v11134_v8, %v2873_v7  ;;  %v7803_v8 = vld [vmem:[%s12332_s9 + $0x4c] ss:$28 sps:$4 sm:$0xff]  }
 0x363   :  { %3373 = vmatpush1.bf16.msra.mxu0 %v7785_v5  ;;  %7603 = vmatpush3.bf16.msra.mxu1 %v7788_v1  ;;  %v2698_v58 = vpop.f32.mrf.mxu0  ;;  %v7808_v15 = vld [vmem:[%s12332_s9 + $0x18] ss:$28 sps:$4 sm:$0xff]   ;;  %v7812_v7 = vld [vmem:[%s12332_s9 + $0x270] ss:$28 sps:$4 sm:$0xff]  }
 0x364   :  { %v2878_v20 = vadd.f32 %v2877_v43, %v2698_v58  ;;  %v2887_v17 = vpop.f32.mrf.mxu1  ;;  %3374 = vmatprep.subr.bf16.mxu0 %v7791_v33  ;;  %7604 = vmatprep.subr.bf16.mxu1 %v12363_v56 }
 0x365   :  { %v2700_v18 = vpop.f32.mrf.mxu0  ;;  %3400 = vmatprep.mubr.bf16.mxu0 %v8203_v63  ;;  %7614 = vmatprep.mubr.msk.bf16.mxu1 %vm8204_vm5, %v12363_v56 }
 0x366   :  { %v2966_v60 = vmax.f32 %v11136_v40, %v2878_v20  ;;  %v2889_v39 = vpop.f32.mrf.mxu1 }
 0x367   :  { %3375 = vmatpush1.bf16.msra.mxu0 %v7789_v32  ;;  %7605 = vmatpush3.bf16.msra.mxu1 %v7792_v44  ;;  %v2703_v61 = vpop.f32.mrf.mxu0  ;;  %v7814_v44 = vld [vmem:[%s12332_s9 + $0x274] ss:$28 sps:$4 sm:$0xff]  }
 0x368   :  { %v2984_v37 = vmax.f32 %v2964_v13, %v2966_v60  ;;  %v2883_v6 = vadd.f32 %v2882_v51, %v2703_v61  ;;  %v2892_v30 = vpop.f32.mrf.mxu1  ;;  %3376 = vmatprep.subr.bf16.mxu0 %v7795_v0  ;;  %7606 = vmatprep.subr.bf16.mxu1 %v12363_v56  ;;  %v7809_v13 = vld [vmem:[%s12332_s9 + $0x268] ss:$28 sps:$4 sm:$0xff]  }
 0x369   :  { %v2705_v40 = vpop.f32.mrf.mxu0 }
 0x36a   :  { %v2967_v55 = vmax.f32 %v11138_v53, %v2883_v6  ;;  %v2894_v34 = vpop.f32.mrf.mxu1  ;;  %v3002_v31 = vadd.f32 %v11175_v42, %v2984_v37  ;;  %v7818_v40 = vld [vmem:[%s12332_s9 + $0x238] ss:$28 sps:$4 sm:$0xff]  }
 0x36b   :  { %3377 = vmatpush1.bf16.msra.mxu0 %v7793_v28  ;;  %7607 = vmatpush3.bf16.msra.mxu1 %v7796_v21  ;;  %v2708_v54 = vpop.f32.mrf.mxu0  ;;  %v7820_v28 = vld [vmem:[%s12332_s9 + $0x23c] ss:$28 sps:$4 sm:$0xff]   ;;  %v7826_v34 = vld [vmem:[%s12332_s9 + $0x204] ss:$28 sps:$4 sm:$0xff]  }
 0x36c   :  { %v2985_v14 = vmax.f32 %v2965_v45, %v2967_v55  ;;  %v2888_v48 = vadd.f32 %v2887_v17, %v2708_v54  ;;  %v2897_v3 = vpop.f32.mrf.mxu1  ;;  %3378 = vmatprep.subr.bf16.mxu0 %v7799_v62  ;;  %7608 = vmatprep.subr.bf16.mxu1 %v12363_v56  ;;  %v7815_v62 = vld [vmem:[%s12332_s9 + $0x230] ss:$28 sps:$4 sm:$0xff]  }
 0x36d   :  { %v2710_v53 = vpop.f32.mrf.mxu0 }
 0x36e   :  { %v3003_v24 = vadd.f32 %v11175_v42, %v2985_v14  ;;  %v2968_v10 = vmax.f32 %v11140_v22, %v2888_v48  ;;  %v2899_v43 = vpop.f32.mrf.mxu1  ;;  %v7807_v22 = vld [vmem:[%s12332_s9 + $0x14] ss:$28 sps:$4 sm:$0xff]   ;;  %v7824_v53 = vld [vmem:[%s12332_s9 + $0x200] ss:$28 sps:$4 sm:$0xff]  }
 0x36f   :  { %3379 = vmatpush1.bf16.msra.mxu0 %v7797_v36  ;;  %7609 = vmatpush3.bf16.msra.mxu1 %v7800_v59  ;;  %v2713_v12 = vpop.f32.mrf.mxu0  ;;  %v7832_v43 = vld [vmem:[%s12332_s9 + $0x1cc] ss:$28 sps:$4 sm:$0xff]  }
 0x370   :  { %v11240_v25 = vpack.c.bf16 %v3003_v24, %v3002_v31  ;;  %v2893_v2 = vadd.f32 %v2892_v30, %v2713_v12  ;;  %v2902_v5 = vpop.f32.mrf.mxu1  ;;  %3380 = vmatprep.subr.bf16.mxu0 %v7803_v8  ;;  %7610 = vmatprep.subr.bf16.mxu1 %v12363_v56  ;;  %v7821_v8 = vld [vmem:[%s12332_s9 + $0x1f8] ss:$28 sps:$4 sm:$0xff]  }
 0x371   :  { %v2715_v1 = vpop.f32.mrf.mxu0 }
 0x372   :  { %v2969_v51 = vmax.f32 %v11142_v47, %v2893_v2  ;;  %v2904_v33 = vpop.f32.mrf.mxu1  ;;  %v7811_v47 = vld [vmem:[%s12332_s9 + $0x26c] ss:$28 sps:$4 sm:$0xff]  }
 0x373   :  { %3381 = vmatpush1.bf16.msra.mxu0 %v7801_v35  ;;  %7611 = vmatpush3.bf16.msra.mxu1 %v7804_v23  ;;  %v2718_v11 = vpop.f32.mrf.mxu0  ;;  %v7838_v33 = vld [vmem:[%s12332_s9 + $0x194] ss:$28 sps:$4 sm:$0xff]  }
 0x374   :  { %v2898_v58 = vadd.f32 %v2897_v3, %v2718_v11  ;;  %v2907_v32 = vpop.f32.mrf.mxu1  ;;  %3382 = vmatprep.subr.bf16.mxu0 %v7807_v22  ;;  %7612 = vmatprep.subr.bf16.mxu1 %v12363_v56  ;;  %v7830_v22 = vld [vmem:[%s12332_s9 + $0x1c8] ss:$28 sps:$4 sm:$0xff]  }
 0x375   :  { %v2720_v20 = vpop.f32.mrf.mxu0 }
 0x376   :  { %v2970_v17 = vmax.f32 %v11144_v4, %v2898_v58  ;;  %v2909_v0 = vpop.f32.mrf.mxu1  ;;  %v7817_v4 = vld [vmem:[%s12332_s9 + $0x234] ss:$28 sps:$4 sm:$0xff]  }
 0x377   :  { %3383 = vmatpush1.bf16.msra.mxu0 %v7805_v57  ;;  %7613 = vmatpush3.bf16.msra.mxu1 %v7808_v15  ;;  %v2723_v18 = vpop.f32.mrf.mxu0  ;;  %v7844_v0 = vld [vmem:[%s12332_s9 + $0x15c] ss:$28 sps:$4 sm:$0xff]  }
 0x378   :  { %v2986_v60 = vmax.f32 %v2968_v10, %v2970_v17  ;;  %v2903_v39 = vadd.f32 %v2902_v5, %v2723_v18  ;;  %v2912_v61 = vpop.f32.mrf.mxu1  ;;  %3764 = vmatprep.subr.bf16.mxu0 %v7811_v47  ;;  %3805 = vmatprep.subr.bf16.mxu1 %v7814_v44  ;;  %v7827_v5 = vld [vmem:[%s12332_s9 + $0x1c0] ss:$28 sps:$4 sm:$0xff]   ;;  %v7836_v47 = vld [vmem:[%s12332_s9 + $0x190] ss:$28 sps:$4 sm:$0xff]  }
 0x379   :  { %v2725_v21 = vpop.f32.mrf.mxu0 }
 0x37a   :  { %v2971_v37 = vmax.f32 %v11146_v46, %v2903_v39  ;;  %v2914_v6 = vpop.f32.mrf.mxu1  ;;  %6938 = vmatmul.mubr.msk.bf16.vlgmr.msra.gmra.mxu0 %vm3282_vm4, %v11185_v50  ;;  %7615 = vmatmul.mubr.msk.bf16.vlgmr.msra.gmra.mxu1 %vm3282_vm4, %v11185_v50  ;;  %v7823_v50 = vld [vmem:[%s12332_s9 + $0x1fc] ss:$28 sps:$4 sm:$0xff]   ;;  %v3004_v36 = vadd.f32 %v11175_v42, %v2986_v60  ;;  %v7839_v39 = vld [vmem:[%s12332_s9 + $0x150] ss:$28 sps:$4 sm:$0xff]  }
 0x37b   :  { %3765 = vmatpush1.bf16.msra.mxu0 %v7809_v13  ;;  %3806 = vmatpush1.bf16.msra.mxu1 %v7812_v7  ;;  %v2728_v30 = vpop.f32.mrf.mxu0 }
 0x37c   :  { %v2987_v45 = vmax.f32 %v2969_v51, %v2971_v37  ;;  %v2908_v46 = vadd.f32 %v2907_v32, %v2728_v30  ;;  %v2917_v55 = vpop.f32.mrf.mxu1  ;;  %3766 = vmatprep.subr.bf16.mxu0 %v7817_v4  ;;  %3807 = vmatprep.subr.bf16.mxu1 %v7820_v28  ;;  %v7833_v32 = vld [vmem:[%s12332_s9 + $0x188] ss:$28 sps:$4 sm:$0xff]  }
 0x37d   :  { %v2730_v54 = vpop.f32.mrf.mxu0  ;;  %3792 = vmatprep.mubr.bf16.mxu0 %v8203_v63  ;;  %3833 = vmatprep.mubr.bf16.mxu1 %v8203_v63 }
 0x37e   :  { %v3005_v59 = vadd.f32 %v11175_v42, %v2987_v45  ;;  %v2972_v14 = vmax.f32 %v11148_v49, %v2908_v46  ;;  %v2919_v48 = vpop.f32.mrf.mxu1  ;;  %v7829_v49 = vld [vmem:[%s12332_s9 + $0x1c4] ss:$28 sps:$4 sm:$0xff]   ;;  %v7845_v46 = vld [vmem:[%s12332_s9 + $0x278] ss:$28 sps:$4 sm:$0xff]  }
 0x37f   :  { %3767 = vmatpush1.bf16.msra.mxu0 %v7815_v62  ;;  %3808 = vmatpush1.bf16.msra.mxu1 %v7818_v40  ;;  %v2733_v3 = vpop.f32.mrf.mxu0 }
 0x380   :  { %v11301_v31 = vpack.c.bf16 %v3005_v59, %v3004_v36  ;;  %v2913_v24 = vadd.f32 %v2912_v61, %v2733_v3  ;;  %v2922_v10 = vpop.f32.mrf.mxu1  ;;  %3768 = vmatprep.subr.bf16.mxu0 %v7823_v50  ;;  %3809 = vmatprep.subr.bf16.mxu1 %v7826_v34  ;;  %v7842_v61 = vld [vmem:[%s12332_s9 + $0x158] ss:$28 sps:$4 sm:$0xff]   ;;  %v7849_v3 = vld [vmem:[%s12332_s9 + $0x240] ss:$28 sps:$4 sm:$0xff]  }
 0x381   :  { %v2735_v12 = vpop.f32.mrf.mxu0 }
 0x382   :  { %v2973_v35 = vmax.f32 %v11150_v19, %v2913_v24  ;;  %v2924_v23 = vpop.f32.mrf.mxu1  ;;  %v7835_v19 = vld [vmem:[%s12332_s9 + $0x18c] ss:$28 sps:$4 sm:$0xff]  }
 0x383   :  { %3769 = vmatpush1.bf16.msra.mxu0 %v7821_v8  ;;  %3810 = vmatpush1.bf16.msra.mxu1 %v7824_v53  ;;  %v2738_v2 = vpop.f32.mrf.mxu0  ;;  %v7852_v8 = vld [vmem:[%s12332_s9 + $0x248] ss:$28 sps:$4 sm:$0xff]   ;;  %v7856_v23 = vld [vmem:[%s12332_s9 + $0x210] ss:$28 sps:$4 sm:$0xff]  }
 0x384   :  { %v2918_v1 = vadd.f32 %v2917_v55, %v2738_v2  ;;  %v2927_v51 = vpop.f32.mrf.mxu1  ;;  %3770 = vmatprep.subr.bf16.mxu0 %v7829_v49  ;;  %3811 = vmatprep.subr.bf16.mxu1 %v7832_v43  ;;  %v7848_v55 = vld [vmem:[%s12332_s9 + $0x280] ss:$28 sps:$4 sm:$0xff]   ;;  %v7855_v24 = vld [vmem:[%s12332_s9 + $0x20c] ss:$28 sps:$4 sm:$0xff]  }
 0x385   :  { %v2740_v11 = vpop.f32.mrf.mxu0 }
 0x386   :  { %v2974_v57 = vmax.f32 %v11152_v9, %v2918_v1  ;;  %v2929_v15 = vpop.f32.mrf.mxu1  ;;  %v7841_v9 = vld [vmem:[%s12332_s9 + $0x154] ss:$28 sps:$4 sm:$0xff]  }
 0x387   :  { %3771 = vmatpush1.bf16.msra.mxu0 %v7827_v5  ;;  %3812 = vmatpush1.bf16.msra.mxu1 %v7830_v22  ;;  %v2743_v58 = vpop.f32.mrf.mxu0  ;;  %v7857_v11 = vld [vmem:[%s12332_s9 + $0x1d0] ss:$28 sps:$4 sm:$0xff]  }
 0x388   :  { %v2988_v44 = vmax.f32 %v2972_v14, %v2974_v57  ;;  %v2923_v20 = vadd.f32 %v2922_v10, %v2743_v58  ;;  %v2932_v17 = vpop.f32.mrf.mxu1  ;;  %3772 = vmatprep.subr.bf16.mxu0 %v7835_v19  ;;  %3813 = vmatprep.subr.bf16.mxu1 %v7838_v33  ;;  %v7860_v57 = vld [vmem:[%s12332_s9 + $0x1d8] ss:$28 sps:$4 sm:$0xff]  }
 0x389   :  { %v2745_v18 = vpop.f32.mrf.mxu0 }
 0x38a   :  { %v2975_v13 = vmax.f32 %v11154_v16, %v2923_v20  ;;  %v2934_v7 = vpop.f32.mrf.mxu1  ;;  %v7847_v16 = vld [vmem:[%s12332_s9 + $0x27c] ss:$28 sps:$4 sm:$0xff]   ;;  %v3006_v6 = vadd.f32 %v11175_v42, %v2988_v44 }
 0x38b   :  { %3773 = vmatpush1.bf16.msra.mxu0 %v7833_v32  ;;  %3814 = vmatpush1.bf16.msra.mxu1 %v7836_v47  ;;  %v2748_v60 = vpop.f32.mrf.mxu0  ;;  %v7861_v18 = vld [vmem:[%s12332_s9 + $0x198] ss:$28 sps:$4 sm:$0xff]  }
 0x38c   :  { %v2989_v4 = vmax.f32 %v2973_v35, %v2975_v13  ;;  %v2928_v28 = vadd.f32 %v2927_v51, %v2748_v60  ;;  %v2937_v21 = vpop.f32.mrf.mxu1  ;;  %3774 = vmatprep.subr.bf16.mxu0 %v7841_v9  ;;  %3815 = vmatprep.subr.bf16.mxu1 %v7844_v0  ;;  %v7853_v35 = vld [vmem:[%s12332_s9 + $0x208] ss:$28 sps:$4 sm:$0xff]   ;;  %v7864_v13 = vld [vmem:[%s12332_s9 + $0x1a0] ss:$28 sps:$4 sm:$0xff]  }
 0x38d   :  { %v2750_v37 = vpop.f32.mrf.mxu0 }
 0x38e   :  { %v3007_v30 = vadd.f32 %v11175_v42, %v2989_v4  ;;  %v2976_v62 = vmax.f32 %v11156_v52, %v2928_v28  ;;  %v2939_v40 = vpop.f32.mrf.mxu1  ;;  %v7851_v52 = vld [vmem:[%s12332_s9 + $0x244] ss:$28 sps:$4 sm:$0xff]   ;;  %v7871_v28 = vld [vmem:[%s12332_s9 + $0x3bc] ss:$28 sps:$4 sm:$0xff]  }
 0x38f   :  { %3775 = vmatpush1.bf16.msra.mxu0 %v7839_v39  ;;  %3816 = vmatpush1.bf16.msra.mxu1 %v7842_v61  ;;  %v2753_v45 = vpop.f32.mrf.mxu0  ;;  %v7865_v39 = vld [vmem:[%s12332_s9 + $0x160] ss:$28 sps:$4 sm:$0xff]   ;;  %v7868_v61 = vld [vmem:[%s12332_s9 + $0x168] ss:$28 sps:$4 sm:$0xff]  }
 0x390   :  { %v11354_v50 = vpack.c.bf16 %v3007_v30, %v3006_v6  ;;  %v2933_v34 = vadd.f32 %v2932_v17, %v2753_v45  ;;  %v2942_v54 = vpop.f32.mrf.mxu1  ;;  %3846 = vmatprep.subr.bf16.mxu0 %v7847_v16  ;;  %7618 = vmatprep.subr.bf16.mxu1 %v12363_v56  ;;  %v7869_v6 = vld [vmem:[%s12332_s9 + $0x3b8] ss:$28 sps:$4 sm:$0xff]   ;;  %v7872_v30 = vld [vmem:[%s12332_s9 + $0x3c0] ss:$28 sps:$4 sm:$0xff]  }
 0x391   :  { %v2755_v36 = vpop.f32.mrf.mxu0  ;;  %v7877_v40 = vld [vmem:[%s12332_s9 + $0x384] ss:$28 sps:$4 sm:$0xff]  }
 0x392   :  { %v2977_v59 = vmax.f32 %v11158_v38, %v2933_v34  ;;  %v2944_v14 = vpop.f32.mrf.mxu1  ;;  %7030 = vmatmul.mubr.msk.bf16.vlgmr.msra.gmra.mxu0 %vm3282_vm4, %v11240_v25  ;;  %7031 = vmatmul.mubr.msk.bf16.vlgmr.msra.gmra.mxu1 %vm3282_vm4, %v11240_v25  ;;  %v7875_v45 = vld [vmem:[%s12332_s9 + $0x380] ss:$28 sps:$4 sm:$0xff]   ;;  %v7881_v34 = vld [vmem:[%s12332_s9 + $0x348] ss:$28 sps:$4 sm:$0xff]  }
 0x393   :  { %3847 = vmatpush1.bf16.msra.mxu0 %v7845_v46  ;;  %7619 = vmatpush3.bf16.msra.mxu1 %v7848_v55  ;;  %v2758_v48 = vpop.f32.mrf.mxu0  ;;  %v7878_v46 = vld [vmem:[%s12332_s9 + $0x388] ss:$28 sps:$4 sm:$0xff]   ;;  %v7892_v36 = vld [vmem:[%s12332_s9 + $0x31c] ss:$28 sps:$4 sm:$0xff]  }
 0x394   :  { %v2938_v53 = vadd.f32 %v2937_v21, %v2758_v48  ;;  %v2947_v38 = vpop.f32.mrf.mxu1  ;;  %3848 = vmatprep.subr.bf16.mxu0 %v7851_v52  ;;  %7620 = vmatprep.subr.bf16.mxu1 %v12363_v56  ;;  %v7874_v21 = vld [vmem:[%s12332_s9 + $0x3c4] ss:$28 sps:$4 sm:$0xff]   ;;  %v7883_v55 = vld [vmem:[%s12332_s9 + $0x34c] ss:$28 sps:$4 sm:$0xff]   ;;  %v7889_v52 = vld [vmem:[%s12332_s9 + $0x314] ss:$28 sps:$4 sm:$0xff]  }
 0x395   :  { %v2760_v10 = vpop.f32.mrf.mxu0  ;;  %3874 = vmatprep.mubr.bf16.mxu0 %v8203_v63  ;;  %7630 = vmatprep.mubr.msk.bf16.mxu1 %vm8204_vm5, %v12363_v56  ;;  %v7890_v14 = vld [vmem:[%s12332_s9 + $0x318] ss:$28 sps:$4 sm:$0xff]  }
 0x396   :  { %v2978_v49 = vmax.f32 %v11160_v29, %v2938_v53  ;;  %v2949_v43 = vpop.f32.mrf.mxu1  ;;  %v7859_v29 = vld [vmem:[%s12332_s9 + $0x1d4] ss:$28 sps:$4 sm:$0xff]   ;;  %v7895_v48 = vld [vmem:[%s12332_s9 + $0x2dc] ss:$28 sps:$4 sm:$0xff]  }
 0x397   :  { %3849 = vmatpush1.bf16.msra.mxu0 %v7849_v3  ;;  %7621 = vmatpush3.bf16.msra.mxu1 %v7852_v8  ;;  %v2763_v12 = vpop.f32.mrf.mxu0  ;;  %v7898_v3 = vld [vmem:[%s12332_s9 + $0x2e4] ss:$28 sps:$4 sm:$0xff]   ;;  %v7893_v8 = vld [vmem:[%s12332_s9 + $0x2d8] ss:$28 sps:$4 sm:$0xff]   ;;  %v7907_v43 = vld [vmem:[%s12332_s9 + $0x3cc] ss:$28 sps:$4 sm:$0xff]  }
 0x398   :  { %v2990_v2 = vmax.f32 %v2976_v62, %v2978_v49  ;;  %v2943_v5 = vadd.f32 %v2942_v54, %v2763_v12  ;;  %v2952_v22 = vpop.f32.mrf.mxu1  ;;  %3850 = vmatprep.subr.bf16.mxu0 %v7855_v24  ;;  %7622 = vmatprep.subr.bf16.mxu1 %v12363_v56  ;;  %v7884_v54 = vld [vmem:[%s12332_s9 + $0x350] ss:$28 sps:$4 sm:$0xff]   ;;  %v7896_v53 = vld [vmem:[%s12332_s9 + $0x2e0] ss:$28 sps:$4 sm:$0xff]   ;;  %v7902_v49 = vld [vmem:[%s12332_s9 + $0x2a8] ss:$28 sps:$4 sm:$0xff]  }
 0x399   :  { %v2765_v1 = vpop.f32.mrf.mxu0  ;;  %v7904_v24 = vld [vmem:[%s12332_s9 + $0x2ac] ss:$28 sps:$4 sm:$0xff]   ;;  %v7899_v10 = vld [vmem:[%s12332_s9 + $0x2a0] ss:$28 sps:$4 sm:$0xff]  }
 0x39a   :  { %v2979_v51 = vmax.f32 %v11162_v26, %v2943_v5  ;;  %v2953_v19 = vpop.f32.mrf.mxu1  ;;  %v7863_v26 = vld [vmem:[%s12332_s9 + $0x19c] ss:$28 sps:$4 sm:$0xff]   ;;  %v3008_v44 = vadd.f32 %v11175_v42, %v2990_v2  ;;  %v7905_v12 = vld [vmem:[%s12332_s9 + $0x3c8] ss:$28 sps:$4 sm:$0xff]   ;;  %v7909_v2 = vld [vmem:[%s12332_s9 + $0x390] ss:$28 sps:$4 sm:$0xff]  }
 0x39b   :  { %3851 = vmatpush1.bf16.msra.mxu0 %v7853_v35  ;;  %7623 = vmatpush3.bf16.msra.mxu1 %v7856_v23  ;;  %v2768_v33 = vpop.f32.mrf.mxu0  ;;  %v7908_v35 = vld [vmem:[%s12332_s9 + $0x3d0] ss:$28 sps:$4 sm:$0xff]   ;;  %v7912_v5 = vld [vmem:[%s12332_s9 + $0x398] ss:$28 sps:$4 sm:$0xff]   ;;  %v7916_v1 = vld [vmem:[%s12332_s9 + $0x360] ss:$28 sps:$4 sm:$0xff]  }
 0x39c   :  { %v2991_v15 = vmax.f32 %v2977_v59, %v2979_v51  ;;  %v2948_v58 = vadd.f32 %v2947_v38, %v2768_v33  ;;  %v2956_v32 = vpop.f32.mrf.mxu1  ;;  %3852 = vmatprep.subr.bf16.mxu0 %v7859_v29  ;;  %7624 = vmatprep.subr.bf16.mxu1 %v12363_v56  ;;  %v7887_v59 = vld [vmem:[%s12332_s9 + $0x310] ss:$28 sps:$4 sm:$0xff]   ;;  %v7901_v38 = vld [vmem:[%s12332_s9 + $0x2a4] ss:$28 sps:$4 sm:$0xff]   ;;  %v7915_v22 = vld [vmem:[%s12332_s9 + $0x35c] ss:$28 sps:$4 sm:$0xff]  }
 0x39d   :  { %v2770_v47 = vpop.f32.mrf.mxu0  ;;  %v7911_v23 = vld [vmem:[%s12332_s9 + $0x394] ss:$28 sps:$4 sm:$0xff]   ;;  %v7919_v51 = vld [vmem:[%s12332_s9 + $0x324] ss:$28 sps:$4 sm:$0xff]  }
 0x39e   :  { %v3009_v20 = vadd.f32 %v11175_v42, %v2991_v15  ;;  %v2980_v17 = vmax.f32 %v11164_v41, %v2948_v58  ;;  %v2958_v9 = vpop.f32.mrf.mxu1  ;;  %v7867_v41 = vld [vmem:[%s12332_s9 + $0x164] ss:$28 sps:$4 sm:$0xff]   ;;  %v7913_v29 = vld [vmem:[%s12332_s9 + $0x358] ss:$28 sps:$4 sm:$0xff]   ;;  %v7924_v15 = vld [vmem:[%s12332_s9 + $0x2f0] ss:$28 sps:$4 sm:$0xff]  }
 0x39f   :  { %3853 = vmatpush1.bf16.msra.mxu0 %v7857_v11  ;;  %7625 = vmatpush3.bf16.msra.mxu1 %v7860_v57  ;;  %v2773_v0 = vpop.f32.mrf.mxu0  ;;  %v7917_v19 = vld [vmem:[%s12332_s9 + $0x320] ss:$28 sps:$4 sm:$0xff]   ;;  %v7920_v33 = vld [vmem:[%s12332_s9 + $0x328] ss:$28 sps:$4 sm:$0xff]   ;;  %v7927_v58 = vld [vmem:[%s12332_s9 + $0x2b4] ss:$28 sps:$4 sm:$0xff]  }
 0x3a0   :  { %v11409_v7 = vpack.c.bf16 %v3009_v20, %v3008_v44  ;;  %3854 = vmatprep.subr.bf16.mxu0 %v7863_v26  ;;  %7626 = vmatprep.subr.bf16.mxu1 %v12363_v56  ;;  %v7923_v11 = vld [vmem:[%s12332_s9 + $0x2ec] ss:$28 sps:$4 sm:$0xff]   ;;  %v7928_v26 = vld [vmem:[%s12332_s9 + $0x2b8] ss:$28 sps:$4 sm:$0xff]  }
 0x3a1   :  { %v2774_v42 = vpop.f32.mrf.mxu0  ;;  %v7921_v57 = vld [vmem:[%s12332_s9 + $0x2e8] ss:$28 sps:$4 sm:$0xff]   ;;  %v7934_v44 = vld [vmem:[%s12332_s9 + $0x514] ss:$28 sps:$4 sm:$0xff]   ;;  %v7940_v0 = vld [vmem:[%s12332_s9 + $0x4dc] ss:$28 sps:$4 sm:$0xff]  }
 0x3a2   :  { %v7931_v47 = vld [vmem:[%s12332_s9 + $0x50c] ss:$28 sps:$4 sm:$0xff]   ;;  %v7937_v9 = vld [vmem:[%s12332_s9 + $0x4d4] ss:$28 sps:$4 sm:$0xff]  }
 0x3a3   :  { %3855 = vmatpush1.bf16.msra.mxu0 %v7861_v18  ;;  %7627 = vmatpush3.bf16.msra.mxu1 %v7864_v13  ;;  %v2777_v60 = vpop.f32.mrf.mxu0  ;;  %v7929_v20 = vld [vmem:[%s12332_s9 + $0x508] ss:$28 sps:$4 sm:$0xff]   ;;  %v7935_v18 = vld [vmem:[%s12332_s9 + $0x4d0] ss:$28 sps:$4 sm:$0xff]   ;;  %v7938_v13 = vld [vmem:[%s12332_s9 + $0x4d8] ss:$28 sps:$4 sm:$0xff]  }
 0x3a4   :  { %v2957_v4 = vadd.f32 %v2956_v32, %v2777_v60  ;;  %3856 = vmatprep.subr.bf16.mxu0 %v7867_v41  ;;  %7628 = vmatprep.subr.bf16.mxu1 %v12363_v56  ;;  %v7925_v32 = vld [vmem:[%s12332_s9 + $0x2b0] ss:$28 sps:$4 sm:$0xff]   ;;  %v7943_v41 = vld [vmem:[%s12332_s9 + $0x49c] ss:$28 sps:$4 sm:$0xff]  }
 0x3a5   :  { %v2779_v16 = vpop.f32.mrf.mxu0  ;;  %v7941_v42 = vld [vmem:[%s12332_s9 + $0x498] ss:$28 sps:$4 sm:$0xff]   ;;  %v7944_v60 = vld [vmem:[%s12332_s9 + $0x4a0] ss:$28 sps:$4 sm:$0xff]  }
 0x3a6   :  { %v2981_v37 = vmax.f32 %v11166_v27, %v2957_v4  ;;  %v7880_v27 = vld [vmem:[%s12332_s9 + $0x38c] ss:$28 sps:$4 sm:$0xff]   ;;  %v7947_v4 = vld [vmem:[%s12332_s9 + $0x460] ss:$28 sps:$4 sm:$0xff]   ;;  %v7958_v16 = vld [vmem:[%s12332_s9 + $0x434] ss:$28 sps:$4 sm:$0xff]  }
 0x3a7   :  { %3857 = vmatpush1.bf16.msra.mxu0 %v7865_v39  ;;  %7629 = vmatpush3.bf16.msra.mxu1 %v7868_v61  ;;  %v7949_v39 = vld [vmem:[%s12332_s9 + $0x464] ss:$28 sps:$4 sm:$0xff]   ;;  %v7952_v61 = vld [vmem:[%s12332_s9 + $0x46c] ss:$28 sps:$4 sm:$0xff]  }
 0x3a8   :  { %v11435_v62 = vmax.f32 %v2980_v17, %v2981_v37  ;;  %4202 = vmatprep.subr.bf16.mxu0 %v7871_v28  ;;  %4243 = vmatprep.subr.bf16.mxu1 %v7874_v21  ;;  %v7932_v17 = vld [vmem:[%s12332_s9 + $0x510] ss:$28 sps:$4 sm:$0xff]   ;;  %v7950_v28 = vld [vmem:[%s12332_s9 + $0x468] ss:$28 sps:$4 sm:$0xff]  }
 0x3a9   :  { %v7955_v21 = vld [vmem:[%s12332_s9 + $0x42c] ss:$28 sps:$4 sm:$0xff]  }
 0x3aa   :  { %7032 = vmatmul.mubr.msk.bf16.vlgmr.msra.gmra.mxu0 %vm3282_vm4, %v11240_v25  ;;  %7631 = vmatmul.mubr.msk.bf16.vlgmr.msra.gmra.mxu1 %vm3282_vm4, %v11240_v25  ;;  %v7886_v25 = vld [vmem:[%s12332_s9 + $0x354] ss:$28 sps:$4 sm:$0xff]   ;;  %v7953_v37 = vld [vmem:[%s12332_s9 + $0x428] ss:$28 sps:$4 sm:$0xff]  }
 0x3ab   :  { %4203 = vmatpush1.bf16.msra.mxu0 %v7869_v6  ;;  %4244 = vmatpush1.bf16.msra.mxu1 %v7872_v30  ;;  %v7956_v6 = vld [vmem:[%s12332_s9 + $0x430] ss:$28 sps:$4 sm:$0xff]  }
 0x3ac   :  { %4204 = vmatprep.subr.bf16.mxu0 %v7877_v40  ;;  %4245 = vmatprep.subr.bf16.mxu1 %v7880_v27  ;;  %v7961_v30 = vld [vmem:[%s12332_s9 + $0x3f4] ss:$28 sps:$4 sm:$0xff]   ;;  %v7964_v40 = vld [vmem:[%s12332_s9 + $0x3fc] ss:$28 sps:$4 sm:$0xff]  }
 0x3ad   :  { %4230 = vmatprep.mubr.bf16.mxu0 %v8203_v63  ;;  %4271 = vmatprep.mubr.bf16.mxu1 %v8203_v63  ;;  %v7959_v27 = vld [vmem:[%s12332_s9 + $0x3f0] ss:$28 sps:$4 sm:$0xff]  }
 0x3af   :  { %4205 = vmatpush1.bf16.msra.mxu0 %v7875_v45  ;;  %4246 = vmatpush1.bf16.msra.mxu1 %v7878_v46  ;;  %v7962_v45 = vld [vmem:[%s12332_s9 + $0x3f8] ss:$28 sps:$4 sm:$0xff]  }
 0x3b0   :  { %4206 = vmatprep.subr.bf16.mxu0 %v7883_v55  ;;  %4247 = vmatprep.subr.bf16.mxu1 %v7886_v25  ;;  %v7967_v46 = vld [vmem:[%s12332_s9 + $0x51c] ss:$28 sps:$4 sm:$0xff]  }
 0x3b1   :  { %v7965_v55 = vld [vmem:[%s12332_s9 + $0x518] ss:$28 sps:$4 sm:$0xff]   ;;  %v7968_v25 = vld [vmem:[%s12332_s9 + $0x520] ss:$28 sps:$4 sm:$0xff]  }
 0x3b3   :  { %4207 = vmatpush1.bf16.msra.mxu0 %v7881_v34  ;;  %4248 = vmatpush1.bf16.msra.mxu1 %v7884_v54  ;;  %v7971_v34 = vld [vmem:[%s12332_s9 + $0x4e4] ss:$28 sps:$4 sm:$0xff]  }
 0x3b4   :  { %4208 = vmatprep.subr.bf16.mxu0 %v7889_v52  ;;  %4249 = vmatprep.subr.bf16.mxu1 %v7892_v36  ;;  %v7969_v54 = vld [vmem:[%s12332_s9 + $0x4e0] ss:$28 sps:$4 sm:$0xff]   ;;  %v7972_v52 = vld [vmem:[%s12332_s9 + $0x4e8] ss:$28 sps:$4 sm:$0xff]  }
 0x3b5   :  { %v7975_v36 = vld [vmem:[%s12332_s9 + $0x4ac] ss:$28 sps:$4 sm:$0xff]  }
 0x3b7   :  { %4209 = vmatpush1.bf16.msra.mxu0 %v7887_v59  ;;  %4250 = vmatpush1.bf16.msra.mxu1 %v7890_v14  ;;  %v7973_v59 = vld [vmem:[%s12332_s9 + $0x4a8] ss:$28 sps:$4 sm:$0xff]   ;;  %v7976_v14 = vld [vmem:[%s12332_s9 + $0x4b0] ss:$28 sps:$4 sm:$0xff]  }
 0x3b8   :  { %4210 = vmatprep.subr.bf16.mxu0 %v7895_v48  ;;  %4251 = vmatprep.subr.bf16.mxu1 %v7898_v3  ;;  %v7979_v48 = vld [vmem:[%s12332_s9 + $0x474] ss:$28 sps:$4 sm:$0xff]  }
 0x3b9   :  { %v7977_v3 = vld [vmem:[%s12332_s9 + $0x470] ss:$28 sps:$4 sm:$0xff]  }
 0x3bb   :  { %4211 = vmatpush1.bf16.msra.mxu0 %v7893_v8  ;;  %4252 = vmatpush1.bf16.msra.mxu1 %v7896_v53  ;;  %v7980_v8 = vld [vmem:[%s12332_s9 + $0x478] ss:$28 sps:$4 sm:$0xff]  }
 0x3bc   :  { %4212 = vmatprep.subr.bf16.mxu0 %v7901_v38  ;;  %4253 = vmatprep.subr.bf16.mxu1 %v7904_v24  ;;  %v7983_v53 = vld [vmem:[%s12332_s9 + $0x43c] ss:$28 sps:$4 sm:$0xff]  }
 0x3bd   :  { %v7981_v38 = vld [vmem:[%s12332_s9 + $0x438] ss:$28 sps:$4 sm:$0xff]   ;;  %v7984_v24 = vld [vmem:[%s12332_s9 + $0x440] ss:$28 sps:$4 sm:$0xff]  }
 0x3bf   :  { %4213 = vmatpush1.bf16.msra.mxu0 %v7899_v10  ;;  %4254 = vmatpush1.bf16.msra.mxu1 %v7902_v49  ;;  %v7987_v10 = vld [vmem:[%s12332_s9 + $0x404] ss:$28 sps:$4 sm:$0xff]  }
 0x3c0   :  { %4284 = vmatprep.subr.bf16.mxu0 %v7907_v43  ;;  %7634 = vmatprep.subr.bf16.mxu1 %v12363_v56  ;;  %v7985_v49 = vld [vmem:[%s12332_s9 + $0x400] ss:$28 sps:$4 sm:$0xff]   ;;  %v7988_v43 = vld [vmem:[%s12332_s9 + $0x408] ss:$28 sps:$4 sm:$0xff]  }
 0x3c2   :  { %7124 = vmatmul.mubr.msk.bf16.vlgmr.msra.gmra.mxu0 %vm3282_vm4, %v11301_v31  ;;  %7125 = vmatmul.mubr.msk.bf16.vlgmr.msra.gmra.mxu1 %vm3282_vm4, %v11301_v31 }
 0x3c3   :  { %4285 = vmatpush1.bf16.msra.mxu0 %v7905_v12  ;;  %7635 = vmatpush3.bf16.msra.mxu1 %v7908_v35  ;;  %v7991_v12 = vld [vmem:[%s12332_s9 + $0x65c] ss:$28 sps:$4 sm:$0xff]   ;;  %v7994_v35 = vld [vmem:[%s12332_s9 + $0x664] ss:$28 sps:$4 sm:$0xff]  }
 0x3c4   :  { %4286 = vmatprep.subr.bf16.mxu0 %v7911_v23  ;;  %7636 = vmatprep.subr.bf16.mxu1 %v12363_v56  ;;  %v7989_v23 = vld [vmem:[%s12332_s9 + $0x658] ss:$28 sps:$4 sm:$0xff]  }
 0x3c5   :  { %4312 = vmatprep.mubr.bf16.mxu0 %v8203_v63  ;;  %7646 = vmatprep.mubr.msk.bf16.mxu1 %vm8204_vm5, %v12363_v56 }
 0x3c7   :  { %4287 = vmatpush1.bf16.msra.mxu0 %v7909_v2  ;;  %7637 = vmatpush3.bf16.msra.mxu1 %v7912_v5  ;;  %v7992_v2 = vld [vmem:[%s12332_s9 + $0x660] ss:$28 sps:$4 sm:$0xff]  }
 0x3c8   :  { %4288 = vmatprep.subr.bf16.mxu0 %v7915_v22  ;;  %7638 = vmatprep.subr.bf16.mxu1 %v12363_v56  ;;  %v7997_v5 = vld [vmem:[%s12332_s9 + $0x624] ss:$28 sps:$4 sm:$0xff]   ;;  %v8000_v22 = vld [vmem:[%s12332_s9 + $0x62c] ss:$28 sps:$4 sm:$0xff]  }
 0x3cb   :  { %4289 = vmatpush1.bf16.msra.mxu0 %v7913_v29  ;;  %7639 = vmatpush3.bf16.msra.mxu1 %v7916_v1  ;;  %v7995_v29 = vld [vmem:[%s12332_s9 + $0x620] ss:$28 sps:$4 sm:$0xff]   ;;  %v7998_v1 = vld [vmem:[%s12332_s9 + $0x628] ss:$28 sps:$4 sm:$0xff]  }
 0x3cc   :  { %4290 = vmatprep.subr.bf16.mxu0 %v7919_v51  ;;  %7640 = vmatprep.subr.bf16.mxu1 %v12363_v56  ;;  %v8003_v51 = vld [vmem:[%s12332_s9 + $0x5ec] ss:$28 sps:$4 sm:$0xff]  }
 0x3cf   :  { %4291 = vmatpush1.bf16.msra.mxu0 %v7917_v19  ;;  %7641 = vmatpush3.bf16.msra.mxu1 %v7920_v33  ;;  %v8001_v19 = vld [vmem:[%s12332_s9 + $0x5e8] ss:$28 sps:$4 sm:$0xff]   ;;  %v8004_v33 = vld [vmem:[%s12332_s9 + $0x5f0] ss:$28 sps:$4 sm:$0xff]  }
 0x3d0   :  { %4292 = vmatprep.subr.bf16.mxu0 %v7923_v11  ;;  %7642 = vmatprep.subr.bf16.mxu1 %v12363_v56  ;;  %v8009_v11 = vld [vmem:[%s12332_s9 + $0x5b4] ss:$28 sps:$4 sm:$0xff]  }
 0x3d3   :  { %4293 = vmatpush1.bf16.msra.mxu0 %v7921_v57  ;;  %7643 = vmatpush3.bf16.msra.mxu1 %v7924_v15  ;;  %v8012_v57 = vld [vmem:[%s12332_s9 + $0x5bc] ss:$28 sps:$4 sm:$0xff]   ;;  %v8007_v15 = vld [vmem:[%s12332_s9 + $0x5b0] ss:$28 sps:$4 sm:$0xff]  }
 0x3d4   :  { %4294 = vmatprep.subr.bf16.mxu0 %v7927_v58  ;;  %7644 = vmatprep.subr.bf16.mxu1 %v12363_v56  ;;  %v8010_v58 = vld [vmem:[%s12332_s9 + $0x5b8] ss:$28 sps:$4 sm:$0xff]  }
 0x3d7   :  { %4295 = vmatpush1.bf16.msra.mxu0 %v7925_v32  ;;  %7645 = vmatpush3.bf16.msra.mxu1 %v7928_v26  ;;  %v8015_v32 = vld [vmem:[%s12332_s9 + $0x57c] ss:$28 sps:$4 sm:$0xff]   ;;  %v8018_v26 = vld [vmem:[%s12332_s9 + $0x584] ss:$28 sps:$4 sm:$0xff]  }
 0x3d8   :  { %4640 = vmatprep.subr.bf16.mxu0 %v7931_v47  ;;  %4681 = vmatprep.subr.bf16.mxu1 %v7934_v44  ;;  %v8013_v47 = vld [vmem:[%s12332_s9 + $0x578] ss:$28 sps:$4 sm:$0xff]   ;;  %v8016_v44 = vld [vmem:[%s12332_s9 + $0x580] ss:$28 sps:$4 sm:$0xff]  }
 0x3da   :  { %7126 = vmatmul.mubr.msk.bf16.vlgmr.msra.gmra.mxu0 %vm3282_vm4, %v11301_v31  ;;  %7647 = vmatmul.mubr.msk.bf16.vlgmr.msra.gmra.mxu1 %vm3282_vm4, %v11301_v31  ;;  %v7946_v31 = vld [vmem:[%s12332_s9 + $0x4a4] ss:$28 sps:$4 sm:$0xff]  }
 0x3db   :  { %4641 = vmatpush1.bf16.msra.mxu0 %v7929_v20  ;;  %4682 = vmatpush1.bf16.msra.mxu1 %v7932_v17  ;;  %v8021_v20 = vld [vmem:[%s12332_s9 + $0x544] ss:$28 sps:$4 sm:$0xff]   ;;  %v8024_v17 = vld [vmem:[%s12332_s9 + $0x54c] ss:$28 sps:$4 sm:$0xff]  }
 0x3dc   :  { %4642 = vmatprep.subr.bf16.mxu0 %v7937_v9  ;;  %4683 = vmatprep.subr.bf16.mxu1 %v7940_v0  ;;  %v8019_v9 = vld [vmem:[%s12332_s9 + $0x540] ss:$28 sps:$4 sm:$0xff]   ;;  %v8022_v0 = vld [vmem:[%s12332_s9 + $0x548] ss:$28 sps:$4 sm:$0xff]  }
 0x3dd   :  { %4668 = vmatprep.mubr.bf16.mxu0 %v8203_v63  ;;  %4709 = vmatprep.mubr.bf16.mxu1 %v8203_v63 }
 0x3df   :  { %4643 = vmatpush1.bf16.msra.mxu0 %v7935_v18  ;;  %4684 = vmatpush1.bf16.msra.mxu1 %v7938_v13  ;;  %v8027_v18 = vld [vmem:[%s12332_s9 + $0x66c] ss:$28 sps:$4 sm:$0xff]  }
 0x3e0   :  { %4644 = vmatprep.subr.bf16.mxu0 %v7943_v41  ;;  %4685 = vmatprep.subr.bf16.mxu1 %v7946_v31  ;;  %v8025_v13 = vld [vmem:[%s12332_s9 + $0x668] ss:$28 sps:$4 sm:$0xff]   ;;  %v8028_v41 = vld [vmem:[%s12332_s9 + $0x670] ss:$28 sps:$4 sm:$0xff]  }
 0x3e1   :  { %v8031_v31 = vld [vmem:[%s12332_s9 + $0x634] ss:$28 sps:$4 sm:$0xff]  }
 0x3e3   :  { %4645 = vmatpush1.bf16.msra.mxu0 %v7941_v42  ;;  %4686 = vmatpush1.bf16.msra.mxu1 %v7944_v60 }
 0x3e4   :  { %4646 = vmatprep.subr.bf16.mxu0 %v7949_v39  ;;  %4687 = vmatprep.subr.bf16.mxu1 %v7952_v61  ;;  %v8029_v39 = vld [vmem:[%s12332_s9 + $0x630] ss:$28 sps:$4 sm:$0xff]   ;;  %v8032_v61 = vld [vmem:[%s12332_s9 + $0x638] ss:$28 sps:$4 sm:$0xff]  }
 0x3e7   :  { %4647 = vmatpush1.bf16.msra.mxu0 %v7947_v4  ;;  %4688 = vmatpush1.bf16.msra.mxu1 %v7950_v28 }
 0x3e8   :  { %4648 = vmatprep.subr.bf16.mxu0 %v7955_v21  ;;  %4689 = vmatprep.subr.bf16.mxu1 %v7958_v16  ;;  %v8035_v21 = vld [vmem:[%s12332_s9 + $0x5fc] ss:$28 sps:$4 sm:$0xff]  }
 0x3eb   :  { %4649 = vmatpush1.bf16.msra.mxu0 %v7953_v37  ;;  %4690 = vmatpush1.bf16.msra.mxu1 %v7956_v6  ;;  %v8033_v6 = vld [vmem:[%s12332_s9 + $0x5f8] ss:$28 sps:$4 sm:$0xff]  }
 0x3ec   :  { %4650 = vmatprep.subr.bf16.mxu0 %v7961_v30  ;;  %4691 = vmatprep.subr.bf16.mxu1 %v7964_v40  ;;  %v8036_v30 = vld [vmem:[%s12332_s9 + $0x600] ss:$28 sps:$4 sm:$0xff]  }
 0x3ef   :  { %4651 = vmatpush1.bf16.msra.mxu0 %v7959_v27  ;;  %4692 = vmatpush1.bf16.msra.mxu1 %v7962_v45  ;;  %v8039_v45 = vld [vmem:[%s12332_s9 + $0x5c4] ss:$28 sps:$4 sm:$0xff]  }
 0x3f0   :  { %4722 = vmatprep.subr.bf16.mxu0 %v7967_v46  ;;  %7650 = vmatprep.subr.bf16.mxu1 %v12363_v56  ;;  %v8037_v46 = vld [vmem:[%s12332_s9 + $0x5c0] ss:$28 sps:$4 sm:$0xff]  }
 0x3f2   :  { %7218 = vmatmul.mubr.msk.bf16.vlgmr.msra.gmra.mxu0 %vm3282_vm4, %v11354_v50  ;;  %7219 = vmatmul.mubr.msk.bf16.vlgmr.msra.gmra.mxu1 %vm3282_vm4, %v11354_v50 }
 0x3f3   :  { %4723 = vmatpush1.bf16.msra.mxu0 %v7965_v55  ;;  %7651 = vmatpush3.bf16.msra.mxu1 %v7968_v25  ;;  %v8040_v55 = vld [vmem:[%s12332_s9 + $0x5c8] ss:$28 sps:$4 sm:$0xff]  }
 0x3f4   :  { %4724 = vmatprep.subr.bf16.mxu0 %v7971_v34  ;;  %7652 = vmatprep.subr.bf16.mxu1 %v12363_v56  ;;  %v8043_v25 = vld [vmem:[%s12332_s9 + $0x58c] ss:$28 sps:$4 sm:$0xff]  }
 0x3f5   :  { %4750 = vmatprep.mubr.bf16.mxu0 %v8203_v63  ;;  %7662 = vmatprep.mubr.msk.bf16.mxu1 %vm8204_vm5, %v12363_v56  ;;  %v8041_v34 = vld [vmem:[%s12332_s9 + $0x588] ss:$28 sps:$4 sm:$0xff]  }
 0x3f7   :  { %4725 = vmatpush1.bf16.msra.mxu0 %v7969_v54  ;;  %7653 = vmatpush3.bf16.msra.mxu1 %v7972_v52  ;;  %v8044_v54 = vld [vmem:[%s12332_s9 + $0x590] ss:$28 sps:$4 sm:$0xff]  }
 0x3f8   :  { %4726 = vmatprep.subr.bf16.mxu0 %v7975_v36  ;;  %7654 = vmatprep.subr.bf16.mxu1 %v12363_v56  ;;  %v8047_v52 = vld [vmem:[%s12332_s9 + $0x554] ss:$28 sps:$4 sm:$0xff]  }
 0x3f9   :  { %v8045_v36 = vld [vmem:[%s12332_s9 + $0x550] ss:$28 sps:$4 sm:$0xff]  }
 0x3fb   :  { %4727 = vmatpush1.bf16.msra.mxu0 %v7973_v59  ;;  %7655 = vmatpush3.bf16.msra.mxu1 %v7976_v14  ;;  %v8048_v59 = vld [vmem:[%s12332_s9 + $0x558] ss:$28 sps:$4 sm:$0xff]   ;;  %v8051_v14 = vld [vmem:[%s12332_s9 + $0x7ac] ss:$28 sps:$4 sm:$0xff]  }
 0x3fc   :  { %4728 = vmatprep.subr.bf16.mxu0 %v7979_v48  ;;  %7656 = vmatprep.subr.bf16.mxu1 %v12363_v56  ;;  %v8054_v48 = vld [vmem:[%s12332_s9 + $0x7b4] ss:$28 sps:$4 sm:$0xff]  }
 0x3ff   :  { %4729 = vmatpush1.bf16.msra.mxu0 %v7977_v3  ;;  %7657 = vmatpush3.bf16.msra.mxu1 %v7980_v8  ;;  %v8049_v3 = vld [vmem:[%s12332_s9 + $0x7a8] ss:$28 sps:$4 sm:$0xff]   ;;  %v8052_v8 = vld [vmem:[%s12332_s9 + $0x7b0] ss:$28 sps:$4 sm:$0xff]  }
 0x400   :  { %4730 = vmatprep.subr.bf16.mxu0 %v7983_v53  ;;  %7658 = vmatprep.subr.bf16.mxu1 %v12363_v56  ;;  %v8057_v53 = vld [vmem:[%s12332_s9 + $0x774] ss:$28 sps:$4 sm:$0xff]  }
 0x403   :  { %4731 = vmatpush1.bf16.msra.mxu0 %v7981_v38  ;;  %7659 = vmatpush3.bf16.msra.mxu1 %v7984_v24  ;;  %v8060_v38 = vld [vmem:[%s12332_s9 + $0x77c] ss:$28 sps:$4 sm:$0xff]  }
 0x404   :  { %4732 = vmatprep.subr.bf16.mxu0 %v7987_v10  ;;  %7660 = vmatprep.subr.bf16.mxu1 %v12363_v56 }
 0x407   :  { %4733 = vmatpush1.bf16.msra.mxu0 %v7985_v49  ;;  %7661 = vmatpush3.bf16.msra.mxu1 %v7988_v43  ;;  %v8055_v49 = vld [vmem:[%s12332_s9 + $0x770] ss:$28 sps:$4 sm:$0xff]   ;;  %v8058_v43 = vld [vmem:[%s12332_s9 + $0x778] ss:$28 sps:$4 sm:$0xff]  }
 0x408   :  { %5078 = vmatprep.subr.bf16.mxu0 %v7991_v12  ;;  %5119 = vmatprep.subr.bf16.mxu1 %v7994_v35 }
 0x40a   :  { %7220 = vmatmul.mubr.msk.bf16.vlgmr.msra.gmra.mxu0 %vm3282_vm4, %v11354_v50  ;;  %7663 = vmatmul.mubr.msk.bf16.vlgmr.msra.gmra.mxu1 %vm3282_vm4, %v11354_v50  ;;  %v8006_v50 = vld [vmem:[%s12332_s9 + $0x5f4] ss:$28 sps:$4 sm:$0xff]  }
 0x40b   :  { %5079 = vmatpush1.bf16.msra.mxu0 %v7989_v23  ;;  %5120 = vmatpush1.bf16.msra.mxu1 %v7992_v2  ;;  %v8063_v23 = vld [vmem:[%s12332_s9 + $0x73c] ss:$28 sps:$4 sm:$0xff]  }
 0x40c   :  { %5080 = vmatprep.subr.bf16.mxu0 %v7997_v5  ;;  %5121 = vmatprep.subr.bf16.mxu1 %v8000_v22  ;;  %v8061_v22 = vld [vmem:[%s12332_s9 + $0x738] ss:$28 sps:$4 sm:$0xff]  }
 0x40d   :  { %5106 = vmatprep.mubr.bf16.mxu0 %v8203_v63  ;;  %5147 = vmatprep.mubr.bf16.mxu1 %v8203_v63 }
 0x40f   :  { %5081 = vmatpush1.bf16.msra.mxu0 %v7995_v29  ;;  %5122 = vmatpush1.bf16.msra.mxu1 %v7998_v1  ;;  %v8064_v29 = vld [vmem:[%s12332_s9 + $0x740] ss:$28 sps:$4 sm:$0xff]  }
 0x410   :  { %5082 = vmatprep.subr.bf16.mxu0 %v8003_v51  ;;  %5123 = vmatprep.subr.bf16.mxu1 %v8006_v50  ;;  %v8069_v50 = vld [vmem:[%s12332_s9 + $0x704] ss:$28 sps:$4 sm:$0xff]  }
 0x413   :  { %5083 = vmatpush1.bf16.msra.mxu0 %v8001_v19  ;;  %5124 = vmatpush1.bf16.msra.mxu1 %v8004_v33  ;;  %v8072_v19 = vld [vmem:[%s12332_s9 + $0x70c] ss:$28 sps:$4 sm:$0xff]   ;;  %v8067_v33 = vld [vmem:[%s12332_s9 + $0x700] ss:$28 sps:$4 sm:$0xff]  }
 0x414   :  { %5084 = vmatprep.subr.bf16.mxu0 %v8009_v11  ;;  %5125 = vmatprep.subr.bf16.mxu1 %v8012_v57  ;;  %v8070_v11 = vld [vmem:[%s12332_s9 + $0x708] ss:$28 sps:$4 sm:$0xff]  }
 0x415   :  { %v8075_v57 = vld [vmem:[%s12332_s9 + $0x6cc] ss:$28 sps:$4 sm:$0xff]  }
 0x417   :  { %5085 = vmatpush1.bf16.msra.mxu0 %v8007_v15  ;;  %5126 = vmatpush1.bf16.msra.mxu1 %v8010_v58  ;;  %v8078_v15 = vld [vmem:[%s12332_s9 + $0x6d4] ss:$28 sps:$4 sm:$0xff]   ;;  %v8073_v58 = vld [vmem:[%s12332_s9 + $0x6c8] ss:$28 sps:$4 sm:$0xff]  }
 0x418   :  { %5086 = vmatprep.subr.bf16.mxu0 %v8015_v32  ;;  %5127 = vmatprep.subr.bf16.mxu1 %v8018_v26  ;;  %v8076_v32 = vld [vmem:[%s12332_s9 + $0x6d0] ss:$28 sps:$4 sm:$0xff]  }
 0x419   :  { %v8081_v26 = vld [vmem:[%s12332_s9 + $0x694] ss:$28 sps:$4 sm:$0xff]  }
 0x41b   :  { %5087 = vmatpush1.bf16.msra.mxu0 %v8013_v47  ;;  %5128 = vmatpush1.bf16.msra.mxu1 %v8016_v44  ;;  %v8084_v47 = vld [vmem:[%s12332_s9 + $0x69c] ss:$28 sps:$4 sm:$0xff]   ;;  %v12446_v44 = vld [vmem:[#allocation2_spill] sm:$0xff] }
 0x41c   :  { %5088 = vmatprep.subr.bf16.mxu0 %v8021_v20  ;;  %5129 = vmatprep.subr.bf16.mxu1 %v8024_v17  ;;  %v3460_v20 = vsub.s32 2, %v12446_v44  ;;  %v11950_v17 = vld [vmem:[%s12334_s10] sm:$0xff] }
 0x41f   :  { %5089 = vmatpush1.bf16.msra.mxu0 %v8019_v9  ;;  %5130 = vmatpush1.bf16.msra.mxu1 %v8022_v0  ;;  %v3464_v9 = vsub.s32 3, %v12446_v44  ;;  %v8079_v0 = vld [vmem:[%s12332_s9 + $0x690] ss:$28 sps:$4 sm:$0xff]  }
 0x420   :  { %5160 = vmatprep.subr.bf16.mxu0 %v8027_v18  ;;  %7666 = vmatprep.subr.bf16.mxu1 %v12363_v56  ;;  %v8082_v18 = vld [vmem:[%s12332_s9 + $0x698] ss:$28 sps:$4 sm:$0xff]  }
 0x422   :  { %7312 = vmatmul.mubr.msk.bf16.vlgmr.msra.gmra.mxu0 %vm3282_vm4, %v11409_v7  ;;  %7313 = vmatmul.mubr.msk.bf16.vlgmr.msra.gmra.mxu1 %vm3282_vm4, %v11409_v7  ;;  %v11810_v42 = vpop.f32.mrf.mxu0  ;;  %v11812_v60 = vpop.f32.mrf.mxu1 }
 0x423   :  { %5161 = vmatpush1.bf16.msra.mxu0 %v8025_v13  ;;  %7667 = vmatpush3.bf16.msra.mxu1 %v8028_v41  ;;  %v8201_v13 = vld [vmem:[%s12333_s8] ss:$0 sm:$0xff] }
 0x424   :  { %v11820_v4 = vpop.f32.mrf.mxu0  ;;  %v11822_v28 = vpop.f32.mrf.mxu1  ;;  %5162 = vmatprep.subr.bf16.mxu0 %v8031_v31  ;;  %7668 = vmatprep.subr.bf16.mxu1 %v12363_v56  ;;  %v3010_v41 = vadd.f32 %v8201_v13, %v11435_v62  ;;  %v8087_v31 = vld [vmem:[%s12332_s9 + $0x7bc] ss:$28 sps:$4 sm:$0xff]  }
 0x425   :  { %5188 = vmatprep.mubr.bf16.mxu0 %v8203_v63  ;;  %7678 = vmatprep.mubr.msk.bf16.mxu1 %vm8204_vm5, %v12363_v56  ;;  %v8085_v62 = vld [vmem:[%s12332_s9 + $0x7b8] ss:$28 sps:$4 sm:$0xff]  }
 0x426   :  { %v3324_v16 = vpop.f32.mrf.mxu0  ;;  %v3365_v37 = vpop.f32.mrf.mxu1 }
 0x427   :  { %5163 = vmatpush1.bf16.msra.mxu0 %v8029_v39  ;;  %7669 = vmatpush3.bf16.msra.mxu1 %v8032_v61  ;;  %v12447_v39 = vld [vmem:[#allocation4_spill] sm:$0xff]  ;;  %v12448_v16 = vld [vmem:[#allocation3_spill] sm:$0xff] }
 0x428   :  { %v3325_v40 = vpop.f32.mrf.mxu0  ;;  %v3366_v27 = vpop.f32.mrf.mxu1  ;;  %5164 = vmatprep.subr.bf16.mxu0 %v8035_v21  ;;  %7670 = vmatprep.subr.bf16.mxu1 %v12363_v56  ;;  %v3453_v61 = vrot.slane %v11950_v17, %v12447_v39  ;;  %v3461_v21 = vrot.slane %v11950_v17, %v3460_v20  ;;  %v3457_v37 = vrot.slane %v11950_v17, %v12448_v16 }
 0x429   :  { %v11978_v40 = vpack.c.bf16 %v3010_v41, %v3010_v41  ;;  %v8091_v27 = vld [vmem:[%s12332_s9 + $0x784] ss:$28 sps:$4 sm:$0xff]  }
 0x42b   :  { %5165 = vmatpush1.bf16.msra.mxu0 %v8033_v6  ;;  %7671 = vmatpush3.bf16.msra.mxu1 %v8036_v30  ;;  %v3465_v6 = vrot.slane %v11950_v17, %v3464_v9  ;;  %v8088_v30 = vld [vmem:[%s12332_s9 + $0x7c0] ss:$28 sps:$4 sm:$0xff]  }
 0x42c   :  { %5166 = vmatprep.subr.bf16.mxu0 %v8039_v45  ;;  %7672 = vmatprep.subr.bf16.mxu1 %v12363_v56  ;;  %v3485_v45 = vadd.f32 %v3453_v61, %v11810_v42  ;;  %v8089_v42 = vld [vmem:[%s12332_s9 + $0x780] ss:$28 sps:$4 sm:$0xff]  }
 0x42f   :  { %5167 = vmatpush1.bf16.msra.mxu0 %v8037_v46  ;;  %7673 = vmatpush3.bf16.msra.mxu1 %v8040_v55  ;;  %v3487_v46 = vadd.f32 %v3461_v21, %v11812_v60  ;;  %v3486_v55 = vadd.f32 %v3457_v37, %v11820_v4  ;;  %v8092_v60 = vld [vmem:[%s12332_s9 + $0x788] ss:$28 sps:$4 sm:$0xff]  }
 0x430   :  { %5168 = vmatprep.subr.bf16.mxu0 %v8043_v25  ;;  %7674 = vmatprep.subr.bf16.mxu1 %v12363_v56 }
 0x433   :  { %5169 = vmatpush1.bf16.msra.mxu0 %v8041_v34  ;;  %7675 = vmatpush3.bf16.msra.mxu1 %v8044_v54  ;;  %v3488_v54 = vadd.f32 %v3465_v6, %v11822_v28  ;;  %v8095_v28 = vld [vmem:[%s12332_s9 + $0x74c] ss:$28 sps:$4 sm:$0xff]  }
 0x434   :  { %5170 = vmatprep.subr.bf16.mxu0 %v8047_v52  ;;  %7676 = vmatprep.subr.bf16.mxu1 %v12363_v56 }
 0x437   :  { %5171 = vmatpush1.bf16.msra.mxu0 %v8045_v36  ;;  %7677 = vmatpush3.bf16.msra.mxu1 %v8048_v59 }
 0x438   :  { %5516 = vmatprep.subr.bf16.mxu0 %v8051_v14  ;;  %5557 = vmatprep.subr.bf16.mxu1 %v8054_v48 }
 0x43a   :  { %v11886_v24 = vpop.f32.mrf.mxu0  ;;  %v11888_v10 = vpop.f32.mrf.mxu1  ;;  %7314 = vmatmul.mubr.msk.bf16.vlgmr.msra.gmra.mxu0 %vm3282_vm4, %v11409_v7  ;;  %7679 = vmatmul.mubr.msk.bf16.vlgmr.msra.gmra.mxu1 %vm3282_vm4, %v11409_v7  ;;  %v8066_v7 = vld [vmem:[%s12332_s9 + $0x744] ss:$28 sps:$4 sm:$0xff]  }
 0x43b   :  { %5517 = vmatpush1.bf16.msra.mxu0 %v8049_v3  ;;  %5558 = vmatpush1.bf16.msra.mxu1 %v8052_v8 }
 0x43c   :  { %v11900_v12 = vpop.f32.mrf.mxu0  ;;  %v7616_v35 = vpop.f32.mrf.mxu1  ;;  %5518 = vmatprep.subr.bf16.mxu0 %v8057_v53  ;;  %5559 = vmatprep.subr.bf16.mxu1 %v8060_v38  ;;  %v8093_v53 = vld [vmem:[%s12332_s9 + $0x748] ss:$28 sps:$4 sm:$0xff]   ;;  %v8096_v38 = vld [vmem:[%s12332_s9 + $0x750] ss:$28 sps:$4 sm:$0xff]  }
 0x43d   :  { %5544 = vmatprep.mubr.bf16.mxu0 %v8203_v63  ;;  %5585 = vmatprep.mubr.bf16.mxu1 %v8203_v63  ;;  %v8097_v35 = vld [vmem:[%s12332_s9 + $0x710] ss:$28 sps:$4 sm:$0xff]  }
 0x43e   :  { %v3406_v2 = vpop.f32.mrf.mxu0  ;;  %v3446_v5 = vpop.f32.mrf.mxu1 }
 0x43f   :  { %5519 = vmatpush1.bf16.msra.mxu0 %v8055_v49  ;;  %5560 = vmatpush1.bf16.msra.mxu1 %v8058_v43  ;;  %v8101_v2 = vld [vmem:[%s12332_s9 + $0x6d8] ss:$28 sps:$4 sm:$0xff]   ;;  %v8104_v5 = vld [vmem:[%s12332_s9 + $0x6e0] ss:$28 sps:$4 sm:$0xff]  }
 0x440   :  { %v3407_v1 = vpop.f32.mrf.mxu0  ;;  %v7617_v51 = vpop.f32.mrf.mxu1  ;;  %5520 = vmatprep.subr.bf16.mxu0 %v8063_v23  ;;  %5561 = vmatprep.subr.bf16.mxu1 %v8066_v7  ;;  %v8100_v23 = vld [vmem:[%s12332_s9 + $0x718] ss:$28 sps:$4 sm:$0xff]  }
 0x441   :  { %v8103_v7 = vld [vmem:[%s12332_s9 + $0x6dc] ss:$28 sps:$4 sm:$0xff]   ;;  %v3476_v1 = vsub.s32 6, %v12446_v44  ;;  %v3472_v51 = vsub.s32 5, %v12446_v44 }
 0x443   :  { %5521 = vmatpush1.bf16.msra.mxu0 %v8061_v22  ;;  %5562 = vmatpush1.bf16.msra.mxu1 %v8064_v29  ;;  %v8107_v22 = vld [vmem:[%s12332_s9 + $0x6a4] ss:$28 sps:$4 sm:$0xff]   ;;  %v3468_v29 = vsub.s32 4, %v12446_v44 }
 0x444   :  { %5522 = vmatprep.subr.bf16.mxu0 %v8069_v50  ;;  %5563 = vmatprep.subr.bf16.mxu1 %v8072_v19  ;;  %v8105_v50 = vld [vmem:[%s12332_s9 + $0x6a0] ss:$28 sps:$4 sm:$0xff]   ;;  %v8108_v19 = vld [vmem:[%s12332_s9 + $0x6a8] ss:$28 sps:$4 sm:$0xff]  }
 0x447   :  { %5523 = vmatpush1.bf16.msra.mxu0 %v8067_v33  ;;  %5564 = vmatpush1.bf16.msra.mxu1 %v8070_v11  ;;  %v3469_v33 = vrot.slane %v11950_v17, %v3468_v29  ;;  %v3477_v11 = vrot.slane %v11950_v17, %v3476_v1  ;;  %v8127_v29 = vld [vmem:[%s12335_s11 + $0x18] sm:$0xff]  }
 0x448   :  { %5524 = vmatprep.subr.bf16.mxu0 %v8075_v57  ;;  %5565 = vmatprep.subr.bf16.mxu1 %v8078_v15  ;;  %v3473_v57 = vrot.slane %v11950_v17, %v3472_v51  ;;  %v8128_v1 = vld [vmem:[%s12335_s11 + $0x98] sm:$0xff]   ;;  %v8129_v51 = vld [vmem:[%s12335_s11 + $0x50] sm:$0xff]  }
 0x449   :  { %v3489_v15 = vadd.f32 %v3469_v33, %v11886_v24 }
 0x44b   :  { %5525 = vmatpush1.bf16.msra.mxu0 %v8073_v58  ;;  %5566 = vmatpush1.bf16.msra.mxu1 %v8076_v32  ;;  %v3491_v58 = vadd.f32 %v3477_v11, %v11888_v10  ;;  %v8131_v11 = vld [vmem:[%s12335_s11 + $0x10] sm:$0xff]  }
 0x44c   :  { %5526 = vmatprep.subr.bf16.mxu0 %v8081_v26  ;;  %5567 = vmatprep.subr.bf16.mxu1 %v8084_v47  ;;  %v3490_v47 = vadd.f32 %v3473_v57, %v11900_v12 }
 0x44f   :  { %5527 = vmatpush1.bf16.msra.mxu0 %v8079_v0  ;;  %5568 = vmatpush1.bf16.msra.mxu1 %v8082_v18 }
 0x450   :  { %5598 = vmatprep.subr.bf16.mxu0 %v8087_v31  ;;  %7682 = vmatprep.subr.bf16.mxu1 %v12363_v56 }
 0x452   :  { %v3794_v25 = vpop.f32.mrf.mxu0  ;;  %v3835_v34 = vpop.f32.mrf.mxu1  ;;  %7406 = vmatmul.mubr.msk.bf16.vlgmr.msra.gmra.mxu0 %vm3282_vm4, %v11978_v40  ;;  %7407 = vmatmul.mubr.msk.bf16.vlgmr.msra.gmra.mxu1 %vm3282_vm4, %v11978_v40 }
 0x453   :  { %v11992_v52 = vadd.f32 %v3794_v25, %v3485_v45  ;;  %v11994_v36 = vadd.f32 %v3835_v34, %v3487_v46  ;;  %5599 = vmatpush1.bf16.msra.mxu0 %v8085_v62  ;;  %7683 = vmatpush3.bf16.msra.mxu1 %v8088_v30 }
 0x454   :  { %v3796_v4 = vpop.f32.mrf.mxu0  ;;  %v3837_v59 = vpop.f32.mrf.mxu1  ;;  %5600 = vmatprep.subr.bf16.mxu0 %v8091_v27  ;;  %7684 = vmatprep.subr.bf16.mxu1 %v12363_v56 }
 0x455   :  { %v12006_v14 = vadd.f32 %v3796_v4, %v3486_v55  ;;  %v12008_v48 = vadd.f32 %v3837_v59, %v3488_v54  ;;  %5626 = vmatprep.mubr.bf16.mxu0 %v8203_v63  ;;  %7694 = vmatprep.mubr.msk.bf16.mxu1 %vm8204_vm5, %v12363_v56  ;;  %v8099_v63 = vld [vmem:[%s12332_s9 + $0x714] ss:$28 sps:$4 sm:$0xff]   ;;  %v8109_v54 = vld [vmem:[%s12335_s11 + $0x78] sm:$0xff]  }
 0x456   :  { %v3798_v3 = vpop.f32.mrf.mxu0  ;;  %v3839_v8 = vpop.f32.mrf.mxu1  ;;  %v8111_v4 = vld [vmem:[%s12335_s11 + $0x38] sm:$0xff]  }
 0x457   :  { %5601 = vmatpush1.bf16.msra.mxu0 %v8089_v42  ;;  %7685 = vmatpush3.bf16.msra.mxu1 %v8092_v60  ;;  %v8112_v59 = vld [vmem:[%s12335_s11 + $0xb8] sm:$0xff]   ;;  %v8114_v3 = vld [vmem:[%s12335_s11 + $0xf0] sm:$0xff]  }
 0x458   :  { %v3799_v49 = vpop.f32.mrf.mxu0  ;;  %v3840_v43 = vpop.f32.mrf.mxu1  ;;  %5602 = vmatprep.subr.bf16.mxu0 %v8095_v28  ;;  %7686 = vmatprep.subr.bf16.mxu1 %v12363_v56  ;;  %v8115_v8 = vld [vmem:[%s12335_s11 + $0x30] sm:$0xff]  }
 0x459   :  { %v8118_v49 = vld [vmem:[%s12335_s11 + $0xe8] sm:$0xff]  }
 0x45a   :  { %v8119_v43 = vld [vmem:[%s12335_s11 + $0x28] sm:$0xff]  }
 0x45b   :  { %5603 = vmatpush1.bf16.msra.mxu0 %v8093_v53  ;;  %7687 = vmatpush3.bf16.msra.mxu1 %v8096_v38  ;;  %v8116_v53 = vld [vmem:[%s12335_s11 + $0xb0] sm:$0xff]   ;;  %v8117_v38 = vld [vmem:[%s12335_s11 + $0x68] sm:$0xff]  }
 0x45c   :  { %5604 = vmatprep.subr.bf16.mxu0 %v8099_v63  ;;  %7688 = vmatprep.subr.bf16.mxu1 %v12363_v56  ;;  %v8120_v63 = vld [vmem:[%s12335_s11 + $0xa8] sm:$0xff]  }
 0x45f   :  { %5605 = vmatpush1.bf16.msra.mxu0 %v8097_v35  ;;  %7689 = vmatpush3.bf16.msra.mxu1 %v8100_v23  ;;  %v8121_v35 = vld [vmem:[%s12335_s11 + $0x60] sm:$0xff]  }
 0x460   :  { %5606 = vmatprep.subr.bf16.mxu0 %v8103_v7  ;;  %7690 = vmatprep.subr.bf16.mxu1 %v12363_v56  ;;  %v8122_v23 = vld [vmem:[%s12335_s11 + $0xe0] sm:$0xff]  }
 0x461   :  { %v8123_v7 = vld [vmem:[%s12335_s11 + $0x20] sm:$0xff]  }
 0x463   :  { %5607 = vmatpush1.bf16.msra.mxu0 %v8101_v2  ;;  %7691 = vmatpush3.bf16.msra.mxu1 %v8104_v5  ;;  %v8124_v2 = vld [vmem:[%s12335_s11 + $0xa0] sm:$0xff]   ;;  %v8125_v5 = vld [vmem:[%s12335_s11 + $0x58] sm:$0xff]  }
 0x464   :  { %5608 = vmatprep.subr.bf16.mxu0 %v8107_v22  ;;  %7692 = vmatprep.subr.bf16.mxu1 %v12363_v56  ;;  %v8126_v22 = vld [vmem:[%s12335_s11 + $0xd8] sm:$0xff]  }
 0x467   :  { %5609 = vmatpush1.bf16.msra.mxu0 %v8105_v50  ;;  %7693 = vmatpush3.bf16.msra.mxu1 %v8108_v19  ;;  %v8130_v50 = vld [vmem:[%s12335_s11 + $0xd0] sm:$0xff]  }
 0x468   :  { %7518 = vmatprep.subr.bf16.mxu0 %v8109_v54 }
 0x46a   :  { %v3876_v32 = vpop.f32.mrf.mxu0  ;;  %v3917_v26 = vpop.f32.mrf.mxu1  ;;  %7408 = vmatmul.mubr.msk.bf16.vlgmr.msra.gmra.mxu0 %vm3282_vm4, %v11978_v40  ;;  %7695 = vmatmul.mubr.msk.bf16.vlgmr.msra.gmra.mxu1 %vm3282_vm4, %v11978_v40 }
 0x46b   :  { %v3927_v44 = vadd.f32 %v3876_v32, %v3489_v15  ;;  %v3929_v20 = vadd.f32 %v3917_v26, %v3491_v58  ;;  %7519 = vmatpush3.bf16.msra.mxu0 %v8111_v4  ;;  %v8132_v58 = vld [vmem:[%s12335_s11 + $0x90] sm:$0xff]  }
 0x46c   :  { %v3878_v9 = vpop.f32.mrf.mxu0  ;;  %v7632_v17 = vpop.f32.mrf.mxu1 }
 0x46d   :  { %v3928_v0 = vadd.f32 %v3878_v9, %v3490_v47  ;;  %v8133_v47 = vld [vmem:[%s12335_s11 + $0x48] sm:$0xff]  }
 0x46e   :  { %v3880_v18 = vpop.f32.mrf.mxu0  ;;  %v3920_v13 = vpop.f32.mrf.mxu1  ;;  %v8134_v9 = vld [vmem:[%s12335_s11 + $0xc8] sm:$0xff]  }
 0x46f   :  { %v8135_v18 = vld [vmem:[%s12335_s11 + $0x8] sm:$0xff]  }
 0x470   :  { %v3881_v24 = vpop.f32.mrf.mxu0  ;;  %v7633_v41 = vpop.f32.mrf.mxu1  ;;  %v8136_v13 = vld [vmem:[%s12335_s11 + $0x88] sm:$0xff]  }
 0x482   :  { %v4232_v10 = vpop.f32.mrf.mxu0  ;;  %v4273_v31 = vpop.f32.mrf.mxu1 }
 0x483   :  { %v12064_v39 = vadd.f32 %v4232_v10, %v11992_v52  ;;  %v12067_v61 = vadd.f32 %v4273_v31, %v11994_v36  ;;  %v8110_v36 = vld [vmem:[%s12335_s11 + $0xf8] sm:$0xff]   ;;  %v8137_v10 = vld [vmem:[%s12335_s11 + $0x40] sm:$0xff]  }
 0x484   :  { %v4234_v21 = vpop.f32.mrf.mxu0  ;;  %v4275_v16 = vpop.f32.mrf.mxu1  ;;  %7540 = vmatprep.subr.bf16.mxu1 %v8110_v36  ;;  %v8138_v31 = vld [vmem:[%s12335_s11 + $0xc0] sm:$0xff]  }
 0x485   :  { %v12070_v12 = vadd.f32 %v4234_v21, %v12006_v14  ;;  %v12073_v37 = vadd.f32 %v4275_v16, %v12008_v48  ;;  %v8113_v48 = vld [vmem:[%s12335_s11 + $0x70] sm:$0xff]   ;;  %7541 = vmatpush3.bf16.msra.mxu1 %v8112_v59  ;;  %v8141_v21 = vld [vmem:[%s12335_s11 + $0x178] sm:$0xff]  }
 0x486   :  { %v4236_v6 = vpop.f32.mrf.mxu0  ;;  %v4277_v62 = vpop.f32.mrf.mxu1  ;;  %7520 = vmatprep.subr.bf16.mxu0 %v8113_v48  ;;  %7542 = vmatprep.subr.bf16.mxu1 %v8114_v3 }
 0x487   :  { %7521 = vmatpush3.bf16.msra.mxu0 %v8115_v8 }
 0x488   :  { %v4237_v30 = vpop.f32.mrf.mxu0  ;;  %v4278_v40 = vpop.f32.mrf.mxu1  ;;  %7522 = vmatprep.subr.bf16.mxu0 %v8117_v38 }
 0x489   :  { %7543 = vmatpush3.bf16.msra.mxu1 %v8116_v53 }
 0x48a   :  { %7544 = vmatprep.subr.bf16.mxu1 %v8118_v49 }
 0x48b   :  { %7523 = vmatpush3.bf16.msra.mxu0 %v8119_v43 }
 0x48c   :  { %7524 = vmatprep.subr.bf16.mxu0 %v8121_v35 }
 0x48d   :  { %7545 = vmatpush3.bf16.msra.mxu1 %v8120_v63 }
 0x48e   :  { %7546 = vmatprep.subr.bf16.mxu1 %v8122_v23 }
 0x48f   :  { %7525 = vmatpush3.bf16.msra.mxu0 %v8123_v7 }
 0x490   :  { %7526 = vmatprep.subr.bf16.mxu0 %v8125_v5 }
 0x491   :  { %7547 = vmatpush3.bf16.msra.mxu1 %v8124_v2 }
 0x492   :  { %7548 = vmatprep.subr.bf16.mxu1 %v8126_v22 }
 0x493   :  { %7527 = vmatpush3.bf16.msra.mxu0 %v8127_v29 }
 0x494   :  { %7528 = vmatprep.subr.bf16.mxu0 %v8129_v51 }
 0x495   :  { %7549 = vmatpush3.bf16.msra.mxu1 %v8128_v1 }
 0x496   :  { %7550 = vmatprep.subr.bf16.mxu1 %v8130_v50 }
 0x497   :  { %7529 = vmatpush3.bf16.msra.mxu0 %v8131_v11 }
 0x498   :  { %7530 = vmatprep.subr.bf16.mxu0 %v8133_v47 }
 0x499   :  { %7551 = vmatpush3.bf16.msra.mxu1 %v8132_v58 }
 0x49a   :  { %v4314_v27 = vpop.f32.mrf.mxu0  ;;  %v4355_v45 = vpop.f32.mrf.mxu1  ;;  %7552 = vmatprep.subr.bf16.mxu1 %v8134_v9 }
 0x49b   :  { %v12075_v46 = vadd.f32 %v4314_v27, %v3927_v44  ;;  %v12077_v55 = vadd.f32 %v4355_v45, %v3929_v20  ;;  %7531 = vmatpush3.bf16.msra.mxu0 %v8135_v18 }
 0x49c   :  { %v4316_v25 = vpop.f32.mrf.mxu0  ;;  %v7648_v34 = vpop.f32.mrf.mxu1  ;;  %7532 = vmatprep.subr.bf16.mxu0 %v8137_v10 }
 0x49d   :  { %v12082_v52 = vadd.f32 %v4316_v25, %v3928_v0  ;;  %7553 = vmatpush3.bf16.msra.mxu1 %v8136_v13 }
 0x49e   :  { %v4318_v42 = vpop.f32.mrf.mxu0  ;;  %v4358_v60 = vpop.f32.mrf.mxu1  ;;  %7554 = vmatprep.subr.bf16.mxu1 %v8138_v31 }
 0x4a0   :  { %v4319_v28 = vpop.f32.mrf.mxu0  ;;  %v7649_v14 = vpop.f32.mrf.mxu1 }
 0x4b2   :  { %v4670_v19 = vpop.f32.mrf.mxu0  ;;  %v4711_v33 = vpop.f32.mrf.mxu1 }
 0x4b3   :  { %v4799_v57 = vadd.f32 %v4670_v19, %v12064_v39  ;;  %v4801_v15 = vadd.f32 %v4711_v33, %v12067_v61  ;;  %v8139_v39 = vld [vmem:[%s12335_s11] sm:$0xff]  }
 0x4b4   :  { %v4672_v32 = vpop.f32.mrf.mxu0  ;;  %v4713_v26 = vpop.f32.mrf.mxu1  ;;  %v8140_v61 = vld [vmem:[%s12335_s11 + $0x80] sm:$0xff]   ;;  %7533 = vmatpush3.bf16.msra.mxu0 %v8139_v39 }
 0x4b5   :  { %v4800_v44 = vadd.f32 %v4672_v32, %v12070_v12  ;;  %v4802_v20 = vadd.f32 %v4713_v26, %v12073_v37  ;;  %7555 = vmatpush3.bf16.msra.mxu1 %v8140_v61  ;;  %7562 = vmatprep.subr.bf16.mxu0 %v8141_v21 }
 0x4b6   :  { %v4674_v17 = vpop.f32.mrf.mxu0  ;;  %v4715_v0 = vpop.f32.mrf.mxu1  ;;  %7698 = vmatprep.subr.bf16.mxu1 %v12363_v56 }
 0x4b8   :  { %v4675_v24 = vpop.f32.mrf.mxu0  ;;  %v4716_v41 = vpop.f32.mrf.mxu1 }
 0x4ca   :  { %v4752_v16 = vpop.f32.mrf.mxu0  ;;  %v4793_v12 = vpop.f32.mrf.mxu1 }
 0x4cb   :  { %v4803_v37 = vadd.f32 %v4752_v16, %v12075_v46  ;;  %v4805_v6 = vadd.f32 %v4793_v12, %v12077_v55 }
 0x4cc   :  { %v4754_v62 = vpop.f32.mrf.mxu0  ;;  %v7664_v30 = vpop.f32.mrf.mxu1 }
 0x4cd   :  { %v12188_v40 = vadd.f32 %v4754_v62, %v12082_v52 }
 0x4ce   :  { %v4756_v27 = vpop.f32.mrf.mxu0  ;;  %v4796_v45 = vpop.f32.mrf.mxu1 }
 0x4d0   :  { %v4757_v25 = vpop.f32.mrf.mxu0  ;;  %v7665_v34 = vpop.f32.mrf.mxu1 }
 0x4e2   :  { %v5108_v54 = vpop.f32.mrf.mxu0  ;;  %v5149_v36 = vpop.f32.mrf.mxu1 }
 0x4e3   :  { %v5237_v49 = vadd.f32 %v5108_v54, %v4799_v57  ;;  %v5239_v43 = vadd.f32 %v5149_v36, %v4801_v15 }
 0x4e4   :  { %v5110_v42 = vpop.f32.mrf.mxu0  ;;  %v5151_v60 = vpop.f32.mrf.mxu1 }
 0x4e5   :  { %v5238_v23 = vadd.f32 %v5110_v42, %v4800_v44  ;;  %v5240_v7 = vadd.f32 %v5151_v60, %v4802_v20 }
 0x4e6   :  { %v5112_v4 = vpop.f32.mrf.mxu0  ;;  %v5153_v59 = vpop.f32.mrf.mxu1 }
 0x4e8   :  { %v5113_v28 = vpop.f32.mrf.mxu0  ;;  %v5154_v14 = vpop.f32.mrf.mxu1 }
 0x4fa   :  { %v5190_v46 = vpop.f32.mrf.mxu0  ;;  %v5231_v48 = vpop.f32.mrf.mxu1 }
 0x4fb   :  { %v5241_v41 = vadd.f32 %v5190_v46, %v4803_v37  ;;  %v5243_v10 = vadd.f32 %v5231_v48, %v4805_v6 }
 0x4fc   :  { %v5192_v55 = vpop.f32.mrf.mxu0  ;;  %v7680_v3 = vpop.f32.mrf.mxu1 }
 0x4fd   :  { %v5242_v16 = vadd.f32 %v5192_v55, %v12188_v40 }
 0x4fe   :  { %v5194_v8 = vpop.f32.mrf.mxu0  ;;  %v5234_v53 = vpop.f32.mrf.mxu1 }
 0x500   :  { %v5195_v52 = vpop.f32.mrf.mxu0  ;;  %v7681_v38 = vpop.f32.mrf.mxu1 }
 0x501   :  { %v8142_v52 = vld [vmem:[%s12335_s11 + $0x138] sm:$0xff]  }
 0x512   :  { %v5546_v63 = vpop.f32.mrf.mxu0  ;;  %v5587_v35 = vpop.f32.mrf.mxu1 }
 0x513   :  { %v5675_v2 = vadd.f32 %v5546_v63, %v5237_v49  ;;  %v5677_v5 = vadd.f32 %v5587_v35, %v5239_v43  ;;  %v8143_v43 = vld [vmem:[%s12335_s11 + $0x1b8] sm:$0xff]   ;;  %v8144_v63 = vld [vmem:[%s12335_s11 + $0x170] sm:$0xff]  }
 0x514   :  { %v5548_v22 = vpop.f32.mrf.mxu0  ;;  %v5589_v29 = vpop.f32.mrf.mxu1 }
 0x515   :  { %v5682_v1 = vsub.f32 0.0, %v5675_v2  ;;  %v5684_v51 = vsub.f32 0.0, %v5677_v5  ;;  %v5676_v50 = vadd.f32 %v5548_v22, %v5238_v23  ;;  %v5678_v19 = vadd.f32 %v5589_v29, %v5240_v7  ;;  %v8145_v23 = vld [vmem:[%s12335_s11 + $0x130] sm:$0xff]  }
 0x516   :  { %v5550_v33 = vpop.f32.mrf.mxu0  ;;  %v5591_v11 = vpop.f32.mrf.mxu1 }
 0x517   :  { %v5689_v58 = vmul.f32 1.442695, %v5682_v1  ;;  %v5693_v32 = vmul.f32 1.442695, %v5684_v51  ;;  %v5683_v26 = vsub.f32 0.0, %v5676_v50  ;;  %v5685_v47 = vsub.f32 0.0, %v5678_v19 }
 0x518   :  { %v5551_v57 = vpop.f32.mrf.mxu0  ;;  %v5592_v15 = vpop.f32.mrf.mxu1  ;;  %v8148_v51 = vld [vmem:[%s12335_s11 + $0x128] sm:$0xff]   ;;  %v8150_v33 = vld [vmem:[%s12335_s11 + $0x160] sm:$0xff]  }
 0x519   :  { %8173 = vpow2.f32 %v5689_v58  ;;  %v5691_v9 = vmul.f32 1.442695, %v5683_v26  ;;  %v5695_v44 = vmul.f32 1.442695, %v5685_v47  ;;  %v8151_v58 = vld [vmem:[%s12335_s11 + $0x120] sm:$0xff]   ;;  %v8153_v26 = vld [vmem:[%s12335_s11 + $0x158] sm:$0xff]  }
 0x51a   :  { %8175 = vpow2.f32 %v5693_v32  ;;  %v8152_v32 = vld [vmem:[%s12335_s11 + $0x1a0] sm:$0xff]   ;;  %v8154_v47 = vld [vmem:[%s12335_s11 + $0x118] sm:$0xff]   ;;  %v8156_v15 = vld [vmem:[%s12335_s11 + $0x150] sm:$0xff]  }
 0x51b   :  { %8177 = vpow2.f32 %v5691_v9  ;;  %v8155_v57 = vld [vmem:[%s12335_s11 + $0x198] sm:$0xff]   ;;  %v8157_v9 = vld [vmem:[%s12335_s11 + $0x110] sm:$0xff]  }
 0x51c   :  { %8179 = vpow2.f32 %v5695_v44 }
 0x526   :  { %v8174_v20 = vpop.eup %8173 }
 0x527   :  { %v8176_v17 = vpop.eup %8175  ;;  %v5703_v0 = vadd.f32 1.0, %v8174_v20  ;;  %v8158_v20 = vld [vmem:[%s12335_s11 + $0x190] sm:$0xff]  }
 0x528   :  { %v8178_v18 = vpop.eup %8177  ;;  %v5705_v13 = vadd.f32 1.0, %v8176_v17  ;;  %v8159_v17 = vld [vmem:[%s12335_s11 + $0x148] sm:$0xff]  }
 0x529   :  { %v8180_v24 = vpop.eup %8179  ;;  %8181 = vrcp.f32 %v5703_v0  ;;  %v5704_v31 = vadd.f32 1.0, %v8178_v18 }
 0x52a   :  { %8183 = vrcp.f32 %v5705_v13  ;;  %v5706_v39 = vadd.f32 1.0, %v8180_v24  ;;  %v5628_v61 = vpop.f32.mrf.mxu0  ;;  %v5669_v21 = vpop.f32.mrf.mxu1  ;;  %v8160_v13 = vld [vmem:[%s12335_s11 + $0x108] sm:$0xff]  }
 0x52b   :  { %8185 = vrcp.f32 %v5704_v31  ;;  %v12191_v12 = vadd.f32 %v5628_v61, %v5241_v41  ;;  %v12193_v62 = vadd.f32 %v5669_v21, %v5243_v10  ;;  %v8161_v24 = vld [vmem:[%s12335_s11 + $0x188] sm:$0xff]   ;;  %v8162_v41 = vld [vmem:[%s12335_s11 + $0x140] sm:$0xff]  }
 0x52c   :  { %8187 = vrcp.f32 %v5706_v39  ;;  %v5630_v30 = vpop.f32.mrf.mxu0  ;;  %v7696_v27 = vpop.f32.mrf.mxu1  ;;  %v8163_v39 = vld [vmem:[%s12335_s11 + $0x100] sm:$0xff]  }
 0x52d   :  { %v5686_v45 = vsub.f32 0.0, %v12191_v12  ;;  %v5688_v37 = vsub.f32 0.0, %v12193_v62  ;;  %v12197_v6 = vadd.f32 %v5630_v30, %v5242_v16  ;;  %v8164_v21 = vld [vmem:[%s12335_s11 + $0x180] sm:$0xff]  }
 0x52e   :  { %v5632_v25 = vpop.f32.mrf.mxu0  ;;  %v5672_v34 = vpop.f32.mrf.mxu1 }
 0x52f   :  { %v5687_v54 = vsub.f32 0.0, %v12197_v6  ;;  %v5697_v36 = vmul.f32 1.442695, %v5686_v45  ;;  %v5701_v60 = vmul.f32 1.442695, %v5688_v37  ;;  %v8167_v45 = vld [vmem:[%s12336_s13 + $0x28] sm:$0xff]  }
 0x530   :  { %v5633_v40 = vpop.f32.mrf.mxu0  ;;  %v7697_v42 = vpop.f32.mrf.mxu1  ;;  %v8168_v37 = vld [vmem:[%s12336_s13 + $0x20] sm:$0xff]   ;;  %v8170_v25 = vld [vmem:[%s12336_s13 + $0x10] sm:$0xff]   ;;  %v8171_v34 = vld [vmem:[%s12336_s13 + $0x8] sm:$0xff]  }
 0x531   :  { %v5699_v4 = vmul.f32 1.442695, %v5687_v54  ;;  %v8172_v54 = vld [vmem:[%s12336_s13] sm:$0xff]  }
 0x533   :  { %8189 = vpow2.f32 %v5699_v4 }
 0x534   :  { %8191 = vpow2.f32 %v5697_v36 }
 0x535   :  { %8193 = vpow2.f32 %v5701_v60 }
 0x536   :  { %v8182_v59 = vpop.eup %8181 }
 0x537   :  { %v8184_v28 = vpop.eup %8183  ;;  %v5724_v46 = vmul.f32 %v8182_v59, %v5675_v2  ;;  %v8146_v2 = vld [vmem:[%s12335_s11 + $0x1b0] sm:$0xff]  }
 0x538   :  { %v8186_v14 = vpop.eup %8185  ;;  %v5726_v55 = vmul.f32 %v8184_v28, %v5677_v5  ;;  %v8147_v5 = vld [vmem:[%s12335_s11 + $0x168] sm:$0xff]  }
 0x539   :  { %v8188_v48 = vpop.eup %8187  ;;  %v5725_v3 = vmul.f32 %v8186_v14, %v5676_v50  ;;  %v5731_v38 = vpack.c.bf16 %v5724_v46, %v5724_v46 }
 0x53a   :  { %v5727_v8 = vmul.f32 %v8188_v48, %v5678_v19  ;;  %v5733_v35 = vpack.c.bf16 %v5726_v55, %v5726_v55  ;;  %v8149_v19 = vld [vmem:[%s12335_s11 + $0x1a8] sm:$0xff]   ;;  %v7410_v48 = vld [vmem:[%s12337_s12] ss:$0 sm:$0xff] }
 0x53b   :  { %v5732_v53 = vpack.c.bf16 %v5725_v3, %v5725_v3 }
 0x53c   :  { %v5734_v49 = vpack.c.bf16 %v5727_v8, %v5727_v8 }
 0x53d   :  { %6225 = vmatprep.mubr.bf16.mxu0 %v5732_v53 }
 0x53e   :  { %6265 = vmatprep.mubr.bf16.mxu1 %v5734_v49  ;;  %6226 = vmatmul.mubr.bf16.vlgmr.msra.gmra.mxu0 %v5731_v38 }
 0x53f   :  { %6266 = vmatmul.mubr.bf16.vlgmr.msra.gmra.mxu1 %v5733_v35  ;;  %7563 = vmatpush3.bf16.msra.mxu0 %v8142_v52 }
 0x540   :  { %v8190_v7 = vpop.eup %8189  ;;  %7699 = vmatpush3.bf16.msra.mxu1 %v8143_v43  ;;  %7564 = vmatprep.subr.bf16.mxu0 %v8144_v63 }
 0x541   :  { %v8192_v22 = vpop.eup %8191  ;;  %v5708_v29 = vadd.f32 1.0, %v8190_v7  ;;  %7700 = vmatprep.subr.bf16.mxu1 %v12363_v56  ;;  %7714 = vmatprep.mubr.msk.bf16.mxu1 %vm8204_vm5, %v12363_v56 }
 0x542   :  { %v8194_v1 = vpop.eup %8193  ;;  %v5707_v50 = vadd.f32 1.0, %v8192_v22 }
 0x543   :  { %8195 = vrcp.f32 %v5708_v29  ;;  %7565 = vmatpush3.bf16.msra.mxu0 %v8145_v23  ;;  %v5709_v11 = vadd.f32 1.0, %v8194_v1  ;;  %v7467_v29 = vld [vmem:[%s12338_s14] ss:$0 sm:$0xff] }
 0x544   :  { %7701 = vmatpush3.bf16.msra.mxu1 %v8146_v2  ;;  %7566 = vmatprep.subr.bf16.mxu0 %v8147_v5  ;;  %8197 = vrcp.f32 %v5707_v50 }
 0x545   :  { %7702 = vmatprep.subr.bf16.mxu1 %v12363_v56  ;;  %8199 = vrcp.f32 %v5709_v11 }
 0x547   :  { %7567 = vmatpush3.bf16.msra.mxu0 %v8148_v51 }
 0x548   :  { %7703 = vmatpush3.bf16.msra.mxu1 %v8149_v19  ;;  %7568 = vmatprep.subr.bf16.mxu0 %v8150_v33 }
 0x549   :  { %7704 = vmatprep.subr.bf16.mxu1 %v12363_v56 }
 0x54b   :  { %7569 = vmatpush3.bf16.msra.mxu0 %v8151_v58 }
 0x54c   :  { %7705 = vmatpush3.bf16.msra.mxu1 %v8152_v32  ;;  %7570 = vmatprep.subr.bf16.mxu0 %v8153_v26 }
 0x54d   :  { %7706 = vmatprep.subr.bf16.mxu1 %v12363_v56 }
 0x54f   :  { %7571 = vmatpush3.bf16.msra.mxu0 %v8154_v47 }
 0x550   :  { %v8196_v44 = vpop.eup %8195  ;;  %7707 = vmatpush3.bf16.msra.mxu1 %v8155_v57  ;;  %7572 = vmatprep.subr.bf16.mxu0 %v8156_v15 }
 0x551   :  { %v5729_v0 = vmul.f32 %v8196_v44, %v12197_v6  ;;  %7708 = vmatprep.subr.bf16.mxu1 %v12363_v56  ;;  %v8198_v10 = vpop.eup %8197  ;;  %v8169_v6 = vld [vmem:[%s12336_s13 + $0x18] sm:$0xff]  }
 0x552   :  { %v8200_v31 = vpop.eup %8199  ;;  %v5728_v61 = vmul.f32 %v8198_v10, %v12191_v12  ;;  %v8165_v12 = vld [vmem:[%s12336_s13 + $0x38] sm:$0xff]  }
 0x553   :  { %v5736_v18 = vpack.c.bf16 %v5729_v0, %v5729_v0  ;;  %7573 = vmatpush3.bf16.msra.mxu0 %v8157_v9  ;;  %v5730_v16 = vmul.f32 %v8200_v31, %v12193_v62  ;;  %v8166_v62 = vld [vmem:[%s12336_s13 + $0x30] sm:$0xff]  }
 0x554   :  { %7709 = vmatpush3.bf16.msra.mxu1 %v8158_v20  ;;  %7574 = vmatprep.subr.bf16.mxu0 %v8159_v17  ;;  %v5735_v30 = vpack.c.bf16 %v5728_v61, %v5728_v61 }
 0x555   :  { %6305 = vmatprep.mubr.bf16.mxu0 %v5736_v18  ;;  %7710 = vmatprep.subr.bf16.mxu1 %v12363_v56  ;;  %v5737_v27 = vpack.c.bf16 %v5730_v16, %v5730_v16 }
 0x557   :  { %7575 = vmatpush3.bf16.msra.mxu0 %v8160_v13 }
 0x558   :  { %7711 = vmatpush3.bf16.msra.mxu1 %v8161_v24  ;;  %7576 = vmatprep.subr.bf16.mxu0 %v8162_v41 }
 0x559   :  { %7712 = vmatprep.subr.bf16.mxu1 %v12363_v56 }
 0x55b   :  { %7577 = vmatpush3.bf16.msra.mxu0 %v8163_v39 }
 0x55c   :  { %7713 = vmatpush3.bf16.msra.mxu1 %v8164_v21  ;;  %7718 = vmatprep.subr.bf16.mxu0 %v12363_v56 }
 0x55e   :  { %6306 = vmatmul.mubr.bf16.vlgmr.msra.gmra.mxu0 %v5735_v30 }
 0x55f   :  { %7715 = vmatmul.mubr.bf16.vlgmr.msra.gmra.mxu1 %v5737_v27  ;;  %7734 = vmatprep.mubr.msk.bf16.mxu0 %vm8204_vm5, %v12363_v56 }
 0x560   :  { %7719 = vmatpush3.bf16.msra.mxu0 %v8165_v12 }
 0x561   :  { %7720 = vmatprep.subr.bf16.mxu0 %v12363_v56 }
 0x564   :  { %7721 = vmatpush3.bf16.msra.mxu0 %v8166_v62 }
 0x565   :  { %7722 = vmatprep.subr.bf16.mxu0 %v12363_v56 }
 0x568   :  { %7723 = vmatpush3.bf16.msra.mxu0 %v8167_v45 }
 0x569   :  { %7724 = vmatprep.subr.bf16.mxu0 %v12363_v56 }
 0x56c   :  { %7725 = vmatpush3.bf16.msra.mxu0 %v8168_v37 }
 0x56d   :  { %7726 = vmatprep.subr.bf16.mxu0 %v12363_v56 }
 0x570   :  { %7727 = vmatpush3.bf16.msra.mxu0 %v8169_v6 }
 0x571   :  { %7728 = vmatprep.subr.bf16.mxu0 %v12363_v56 }
 0x574   :  { %7729 = vmatpush3.bf16.msra.mxu0 %v8170_v25 }
 0x575   :  { %7730 = vmatprep.subr.bf16.mxu0 %v12363_v56 }
 0x578   :  { %7731 = vmatpush3.bf16.msra.mxu0 %v8171_v34 }
 0x579   :  { %7732 = vmatprep.subr.bf16.mxu0 %v12363_v56 }
 0x57c   :  { %7733 = vmatpush3.bf16.msra.mxu0 %v8172_v54 }
 0x5fe   :  { %v7534_v36 = vpop.f32.mrf.mxu0 }
 0x5ff   :  { %v7556_v40 = vpop.f32.mrf.mxu1 }
 0x600   :  { %v7535_v42 = vpop.f32.mrf.mxu0 }
 0x601   :  { %v7557_v60 = vpop.f32.mrf.mxu1  ;;  %v7536_v46 = vadd.f32 %v7535_v42, %v7534_v36 }
 0x602   :  { %v7537_v4 = vpop.f32.mrf.mxu0  ;;  %v7558_v3 = vadd.f32 %v7557_v60, %v7556_v40 }
 0x603   :  { %v7559_v59 = vpop.f32.mrf.mxu1  ;;  %v6228_v55 = vadd.f32 %v7536_v46, %v7410_v48 }
 0x604   :  { %v7538_v28 = vpop.f32.mrf.mxu0 }
 0x605   :  { %v7560_v14 = vpop.f32.mrf.mxu1  ;;  %v6268_v52 = vadd.f32 %v7558_v3, %v6228_v55 }
 0x61e   :  { %v7578_v56 = vpop.f32.mrf.mxu0 }
 0x61f   :  { %v6347_v8 = vpop.f32.mrf.mxu1 }
 0x620   :  { %v7579_v53 = vpop.f32.mrf.mxu0 }
 0x621   :  { %v7580_v38 = vadd.f32 %v7579_v53, %v7578_v56  ;;  %v7716_v49 = vpop.f32.mrf.mxu1 }
 0x622   :  { %v7581_v43 = vpop.f32.mrf.mxu0 }
 0x623   :  { %v6308_v63 = vadd.f32 %v7580_v38, %v6268_v52  ;;  %v6350_v35 = vpop.f32.mrf.mxu1 }
 0x624   :  { %v7582_v23 = vpop.f32.mrf.mxu0 }
 0x625   :  { %v6348_v7 = vadd.f32 %v6347_v8, %v6308_v63  ;;  %v7717_v2 = vpop.f32.mrf.mxu1 }
 0x627   :  { %v6353_v5 = vmax.f32 %v6348_v7, 0.0 }
 0x629   :  { %v6354_v22 = vpack.c.bf16 %v6353_v5, %v6353_v5 }
 0x62b   :  { %7735 = vmatmul.mubr.bf16.vlgmr.msra.gmra.mxu0 %v6354_v22 }
 0x6eb   :  { %v6460_v1 = vpop.f32.mrf.mxu0 }
 0x6ec   :  { %v6461_v51 = vadd.f32 %v7467_v29, %v6460_v1 }
 0x6ed   :  { %v7736_v50 = vpop.f32.mrf.mxu0 }
 0x6ee   :  { %6466 = vst [vmem:[%s12339_s15] sm:$0xff] %v6461_v51 }
 0x6ef   :  { %v6463_v19 = vpop.f32.mrf.mxu0 }
 0x6f1   :  { %v7737_v33 = vpop.f32.mrf.mxu0 }

</bundles_post_ra>
